<compile_context>
chip_gen: v5e
topology: v5e:2x2
jax: 0.10.0
libtpu: 0.0.40
codegen_flags: <defaults>
</compile_context>

<pallas_src>
import jax
import jax.numpy as jnp
import numpy as np
from jax.experimental import pallas as pl
from jax.experimental.pallas import tpu as pltpu


def _round_up(x, m):
    return (x + m - 1) // m * m


def _vmem_capacity_bytes():
    """Best-effort per-core VMEM capacity; conservative (v7x) fallback."""
    try:
        info = pltpu.get_tpu_info()
        cap = getattr(info, "vmem_capacity_bytes", None)
        if cap:
            return int(cap)
    except Exception:
        pass
    return 64 * 1024 * 1024


def _vmem_footprint_bytes(T, Bb, V, Ep, Hp):
    """Estimated VMEM bytes for one grid step (f32 everywhere)."""
    G = 4 * Hp
    resident = V * Ep + Ep * G + Hp * G + G            # weights (single copy)
    pipelined = 2 * Bb * T * V + 2 * Bb * T * Ep + 2 * Bb * Hp   # msg in / emb out / h_out (x2 bufs)
    scratch = 2 * Bb * T * G + 2 * Bb * Hp             # xw skew slots + h/c carries
    return 4 * (resident + pipelined + scratch)


def _pick_seq_block(S, Bb, V, Ep, Hp, budget_bytes, cap=64):
    """Largest chunk length T (multiple of 8 dividing S, or S itself) whose VMEM
    footprint fits the budget.  `cap` bounds the static token-loop unroll; on
    v6e (128 MiB VMEM) it can be raised via the seq_block argument to make
    Bb*T >= 256 rows for the chunk matmuls."""
    cands = [t for t in range(8, cap + 1, 8) if S % t == 0]
    if S <= cap:
        cands.append(S)
    if not cands:
        cands = [next((d for d in range(8, S + 1) if S % d == 0), S)]
    cands = sorted(set(cands))
    best = cands[0]
    for t in cands:
        if _vmem_footprint_bytes(t, Bb, V, Ep, Hp) <= budget_bytes:
            best = t
    return best


def receiver_kernel(msg_ref, emb_w_ref, wih_ref, whh_ref, b_ref,
                    emb_ref, h_out_ref, xw_sc, h_sc, c_sc):
    """One grid step = MXU phase for chunk t + serial recurrence for chunk t-1.

    msg_ref   : (Bb, T, V)       message chunk (native [B, S, V] layout)
    emb_w_ref : (V, Ep)          embedding, E zero-padded to Ep   (VMEM resident)
    wih_ref   : (Ep, 4*Hp)       W_ih^T, gates packed [i,f,o,g]   (VMEM resident)
    whh_ref   : (Hp, 4*Hp)       W_hh^T, packed/padded            (VMEM resident)
    b_ref     : (1, 4*Hp)        b_ih + b_hh, packed/padded       (VMEM resident)
    emb_ref   : (Bb, T, Ep)      per-chunk embedding output (lane-dense)
    h_out_ref : (1, Bb, Hp)      final hidden state (written at last chunk)
    xw_sc     : (2, Bb, T, 4Hp)  double-buffered input-projection scratch (skew)
    h_sc,c_sc : (Bb, Hp)         f32 VMEM recurrence carries
    """
    t_idx = pl.program_id(1)
    n_t = pl.num_programs(1)

    Bb, T, V = msg_ref.shape
    Ep = emb_w_ref.shape[-1]
    Hp = h_sc.shape[-1]
    G = 4 * Hp

    cur = t_idx % 2          # slot that will receive chunk t's xw
    prv = 1 - cur            # slot holding chunk t-1's xw

    @pl.when(t_idx == 0)
    def _():
        h_sc[...] = jnp.zeros_like(h_sc)
        c_sc[...] = jnp.zeros_like(c_sc)
        # Zero the "previous" slot so the unconditional recurrence below is an
        # exact no-op at t==0: with gates == 0, i=f=o=0.5, g=0, so c and h stay
        # exactly 0 through the whole dummy chunk (no reset needed afterwards).
        xw_sc[1] = jnp.zeros(xw_sc.shape[1:], xw_sc.dtype)

    # ---- chunk-level MXU phase for chunk t (pure value compute; the VMEM
    #      writebacks are issued *after* the recurrence loads below so the
    #      scheduler is free to overlap it with the serial chain).
    msg = msg_ref[...].reshape(Bb * T, V)                                   # (Bb*T, V)
    x = jnp.dot(msg, emb_w_ref[...], preferred_element_type=jnp.float32)    # (Bb*T, Ep)
    xw = jnp.dot(x, wih_ref[...], preferred_element_type=jnp.float32) + b_ref[...]

    # ---- serial recurrence over one chunk; gates packed [i | f | o | g] so the
    #      three sigmoids collapse into one EUP launch per token.  Per-token xw
    #      is read from the VMEM scratch (static token index, dynamic slot) so
    #      live ranges stay bounded even for large T.
    def run_chunk(slot, h, c):
        whh = whh_ref[...]
        for tok in range(T):
            x_t = xw_sc[slot, :, tok, :]                                    # (Bb, G)
            gates = jnp.dot(h, whh, preferred_element_type=jnp.float32) + x_t
            sig = jax.nn.sigmoid(gates[:, :3 * Hp])                         # i | f | o
            g_g = jnp.tanh(gates[:, 3 * Hp:])
            c = sig[:, Hp:2 * Hp] * c + sig[:, :Hp] * g_g
            h = sig[:, 2 * Hp:3 * Hp] * jnp.tanh(c)
        return h, c

    # Recurrence for chunk t-1 (exact no-op at t == 0, see init above).
    h, c = run_chunk(prv, h_sc[...], c_sc[...])
    h_sc[...] = h
    c_sc[...] = c

    # ---- writebacks for chunk t (ordered after the xw_sc[prv] loads above, so
    #      they cannot force the recurrence to wait on the big matmuls).
    emb_ref[...] = x.reshape(Bb, T, Ep).astype(emb_ref.dtype)
    xw_sc[cur] = xw.reshape(Bb, T, G)

    # ---- last chunk: also run its recurrence and emit the final hidden state.
    @pl.when(t_idx == n_t - 1)
    def _():
        h_last, _ = run_chunk(cur, h, c)
        h_out_ref[0] = h_last.astype(h_out_ref.dtype)


def receiver_forward(messages, embedding, w_ih, w_hh, b_ih, b_hh,
                     *, seq_block=None, batch_blocks=1):
    """messages: [B, S, V] float32.  Returns (h_final [B, H], emb [B, S, E]).

    batch_blocks: split the batch across this many grid blocks (set to 2 on a
    v7x megacore chip, keeping Bb >= 8 if possible; leave at 1 on v5e/v6e).
    seq_block: override the automatically budgeted sequence chunk length.
    """
    B, S, V = messages.shape
    E = embedding.shape[1]
    H = w_hh.shape[1]
    Hp = _round_up(H, 128)                      # lane-dense gate slices / h stores
    Ep = _round_up(E, 128)                      # lane-dense emb writeback
    G = 4 * Hp

    NB = batch_blocks
    assert B % NB == 0, "batch_blocks must divide batch size"
    Bb = B // NB

    cap_bytes = _vmem_capacity_bytes()
    if seq_block is not None:
        T = seq_block
    else:
        T = _pick_seq_block(S, Bb, V, Ep, Hp, budget_bytes=int(0.70 * cap_bytes))
    assert S % T == 0, "sequence chunk must divide S"

    footprint = _vmem_footprint_bytes(T, Bb, V, Ep, Hp)
    vmem_limit = int(max(32 << 20, min(int(0.90 * cap_bytes), footprint + (8 << 20))))

    # --- repack gates [i, f, g, o] -> [i, f, o, g] and zero-pad H -> Hp, E -> Ep.
    # Padded gate columns have zero weight and zero bias, so their c/h stay
    # exactly 0 forever; padded W_hh^T / W_ih^T rows are zero, so real outputs
    # are unaffected.
    perm = jnp.array([0, 1, 3, 2], dtype=jnp.int32)

    emb_w = embedding if Ep == E else jnp.pad(embedding, ((0, 0), (0, Ep - E)))

    wih = jnp.pad(w_ih.reshape(4, H, E)[perm],
                  ((0, 0), (0, Hp - H), (0, Ep - E)))                  # (4, Hp, Ep)
    wih_t = jnp.transpose(wih, (2, 0, 1)).reshape(Ep, G)               # (Ep, 4Hp)

    whh = jnp.pad(w_hh.reshape(4, H, H)[perm],
                  ((0, 0), (0, Hp - H), (0, Hp - H)))                  # (4, Hp, Hp)
    whh_t = jnp.transpose(whh, (2, 0, 1)).reshape(Hp, G)               # (Hp, 4Hp)

    bias = jnp.pad((b_ih + b_hh).reshape(4, H)[perm],
                   ((0, 0), (0, Hp - H))).reshape(1, G)                # (1, 4Hp)

    # Whole-array VMEM residents for constant weights: no block_shape => fetched
    # once, single copy (not part of the double-buffered pipeline).
    vmem_ws = pl.BlockSpec(memory_space=pltpu.MemorySpace.VMEM)

    grid_spec = pltpu.PrefetchScalarGridSpec(
        num_scalar_prefetch=0,
        grid=(NB, S // T),
        in_specs=[
            pl.BlockSpec((Bb, T, V), lambda nb, t: (nb, t, 0)),        # messages chunk
            vmem_ws,                                                   # embedding (V, Ep)
            vmem_ws,                                                   # W_ih^T    (Ep, 4Hp)
            vmem_ws,                                                   # W_hh^T    (Hp, 4Hp)
            vmem_ws,                                                   # bias      (1, 4Hp)
        ],
        out_specs=[
            pl.BlockSpec((Bb, T, Ep), lambda nb, t: (nb, t, 0)),       # emb chunk (lane-dense)
            pl.BlockSpec((1, Bb, Hp), lambda nb, t: (nb, 0, 0)),       # final h (resident)
        ],
        scratch_shapes=[
            pltpu.VMEM((2, Bb, T, G), jnp.float32),                    # xw skew buffers
            pltpu.VMEM((Bb, Hp), jnp.float32),                         # h carry
            pltpu.VMEM((Bb, Hp), jnp.float32),                         # c carry
        ],
    )

    emb_p, h_out = pl.pallas_call(
        receiver_kernel,
        out_shape=(
            jax.ShapeDtypeStruct((B, S, Ep), jnp.float32),
            jax.ShapeDtypeStruct((NB, Bb, Hp), jnp.float32),
        ),
        grid_spec=grid_spec,
        compiler_params=pltpu.CompilerParams(
            # Batch blocks are independent (per-core h/c/xw scratch) -> parallel.
            # The sequence axis is a true recurrence -> MUST stay arbitrary.
            dimension_semantics=("parallel", "arbitrary"),
            vmem_limit_bytes=vmem_limit,
        ),
    )(messages, emb_w, wih_t, whh_t, bias)

    h_full = h_out.reshape(B, Hp)
    h_final = h_full if Hp == H else h_full[:, :H]
    emb = emb_p if Ep == E else emb_p[:, :, :E]
    return h_final, emb


def init_params(key, vocab_size, embedding_size, hidden_size):
    """Deterministic synthetic init mirroring Receiver.reset_parameters shapes."""
    k_emb, k_ih, k_hh = jax.random.split(key, 3)
    embedding = 0.1 * jax.random.normal(k_emb, (vocab_size, embedding_size), jnp.float32)

    fan_in, fan_out = embedding_size, 4 * hidden_size
    bound = float(np.sqrt(6.0 / (fan_in + fan_out)))
    w_ih = jax.random.uniform(k_ih, (4 * hidden_size, embedding_size),
                              jnp.float32, minval=-bound, maxval=bound)

    qs = []
    for i in range(4):
        a = jax.random.normal(jax.random.fold_in(k_hh, i),
                              (hidden_size, hidden_size), jnp.float32)
        q, r = jnp.linalg.qr(a)
        q = q * jnp.sign(jnp.diag(r))[None, :]
        qs.append(q)
    w_hh = jnp.concatenate(qs, axis=0)                        # (4H, H)

    b_ih = jnp.zeros((4 * hidden_size,), jnp.float32)
    b_hh = jnp.zeros((4 * hidden_size,), jnp.float32)
    b_hh = b_hh.at[hidden_size:2 * hidden_size].set(1.0)      # forget-gate bias = 1
    return embedding, w_ih, w_hh, b_ih, b_hh


def reference_forward(messages, embedding, w_ih, w_hh, b_ih, b_hh):
    """Pure-JAX reference of the PyTorch forward (gate order i, f, g, o)."""
    B = messages.shape[0]
    H = w_hh.shape[1]
    emb = jnp.einsum('bsv,ve->bse', messages, embedding)
    h = jnp.zeros((B, H), jnp.float32)
    c = jnp.zeros((B, H), jnp.float32)
    for t in range(messages.shape[1]):
        x = emb[:, t, :]
        gates = x @ w_ih.T + b_ih + h @ w_hh.T + b_hh
        i_g = jax.nn.sigmoid(gates[:, 0 * H:1 * H])
        f_g = jax.nn.sigmoid(gates[:, 1 * H:2 * H])
        g_g = jnp.tanh(gates[:, 2 * H:3 * H])
        o_g = jax.nn.sigmoid(gates[:, 3 * H:4 * H])
        c = f_g * c + i_g * g_g
        h = o_g * jnp.tanh(c)
    return h, emb


if __name__ == "__main__":
    V, E, H = 16, 32, 64
    key = jax.random.PRNGKey(0)
    k_params, k_msg = jax.random.split(key)
    embedding, w_ih, w_hh, b_ih, b_hh = init_params(k_params, V, E, H)

    # --- Test A: single chunk, single batch block (B=2, S=8). ---
    B, S = 2, 8
    tokens = jax.random.randint(k_msg, (B, S), 0, V)
    messages = jax.nn.one_hot(tokens, V, dtype=jnp.float32)

    h_ref, emb_ref = reference_forward(messages, embedding, w_ih, w_hh, b_ih, b_hh)
    h_out, emb_out = receiver_forward(messages, embedding, w_ih, w_hh, b_ih, b_hh)
    jax.block_until_ready((h_out, emb_out))
    np.testing.assert_allclose(np.asarray(emb_out), np.asarray(emb_ref), atol=1e-5, rtol=1e-5)
    np.testing.assert_allclose(np.asarray(h_out), np.asarray(h_ref), atol=1e-4, rtol=1e-4)

    # --- Test B: multi-chunk pipeline skew + batch split (B=4, S=16, T=8, NB=2). ---
    B2, S2 = 4, 16
    tokens2 = jax.random.randint(jax.random.fold_in(k_msg, 1), (B2, S2), 0, V)
    messages2 = jax.nn.one_hot(tokens2, V, dtype=jnp.float32)

    h_ref2, emb_ref2 = reference_forward(messages2, embedding, w_ih, w_hh, b_ih, b_hh)
    h_out2, emb_out2 = receiver_forward(messages2, embedding, w_ih, w_hh, b_ih, b_hh,
                                        seq_block=8, batch_blocks=2)
    jax.block_until_ready((h_out2, emb_out2))
    np.testing.assert_allclose(np.asarray(emb_out2), np.asarray(emb_ref2), atol=1e-5, rtol=1e-5)
    np.testing.assert_allclose(np.asarray(h_out2), np.asarray(h_ref2), atol=1e-4, rtol=1e-4)

    print("KERNEL_OK")
</pallas_src>

<mosaic_0001>
module attributes {stable_mosaic.version = 11 : i64} {
  func.func @receiver_kernel(%arg0: i32, %arg1: i32, %arg2: memref<2x8x16xf32, #tpu.memory_space<vmem>>, %arg3: memref<16x128xf32, #tpu.memory_space<vmem>>, %arg4: memref<128x512xf32, #tpu.memory_space<vmem>>, %arg5: memref<128x512xf32, #tpu.memory_space<vmem>>, %arg6: memref<1x512xf32, #tpu.memory_space<vmem>>, %arg7: memref<2x8x128xf32, #tpu.memory_space<vmem>>, %arg8: memref<1x2x128xf32, #tpu.memory_space<vmem>>, %arg9: memref<2x2x8x512xf32, #tpu.memory_space<vmem>>, %arg10: memref<2x128xf32, #tpu.memory_space<vmem>>, %arg11: memref<2x128xf32, #tpu.memory_space<vmem>>) attributes {dimension_semantics = [#tpu.dimension_semantics<parallel>, #tpu.dimension_semantics<arbitrary>], iteration_bounds = array<i64: 1, 1>, scalar_prefetch = 0 : i64, scratch_operands = 3 : i64, tpu.core_type = #tpu.core_type<tc>, window_params = [{transform_indices = @transform_0, window_bounds = array<i64: 2, 8, 16>}, {pipeline_mode = #tpu.pipeline_mode<synchronous>, transform_indices = @transform_1, window_bounds = array<i64: 16, 128>}, {pipeline_mode = #tpu.pipeline_mode<synchronous>, transform_indices = @transform_2, window_bounds = array<i64: 128, 512>}, {pipeline_mode = #tpu.pipeline_mode<synchronous>, transform_indices = @transform_3, window_bounds = array<i64: 128, 512>}, {pipeline_mode = #tpu.pipeline_mode<synchronous>, transform_indices = @transform_4, window_bounds = array<i64: 1, 512>}, {transform_indices = @transform_5, window_bounds = array<i64: 2, 8, 128>}, {transform_indices = @transform_6, window_bounds = array<i64: 1, 2, 128>}]} {
    %c2_i32 = arith.constant 2 : i32
    %c0_i32 = arith.constant 0 : i32
    %0 = arith.cmpi eq, %c2_i32, %c0_i32 : i32
    %c1_i32 = arith.constant 1 : i32
    %1 = arith.select %0, %c1_i32, %c2_i32 : i32
    %2 = arith.remsi %arg1, %1 : i32
    %c0_i32_0 = arith.constant 0 : i32
    %3 = arith.cmpi ne, %2, %c0_i32_0 : i32
    %c0_i32_1 = arith.constant 0 : i32
    %4 = arith.cmpi slt, %2, %c0_i32_1 : i32
    %c0_i32_2 = arith.constant 0 : i32
    %5 = arith.cmpi slt, %1, %c0_i32_2 : i32
    %6 = arith.xori %4, %5 : i1
    %7 = arith.andi %6, %3 : i1
    %8 = arith.addi %2, %1 : i32
    %9 = arith.select %7, %8, %2 : i32
    %c1_i32_3 = arith.constant 1 : i32
    %10 = arith.subi %c1_i32_3, %9 : i32
    %c0_i32_4 = arith.constant 0 : i32
    %11 = arith.cmpi eq, %arg1, %c0_i32_4 : i32
    %12 = arith.extui %11 : i1 to i32
    %c0_i32_5 = arith.constant 0 : i32
    %13 = arith.cmpi ne, %12, %c0_i32_5 : i32
    scf.if %13 {
      %cst_66 = arith.constant 0.000000e+00 : f32
      %206 = vector.broadcast %cst_66 : f32 to vector<2x128xf32>
      %c0_67 = arith.constant 0 : index
      %c0_68 = arith.constant 0 : index
      %207 = vector.load %arg10[%c0_67, %c0_68] : memref<2x128xf32, #tpu.memory_space<vmem>>, vector<2x128xf32>
      tpu.vector_store %arg10[%c0_67, %c0_68], %206 {strides = array<i32>} : memref<2x128xf32, #tpu.memory_space<vmem>>, vector<2x128xf32>,
      %cst_69 = arith.constant 0.000000e+00 : f32
      %208 = vector.broadcast %cst_69 : f32 to vector<2x128xf32>
      %c0_70 = arith.constant 0 : index
      %c0_71 = arith.constant 0 : index
      %209 = vector.load %arg11[%c0_70, %c0_71] : memref<2x128xf32, #tpu.memory_space<vmem>>, vector<2x128xf32>
      tpu.vector_store %arg11[%c0_70, %c0_71], %208 {strides = array<i32>} : memref<2x128xf32, #tpu.memory_space<vmem>>, vector<2x128xf32>,
      %cst_72 = arith.constant 0.000000e+00 : f32
      %210 = vector.broadcast %cst_72 : f32 to vector<2x8x512xf32>
      %c1_73 = arith.constant 1 : index
      %c0_74 = arith.constant 0 : index
      %c0_75 = arith.constant 0 : index
      %c0_76 = arith.constant 0 : index
      %211 = vector.load %arg9[%c1_73, %c0_74, %c0_75, %c0_76] : memref<2x2x8x512xf32, #tpu.memory_space<vmem>>, vector<1x2x8x512xf32>
      %212 = vector.shape_cast %211 : vector<1x2x8x512xf32> to vector<2x8x512xf32>
      %213 = vector.shape_cast %210 : vector<2x8x512xf32> to vector<1x2x8x512xf32>
      tpu.vector_store %arg9[%c1_73, %c0_74, %c0_75, %c0_76], %213 {strides = array<i32>} : memref<2x2x8x512xf32, #tpu.memory_space<vmem>>, vector<1x2x8x512xf32>,
    } else {
    }
    %c0 = arith.constant 0 : index
    %c0_6 = arith.constant 0 : index
    %c0_7 = arith.constant 0 : index
    %14 = vector.load %arg2[%c0, %c0_6, %c0_7] : memref<2x8x16xf32, #tpu.memory_space<vmem>>, vector<2x8x16xf32>
    %15 = vector.shape_cast %14 : vector<2x8x16xf32> to vector<16x16xf32>
    %c0_8 = arith.constant 0 : index
    %c0_9 = arith.constant 0 : index
    %16 = vector.load %arg3[%c0_8, %c0_9] : memref<16x128xf32, #tpu.memory_space<vmem>>, vector<16x128xf32>
    %cst = arith.constant dense<0.000000e+00> : vector<16x128xf32>
    %17 = tpu.matmul %15, %16, %cst {dimension_numbers = #tpu.dot_dimension_numbers<[1], [0], [0], [1], [0, 0, 1, 1], [], []>} : vector<16x16xf32>, vector<16x128xf32>, vector<16x128xf32> -> vector<16x128xf32>
    %c0_10 = arith.constant 0 : index
    %c0_11 = arith.constant 0 : index
    %18 = vector.load %arg4[%c0_10, %c0_11] : memref<128x512xf32, #tpu.memory_space<vmem>>, vector<128x512xf32>
    %cst_12 = arith.constant dense<0.000000e+00> : vector<16x512xf32>
    %19 = tpu.matmul %17, %18, %cst_12 {dimension_numbers = #tpu.dot_dimension_numbers<[1], [0], [0], [1], [0, 0, 1, 1], [], []>} : vector<16x128xf32>, vector<128x512xf32>, vector<16x512xf32> -> vector<16x512xf32>
    %c0_13 = arith.constant 0 : index
    %c0_14 = arith.constant 0 : index
    %20 = vector.load %arg6[%c0_13, %c0_14] : memref<1x512xf32, #tpu.memory_space<vmem>>, vector<1x512xf32>
    %21 = vector.broadcast %20 : vector<1x512xf32> to vector<16x512xf32>
    %22 = arith.addf %19, %21 : vector<16x512xf32>
    %c0_15 = arith.constant 0 : index
    %c0_16 = arith.constant 0 : index
    %23 = vector.load %arg10[%c0_15, %c0_16] : memref<2x128xf32, #tpu.memory_space<vmem>>, vector<2x128xf32>
    %c0_17 = arith.constant 0 : index
    %c0_18 = arith.constant 0 : index
    %24 = vector.load %arg11[%c0_17, %c0_18] : memref<2x128xf32, #tpu.memory_space<vmem>>, vector<2x128xf32>
    %c0_19 = arith.constant 0 : index
    %c0_20 = arith.constant 0 : index
    %25 = vector.load %arg5[%c0_19, %c0_20] : memref<128x512xf32, #tpu.memory_space<vmem>>, vector<128x512xf32>
    %26 = arith.index_cast %10 : i32 to index
    %c0_21 = arith.constant 0 : index
    %c0_22 = arith.constant 0 : index
    %c0_23 = arith.constant 0 : index
    %27 = vector.load %arg9[%26, %c0_21, %c0_22, %c0_23] : memref<2x2x8x512xf32, #tpu.memory_space<vmem>>, vector<1x2x1x512xf32>
    %28 = vector.shape_cast %27 : vector<1x2x1x512xf32> to vector<2x512xf32>
    %cst_24 = arith.constant dense<0.000000e+00> : vector<2x512xf32>
    %29 = tpu.matmul %23, %25, %cst_24 {dimension_numbers = #tpu.dot_dimension_numbers<[1], [0], [0], [1], [0, 0, 1, 1], [], []>} : vector<2x128xf32>, vector<128x512xf32>, vector<2x512xf32> -> vector<2x512xf32>
    %30 = arith.addf %29, %28 : vector<2x512xf32>
    %31 = vector.extract_strided_slice %30 {offsets = [0, 0], sizes = [2, 384], strides = [1, 1]} : vector<2x512xf32> to vector<2x384xf32>
    %32 = arith.negf %31 : vector<2x384xf32>
    %33 = math.exp %32 : vector<2x384xf32>
    %cst_25 = arith.constant 1.000000e+00 : f32
    %34 = vector.broadcast %cst_25 : f32 to vector<2x384xf32>
    %35 = arith.addf %34, %33 : vector<2x384xf32>
    %36 = arith.divf %34, %35 : vector<2x384xf32>
    %37 = vector.extract_strided_slice %30 {offsets = [0, 384], sizes = [2, 128], strides = [1, 1]} : vector<2x512xf32> to vector<2x128xf32>
    %38 = math.tanh %37 : vector<2x128xf32>
    %39 = vector.extract_strided_slice %36 {offsets = [0, 128], sizes = [2, 128], strides = [1, 1]} : vector<2x384xf32> to vector<2x128xf32>
    %40 = arith.mulf %39, %24 : vector<2x128xf32>
    %41 = vector.extract_strided_slice %36 {offsets = [0, 0], sizes = [2, 128], strides = [1, 1]} : vector<2x384xf32> to vector<2x128xf32>
    %42 = arith.mulf %41, %38 : vector<2x128xf32>
    %43 = arith.addf %40, %42 : vector<2x128xf32>
    %44 = vector.extract_strided_slice %36 {offsets = [0, 256], sizes = [2, 128], strides = [1, 1]} : vector<2x384xf32> to vector<2x128xf32>
    %45 = math.tanh %43 : vector<2x128xf32>
    %46 = arith.mulf %44, %45 : vector<2x128xf32>
    %47 = arith.index_cast %10 : i32 to index
    %c0_26 = arith.constant 0 : index
    %c1 = arith.constant 1 : index
    %c0_27 = arith.constant 0 : index
    %48 = vector.load %arg9[%47, %c0_26, %c1, %c0_27] : memref<2x2x8x512xf32, #tpu.memory_space<vmem>>, vector<1x2x1x512xf32>
    %49 = vector.shape_cast %48 : vector<1x2x1x512xf32> to vector<2x512xf32>
    %cst_28 = arith.constant dense<0.000000e+00> : vector<2x512xf32>
    %50 = tpu.matmul %46, %25, %cst_28 {dimension_numbers = #tpu.dot_dimension_numbers<[1], [0], [0], [1], [0, 0, 1, 1], [], []>} : vector<2x128xf32>, vector<128x512xf32>, vector<2x512xf32> -> vector<2x512xf32>
    %51 = arith.addf %50, %49 : vector<2x512xf32>
    %52 = vector.extract_strided_slice %51 {offsets = [0, 0], sizes = [2, 384], strides = [1, 1]} : vector<2x512xf32> to vector<2x384xf32>
    %53 = arith.negf %52 : vector<2x384xf32>
    %54 = math.exp %53 : vector<2x384xf32>
    %cst_29 = arith.constant 1.000000e+00 : f32
    %55 = vector.broadcast %cst_29 : f32 to vector<2x384xf32>
    %56 = arith.addf %55, %54 : vector<2x384xf32>
    %57 = arith.divf %55, %56 : vector<2x384xf32>
    %58 = vector.extract_strided_slice %51 {offsets = [0, 384], sizes = [2, 128], strides = [1, 1]} : vector<2x512xf32> to vector<2x128xf32>
    %59 = math.tanh %58 : vector<2x128xf32>
    %60 = vector.extract_strided_slice %57 {offsets = [0, 128], sizes = [2, 128], strides = [1, 1]} : vector<2x384xf32> to vector<2x128xf32>
    %61 = arith.mulf %60, %43 : vector<2x128xf32>
    %62 = vector.extract_strided_slice %57 {offsets = [0, 0], sizes = [2, 128], strides = [1, 1]} : vector<2x384xf32> to vector<2x128xf32>
    %63 = arith.mulf %62, %59 : vector<2x128xf32>
    %64 = arith.addf %61, %63 : vector<2x128xf32>
    %65 = vector.extract_strided_slice %57 {offsets = [0, 256], sizes = [2, 128], strides = [1, 1]} : vector<2x384xf32> to vector<2x128xf32>
    %66 = math.tanh %64 : vector<2x128xf32>
    %67 = arith.mulf %65, %66 : vector<2x128xf32>
    %68 = arith.index_cast %10 : i32 to index
    %c0_30 = arith.constant 0 : index
    %c2 = arith.constant 2 : index
    %c0_31 = arith.constant 0 : index
    %69 = vector.load %arg9[%68, %c0_30, %c2, %c0_31] : memref<2x2x8x512xf32, #tpu.memory_space<vmem>>, vector<1x2x1x512xf32>
    %70 = vector.shape_cast %69 : vector<1x2x1x512xf32> to vector<2x512xf32>
    %cst_32 = arith.constant dense<0.000000e+00> : vector<2x512xf32>
    %71 = tpu.matmul %67, %25, %cst_32 {dimension_numbers = #tpu.dot_dimension_numbers<[1], [0], [0], [1], [0, 0, 1, 1], [], []>} : vector<2x128xf32>, vector<128x512xf32>, vector<2x512xf32> -> vector<2x512xf32>
    %72 = arith.addf %71, %70 : vector<2x512xf32>
    %73 = vector.extract_strided_slice %72 {offsets = [0, 0], sizes = [2, 384], strides = [1, 1]} : vector<2x512xf32> to vector<2x384xf32>
    %74 = arith.negf %73 : vector<2x384xf32>
    %75 = math.exp %74 : vector<2x384xf32>
    %cst_33 = arith.constant 1.000000e+00 : f32
    %76 = vector.broadcast %cst_33 : f32 to vector<2x384xf32>
    %77 = arith.addf %76, %75 : vector<2x384xf32>
    %78 = arith.divf %76, %77 : vector<2x384xf32>
    %79 = vector.extract_strided_slice %72 {offsets = [0, 384], sizes = [2, 128], strides = [1, 1]} : vector<2x512xf32> to vector<2x128xf32>
    %80 = math.tanh %79 : vector<2x128xf32>
    %81 = vector.extract_strided_slice %78 {offsets = [0, 128], sizes = [2, 128], strides = [1, 1]} : vector<2x384xf32> to vector<2x128xf32>
    %82 = arith.mulf %81, %64 : vector<2x128xf32>
    %83 = vector.extract_strided_slice %78 {offsets = [0, 0], sizes = [2, 128], strides = [1, 1]} : vector<2x384xf32> to vector<2x128xf32>
    %84 = arith.mulf %83, %80 : vector<2x128xf32>
    %85 = arith.addf %82, %84 : vector<2x128xf32>
    %86 = vector.extract_strided_slice %78 {offsets = [0, 256], sizes = [2, 128], strides = [1, 1]} : vector<2x384xf32> to vector<2x128xf32>
    %87 = math.tanh %85 : vector<2x128xf32>
    %88 = arith.mulf %86, %87 : vector<2x128xf32>
    %89 = arith.index_cast %10 : i32 to index
    %c0_34 = arith.constant 0 : index
    %c3 = arith.constant 3 : index
    %c0_35 = arith.constant 0 : index
    %90 = vector.load %arg9[%89, %c0_34, %c3, %c0_35] : memref<2x2x8x512xf32, #tpu.memory_space<vmem>>, vector<1x2x1x512xf32>
    %91 = vector.shape_cast %90 : vector<1x2x1x512xf32> to vector<2x512xf32>
    %cst_36 = arith.constant dense<0.000000e+00> : vector<2x512xf32>
    %92 = tpu.matmul %88, %25, %cst_36 {dimension_numbers = #tpu.dot_dimension_numbers<[1], [0], [0], [1], [0, 0, 1, 1], [], []>} : vector<2x128xf32>, vector<128x512xf32>, vector<2x512xf32> -> vector<2x512xf32>
    %93 = arith.addf %92, %91 : vector<2x512xf32>
    %94 = vector.extract_strided_slice %93 {offsets = [0, 0], sizes = [2, 384], strides = [1, 1]} : vector<2x512xf32> to vector<2x384xf32>
    %95 = arith.negf %94 : vector<2x384xf32>
    %96 = math.exp %95 : vector<2x384xf32>
    %cst_37 = arith.constant 1.000000e+00 : f32
    %97 = vector.broadcast %cst_37 : f32 to vector<2x384xf32>
    %98 = arith.addf %97, %96 : vector<2x384xf32>
    %99 = arith.divf %97, %98 : vector<2x384xf32>
    %100 = vector.extract_strided_slice %93 {offsets = [0, 384], sizes = [2, 128], strides = [1, 1]} : vector<2x512xf32> to vector<2x128xf32>
    %101 = math.tanh %100 : vector<2x128xf32>
    %102 = vector.extract_strided_slice %99 {offsets = [0, 128], sizes = [2, 128], strides = [1, 1]} : vector<2x384xf32> to vector<2x128xf32>
    %103 = arith.mulf %102, %85 : vector<2x128xf32>
    %104 = vector.extract_strided_slice %99 {offsets = [0, 0], sizes = [2, 128], strides = [1, 1]} : vector<2x384xf32> to vector<2x128xf32>
    %105 = arith.mulf %104, %101 : vector<2x128xf32>
    %106 = arith.addf %103, %105 : vector<2x128xf32>
    %107 = vector.extract_strided_slice %99 {offsets = [0, 256], sizes = [2, 128], strides = [1, 1]} : vector<2x384xf32> to vector<2x128xf32>
    %108 = math.tanh %106 : vector<2x128xf32>
    %109 = arith.mulf %107, %108 : vector<2x128xf32>
    %110 = arith.index_cast %10 : i32 to index
    %c0_38 = arith.constant 0 : index
    %c4 = arith.constant 4 : index
    %c0_39 = arith.constant 0 : index
    %111 = vector.load %arg9[%110, %c0_38, %c4, %c0_39] : memref<2x2x8x512xf32, #tpu.memory_space<vmem>>, vector<1x2x1x512xf32>
    %112 = vector.shape_cast %111 : vector<1x2x1x512xf32> to vector<2x512xf32>
    %cst_40 = arith.constant dense<0.000000e+00> : vector<2x512xf32>
    %113 = tpu.matmul %109, %25, %cst_40 {dimension_numbers = #tpu.dot_dimension_numbers<[1], [0], [0], [1], [0, 0, 1, 1], [], []>} : vector<2x128xf32>, vector<128x512xf32>, vector<2x512xf32> -> vector<2x512xf32>
    %114 = arith.addf %113, %112 : vector<2x512xf32>
    %115 = vector.extract_strided_slice %114 {offsets = [0, 0], sizes = [2, 384], strides = [1, 1]} : vector<2x512xf32> to vector<2x384xf32>
    %116 = arith.negf %115 : vector<2x384xf32>
    %117 = math.exp %116 : vector<2x384xf32>
    %cst_41 = arith.constant 1.000000e+00 : f32
    %118 = vector.broadcast %cst_41 : f32 to vector<2x384xf32>
    %119 = arith.addf %118, %117 : vector<2x384xf32>
    %120 = arith.divf %118, %119 : vector<2x384xf32>
    %121 = vector.extract_strided_slice %114 {offsets = [0, 384], sizes = [2, 128], strides = [1, 1]} : vector<2x512xf32> to vector<2x128xf32>
    %122 = math.tanh %121 : vector<2x128xf32>
    %123 = vector.extract_strided_slice %120 {offsets = [0, 128], sizes = [2, 128], strides = [1, 1]} : vector<2x384xf32> to vector<2x128xf32>
    %124 = arith.mulf %123, %106 : vector<2x128xf32>
    %125 = vector.extract_strided_slice %120 {offsets = [0, 0], sizes = [2, 128], strides = [1, 1]} : vector<2x384xf32> to vector<2x128xf32>
    %126 = arith.mulf %125, %122 : vector<2x128xf32>
    %127 = arith.addf %124, %126 : vector<2x128xf32>
    %128 = vector.extract_strided_slice %120 {offsets = [0, 256], sizes = [2, 128], strides = [1, 1]} : vector<2x384xf32> to vector<2x128xf32>
    %129 = math.tanh %127 : vector<2x128xf32>
    %130 = arith.mulf %128, %129 : vector<2x128xf32>
    %131 = arith.index_cast %10 : i32 to index
    %c0_42 = arith.constant 0 : index
    %c5 = arith.constant 5 : index
    %c0_43 = arith.constant 0 : index
    %132 = vector.load %arg9[%131, %c0_42, %c5, %c0_43] : memref<2x2x8x512xf32, #tpu.memory_space<vmem>>, vector<1x2x1x512xf32>
    %133 = vector.shape_cast %132 : vector<1x2x1x512xf32> to vector<2x512xf32>
    %cst_44 = arith.constant dense<0.000000e+00> : vector<2x512xf32>
    %134 = tpu.matmul %130, %25, %cst_44 {dimension_numbers = #tpu.dot_dimension_numbers<[1], [0], [0], [1], [0, 0, 1, 1], [], []>} : vector<2x128xf32>, vector<128x512xf32>, vector<2x512xf32> -> vector<2x512xf32>
    %135 = arith.addf %134, %133 : vector<2x512xf32>
    %136 = vector.extract_strided_slice %135 {offsets = [0, 0], sizes = [2, 384], strides = [1, 1]} : vector<2x512xf32> to vector<2x384xf32>
    %137 = arith.negf %136 : vector<2x384xf32>
    %138 = math.exp %137 : vector<2x384xf32>
    %cst_45 = arith.constant 1.000000e+00 : f32
    %139 = vector.broadcast %cst_45 : f32 to vector<2x384xf32>
    %140 = arith.addf %139, %138 : vector<2x384xf32>
    %141 = arith.divf %139, %140 : vector<2x384xf32>
    %142 = vector.extract_strided_slice %135 {offsets = [0, 384], sizes = [2, 128], strides = [1, 1]} : vector<2x512xf32> to vector<2x128xf32>
    %143 = math.tanh %142 : vector<2x128xf32>
    %144 = vector.extract_strided_slice %141 {offsets = [0, 128], sizes = [2, 128], strides = [1, 1]} : vector<2x384xf32> to vector<2x128xf32>
    %145 = arith.mulf %144, %127 : vector<2x128xf32>
    %146 = vector.extract_strided_slice %141 {offsets = [0, 0], sizes = [2, 128], strides = [1, 1]} : vector<2x384xf32> to vector<2x128xf32>
    %147 = arith.mulf %146, %143 : vector<2x128xf32>
    %148 = arith.addf %145, %147 : vector<2x128xf32>
    %149 = vector.extract_strided_slice %141 {offsets = [0, 256], sizes = [2, 128], strides = [1, 1]} : vector<2x384xf32> to vector<2x128xf32>
    %150 = math.tanh %148 : vector<2x128xf32>
    %151 = arith.mulf %149, %150 : vector<2x128xf32>
    %152 = arith.index_cast %10 : i32 to index
    %c0_46 = arith.constant 0 : index
    %c6 = arith.constant 6 : index
    %c0_47 = arith.constant 0 : index
    %153 = vector.load %arg9[%152, %c0_46, %c6, %c0_47] : memref<2x2x8x512xf32, #tpu.memory_space<vmem>>, vector<1x2x1x512xf32>
    %154 = vector.shape_cast %153 : vector<1x2x1x512xf32> to vector<2x512xf32>
    %cst_48 = arith.constant dense<0.000000e+00> : vector<2x512xf32>
    %155 = tpu.matmul %151, %25, %cst_48 {dimension_numbers = #tpu.dot_dimension_numbers<[1], [0], [0], [1], [0, 0, 1, 1], [], []>} : vector<2x128xf32>, vector<128x512xf32>, vector<2x512xf32> -> vector<2x512xf32>
    %156 = arith.addf %155, %154 : vector<2x512xf32>
    %157 = vector.extract_strided_slice %156 {offsets = [0, 0], sizes = [2, 384], strides = [1, 1]} : vector<2x512xf32> to vector<2x384xf32>
    %158 = arith.negf %157 : vector<2x384xf32>
    %159 = math.exp %158 : vector<2x384xf32>
    %cst_49 = arith.constant 1.000000e+00 : f32
    %160 = vector.broadcast %cst_49 : f32 to vector<2x384xf32>
    %161 = arith.addf %160, %159 : vector<2x384xf32>
    %162 = arith.divf %160, %161 : vector<2x384xf32>
    %163 = vector.extract_strided_slice %156 {offsets = [0, 384], sizes = [2, 128], strides = [1, 1]} : vector<2x512xf32> to vector<2x128xf32>
    %164 = math.tanh %163 : vector<2x128xf32>
    %165 = vector.extract_strided_slice %162 {offsets = [0, 128], sizes = [2, 128], strides = [1, 1]} : vector<2x384xf32> to vector<2x128xf32>
    %166 = arith.mulf %165, %148 : vector<2x128xf32>
    %167 = vector.extract_strided_slice %162 {offsets = [0, 0], sizes = [2, 128], strides = [1, 1]} : vector<2x384xf32> to vector<2x128xf32>
    %168 = arith.mulf %167, %164 : vector<2x128xf32>
    %169 = arith.addf %166, %168 : vector<2x128xf32>
    %170 = vector.extract_strided_slice %162 {offsets = [0, 256], sizes = [2, 128], strides = [1, 1]} : vector<2x384xf32> to vector<2x128xf32>
    %171 = math.tanh %169 : vector<2x128xf32>
    %172 = arith.mulf %170, %171 : vector<2x128xf32>
    %173 = arith.index_cast %10 : i32 to index
    %c0_50 = arith.constant 0 : index
    %c7 = arith.constant 7 : index
    %c0_51 = arith.constant 0 : index
    %174 = vector.load %arg9[%173, %c0_50, %c7, %c0_51] : memref<2x2x8x512xf32, #tpu.memory_space<vmem>>, vector<1x2x1x512xf32>
    %175 = vector.shape_cast %174 : vector<1x2x1x512xf32> to vector<2x512xf32>
    %cst_52 = arith.constant dense<0.000000e+00> : vector<2x512xf32>
    %176 = tpu.matmul %172, %25, %cst_52 {dimension_numbers = #tpu.dot_dimension_numbers<[1], [0], [0], [1], [0, 0, 1, 1], [], []>} : vector<2x128xf32>, vector<128x512xf32>, vector<2x512xf32> -> vector<2x512xf32>
    %177 = arith.addf %176, %175 : vector<2x512xf32>
    %178 = vector.extract_strided_slice %177 {offsets = [0, 0], sizes = [2, 384], strides = [1, 1]} : vector<2x512xf32> to vector<2x384xf32>
    %179 = arith.negf %178 : vector<2x384xf32>
    %180 = math.exp %179 : vector<2x384xf32>
    %cst_53 = arith.constant 1.000000e+00 : f32
    %181 = vector.broadcast %cst_53 : f32 to vector<2x384xf32>
    %182 = arith.addf %181, %180 : vector<2x384xf32>
    %183 = arith.divf %181, %182 : vector<2x384xf32>
    %184 = vector.extract_strided_slice %177 {offsets = [0, 384], sizes = [2, 128], strides = [1, 1]} : vector<2x512xf32> to vector<2x128xf32>
    %185 = math.tanh %184 : vector<2x128xf32>
    %186 = vector.extract_strided_slice %183 {offsets = [0, 128], sizes = [2, 128], strides = [1, 1]} : vector<2x384xf32> to vector<2x128xf32>
    %187 = arith.mulf %186, %169 : vector<2x128xf32>
    %188 = vector.extract_strided_slice %183 {offsets = [0, 0], sizes = [2, 128], strides = [1, 1]} : vector<2x384xf32> to vector<2x128xf32>
    %189 = arith.mulf %188, %185 : vector<2x128xf32>
    %190 = arith.addf %187, %189 : vector<2x128xf32>
    %191 = vector.extract_strided_slice %183 {offsets = [0, 256], sizes = [2, 128], strides = [1, 1]} : vector<2x384xf32> to vector<2x128xf32>
    %192 = math.tanh %190 : vector<2x128xf32>
    %193 = arith.mulf %191, %192 : vector<2x128xf32>
    %c0_54 = arith.constant 0 : index
    %c0_55 = arith.constant 0 : index
    %194 = vector.load %arg10[%c0_54, %c0_55] : memref<2x128xf32, #tpu.memory_space<vmem>>, vector<2x128xf32>
    tpu.vector_store %arg10[%c0_54, %c0_55], %193 {strides = array<i32>} : memref<2x128xf32, #tpu.memory_space<vmem>>, vector<2x128xf32>,
    %c0_56 = arith.constant 0 : index
    %c0_57 = arith.constant 0 : index
    %195 = vector.load %arg11[%c0_56, %c0_57] : memref<2x128xf32, #tpu.memory_space<vmem>>, vector<2x128xf32>
    tpu.vector_store %arg11[%c0_56, %c0_57], %190 {strides = array<i32>} : memref<2x128xf32, #tpu.memory_space<vmem>>, vector<2x128xf32>,
    %196 = vector.shape_cast %17 : vector<16x128xf32> to vector<2x8x128xf32>
    %c0_58 = arith.constant 0 : index
    %c0_59 = arith.constant 0 : index
    %c0_60 = arith.constant 0 : index
    %197 = vector.load %arg7[%c0_58, %c0_59, %c0_60] : memref<2x8x128xf32, #tpu.memory_space<vmem>>, vector<2x8x128xf32>
    tpu.vector_store %arg7[%c0_58, %c0_59, %c0_60], %196 {strides = array<i32>} : memref<2x8x128xf32, #tpu.memory_space<vmem>>, vector<2x8x128xf32>,
    %198 = vector.shape_cast %22 : vector<16x512xf32> to vector<2x8x512xf32>
    %199 = arith.index_cast %9 : i32 to index
    %c0_61 = arith.constant 0 : index
    %c0_62 = arith.constant 0 : index
    %c0_63 = arith.constant 0 : index
    %200 = vector.load %arg9[%199, %c0_61, %c0_62, %c0_63] : memref<2x2x8x512xf32, #tpu.memory_space<vmem>>, vector<1x2x8x512xf32>
    %201 = vector.shape_cast %200 : vector<1x2x8x512xf32> to vector<2x8x512xf32>
    %202 = vector.shape_cast %198 : vector<2x8x512xf32> to vector<1x2x8x512xf32>
    tpu.vector_store %arg9[%199, %c0_61, %c0_62, %c0_63], %202 {strides = array<i32>} : memref<2x2x8x512xf32, #tpu.memory_space<vmem>>, vector<1x2x8x512xf32>,
    %c0_i32_64 = arith.constant 0 : i32
    %203 = arith.cmpi eq, %arg1, %c0_i32_64 : i32
    %204 = arith.extui %203 : i1 to i32
    %c0_i32_65 = arith.constant 0 : i32
    %205 = arith.cmpi ne, %204, %c0_i32_65 : i32
    scf.if %205 {
      %c0_66 = arith.constant 0 : index
      %c0_67 = arith.constant 0 : index
      %206 = vector.load %arg5[%c0_66, %c0_67] : memref<128x512xf32, #tpu.memory_space<vmem>>, vector<128x512xf32>
      %207 = arith.index_cast %9 : i32 to index
      %c0_68 = arith.constant 0 : index
      %c0_69 = arith.constant 0 : index
      %c0_70 = arith.constant 0 : index
      %208 = vector.load %arg9[%207, %c0_68, %c0_69, %c0_70] : memref<2x2x8x512xf32, #tpu.memory_space<vmem>>, vector<1x2x1x512xf32>
      %209 = vector.shape_cast %208 : vector<1x2x1x512xf32> to vector<2x512xf32>
      %cst_71 = arith.constant dense<0.000000e+00> : vector<2x512xf32>
      %210 = tpu.matmul %193, %206, %cst_71 {dimension_numbers = #tpu.dot_dimension_numbers<[1], [0], [0], [1], [0, 0, 1, 1], [], []>} : vector<2x128xf32>, vector<128x512xf32>, vector<2x512xf32> -> vector<2x512xf32>
      %211 = arith.addf %210, %209 : vector<2x512xf32>
      %212 = vector.extract_strided_slice %211 {offsets = [0, 0], sizes = [2, 384], strides = [1, 1]} : vector<2x512xf32> to vector<2x384xf32>
      %213 = arith.negf %212 : vector<2x384xf32>
      %214 = math.exp %213 : vector<2x384xf32>
      %cst_72 = arith.constant 1.000000e+00 : f32
      %215 = vector.broadcast %cst_72 : f32 to vector<2x384xf32>
      %216 = arith.addf %215, %214 : vector<2x384xf32>
      %217 = arith.divf %215, %216 : vector<2x384xf32>
      %218 = vector.extract_strided_slice %211 {offsets = [0, 384], sizes = [2, 128], strides = [1, 1]} : vector<2x512xf32> to vector<2x128xf32>
      %219 = math.tanh %218 : vector<2x128xf32>
      %220 = vector.extract_strided_slice %217 {offsets = [0, 128], sizes = [2, 128], strides = [1, 1]} : vector<2x384xf32> to vector<2x128xf32>
      %221 = arith.mulf %220, %190 : vector<2x128xf32>
      %222 = vector.extract_strided_slice %217 {offsets = [0, 0], sizes = [2, 128], strides = [1, 1]} : vector<2x384xf32> to vector<2x128xf32>
      %223 = arith.mulf %222, %219 : vector<2x128xf32>
      %224 = arith.addf %221, %223 : vector<2x128xf32>
      %225 = vector.extract_strided_slice %217 {offsets = [0, 256], sizes = [2, 128], strides = [1, 1]} : vector<2x384xf32> to vector<2x128xf32>
      %226 = math.tanh %224 : vector<2x128xf32>
      %227 = arith.mulf %225, %226 : vector<2x128xf32>
      %228 = arith.index_cast %9 : i32 to index
      %c0_73 = arith.constant 0 : index
      %c1_74 = arith.constant 1 : index
      %c0_75 = arith.constant 0 : index
      %229 = vector.load %arg9[%228, %c0_73, %c1_74, %c0_75] : memref<2x2x8x512xf32, #tpu.memory_space<vmem>>, vector<1x2x1x512xf32>
      %230 = vector.shape_cast %229 : vector<1x2x1x512xf32> to vector<2x512xf32>
      %cst_76 = arith.constant dense<0.000000e+00> : vector<2x512xf32>
      %231 = tpu.matmul %227, %206, %cst_76 {dimension_numbers = #tpu.dot_dimension_numbers<[1], [0], [0], [1], [0, 0, 1, 1], [], []>} : vector<2x128xf32>, vector<128x512xf32>, vector<2x512xf32> -> vector<2x512xf32>
      %232 = arith.addf %231, %230 : vector<2x512xf32>
      %233 = vector.extract_strided_slice %232 {offsets = [0, 0], sizes = [2, 384], strides = [1, 1]} : vector<2x512xf32> to vector<2x384xf32>
      %234 = arith.negf %233 : vector<2x384xf32>
      %235 = math.exp %234 : vector<2x384xf32>
      %cst_77 = arith.constant 1.000000e+00 : f32
      %236 = vector.broadcast %cst_77 : f32 to vector<2x384xf32>
      %237 = arith.addf %236, %235 : vector<2x384xf32>
      %238 = arith.divf %236, %237 : vector<2x384xf32>
      %239 = vector.extract_strided_slice %232 {offsets = [0, 384], sizes = [2, 128], strides = [1, 1]} : vector<2x512xf32> to vector<2x128xf32>
      %240 = math.tanh %239 : vector<2x128xf32>
      %241 = vector.extract_strided_slice %238 {offsets = [0, 128], sizes = [2, 128], strides = [1, 1]} : vector<2x384xf32> to vector<2x128xf32>
      %242 = arith.mulf %241, %224 : vector<2x128xf32>
      %243 = vector.extract_strided_slice %238 {offsets = [0, 0], sizes = [2, 128], strides = [1, 1]} : vector<2x384xf32> to vector<2x128xf32>
      %244 = arith.mulf %243, %240 : vector<2x128xf32>
      %245 = arith.addf %242, %244 : vector<2x128xf32>
      %246 = vector.extract_strided_slice %238 {offsets = [0, 256], sizes = [2, 128], strides = [1, 1]} : vector<2x384xf32> to vector<2x128xf32>
      %247 = math.tanh %245 : vector<2x128xf32>
      %248 = arith.mulf %246, %247 : vector<2x128xf32>
      %249 = arith.index_cast %9 : i32 to index
      %c0_78 = arith.constant 0 : index
      %c2_79 = arith.constant 2 : index
      %c0_80 = arith.constant 0 : index
      %250 = vector.load %arg9[%249, %c0_78, %c2_79, %c0_80] : memref<2x2x8x512xf32, #tpu.memory_space<vmem>>, vector<1x2x1x512xf32>
      %251 = vector.shape_cast %250 : vector<1x2x1x512xf32> to vector<2x512xf32>
      %cst_81 = arith.constant dense<0.000000e+00> : vector<2x512xf32>
      %252 = tpu.matmul %248, %206, %cst_81 {dimension_numbers = #tpu.dot_dimension_numbers<[1], [0], [0], [1], [0, 0, 1, 1], [], []>} : vector<2x128xf32>, vector<128x512xf32>, vector<2x512xf32> -> vector<2x512xf32>
      %253 = arith.addf %252, %251 : vector<2x512xf32>
      %254 = vector.extract_strided_slice %253 {offsets = [0, 0], sizes = [2, 384], strides = [1, 1]} : vector<2x512xf32> to vector<2x384xf32>
      %255 = arith.negf %254 : vector<2x384xf32>
      %256 = math.exp %255 : vector<2x384xf32>
      %cst_82 = arith.constant 1.000000e+00 : f32
      %257 = vector.broadcast %cst_82 : f32 to vector<2x384xf32>
      %258 = arith.addf %257, %256 : vector<2x384xf32>
      %259 = arith.divf %257, %258 : vector<2x384xf32>
      %260 = vector.extract_strided_slice %253 {offsets = [0, 384], sizes = [2, 128], strides = [1, 1]} : vector<2x512xf32> to vector<2x128xf32>
      %261 = math.tanh %260 : vector<2x128xf32>
      %262 = vector.extract_strided_slice %259 {offsets = [0, 128], sizes = [2, 128], strides = [1, 1]} : vector<2x384xf32> to vector<2x128xf32>
      %263 = arith.mulf %262, %245 : vector<2x128xf32>
      %264 = vector.extract_strided_slice %259 {offsets = [0, 0], sizes = [2, 128], strides = [1, 1]} : vector<2x384xf32> to vector<2x128xf32>
      %265 = arith.mulf %264, %261 : vector<2x128xf32>
      %266 = arith.addf %263, %265 : vector<2x128xf32>
      %267 = vector.extract_strided_slice %259 {offsets = [0, 256], sizes = [2, 128], strides = [1, 1]} : vector<2x384xf32> to vector<2x128xf32>
      %268 = math.tanh %266 : vector<2x128xf32>
      %269 = arith.mulf %267, %268 : vector<2x128xf32>
      %270 = arith.index_cast %9 : i32 to index
      %c0_83 = arith.constant 0 : index
      %c3_84 = arith.constant 3 : index
      %c0_85 = arith.constant 0 : index
      %271 = vector.load %arg9[%270, %c0_83, %c3_84, %c0_85] : memref<2x2x8x512xf32, #tpu.memory_space<vmem>>, vector<1x2x1x512xf32>
      %272 = vector.shape_cast %271 : vector<1x2x1x512xf32> to vector<2x512xf32>
      %cst_86 = arith.constant dense<0.000000e+00> : vector<2x512xf32>
      %273 = tpu.matmul %269, %206, %cst_86 {dimension_numbers = #tpu.dot_dimension_numbers<[1], [0], [0], [1], [0, 0, 1, 1], [], []>} : vector<2x128xf32>, vector<128x512xf32>, vector<2x512xf32> -> vector<2x512xf32>
      %274 = arith.addf %273, %272 : vector<2x512xf32>
      %275 = vector.extract_strided_slice %274 {offsets = [0, 0], sizes = [2, 384], strides = [1, 1]} : vector<2x512xf32> to vector<2x384xf32>
      %276 = arith.negf %275 : vector<2x384xf32>
      %277 = math.exp %276 : vector<2x384xf32>
      %cst_87 = arith.constant 1.000000e+00 : f32
      %278 = vector.broadcast %cst_87 : f32 to vector<2x384xf32>
      %279 = arith.addf %278, %277 : vector<2x384xf32>
      %280 = arith.divf %278, %279 : vector<2x384xf32>
      %281 = vector.extract_strided_slice %274 {offsets = [0, 384], sizes = [2, 128], strides = [1, 1]} : vector<2x512xf32> to vector<2x128xf32>
      %282 = math.tanh %281 : vector<2x128xf32>
      %283 = vector.extract_strided_slice %280 {offsets = [0, 128], sizes = [2, 128], strides = [1, 1]} : vector<2x384xf32> to vector<2x128xf32>
      %284 = arith.mulf %283, %266 : vector<2x128xf32>
      %285 = vector.extract_strided_slice %280 {offsets = [0, 0], sizes = [2, 128], strides = [1, 1]} : vector<2x384xf32> to vector<2x128xf32>
      %286 = arith.mulf %285, %282 : vector<2x128xf32>
      %287 = arith.addf %284, %286 : vector<2x128xf32>
      %288 = vector.extract_strided_slice %280 {offsets = [0, 256], sizes = [2, 128], strides = [1, 1]} : vector<2x384xf32> to vector<2x128xf32>
      %289 = math.tanh %287 : vector<2x128xf32>
      %290 = arith.mulf %288, %289 : vector<2x128xf32>
      %291 = arith.index_cast %9 : i32 to index
      %c0_88 = arith.constant 0 : index
      %c4_89 = arith.constant 4 : index
      %c0_90 = arith.constant 0 : index
      %292 = vector.load %arg9[%291, %c0_88, %c4_89, %c0_90] : memref<2x2x8x512xf32, #tpu.memory_space<vmem>>, vector<1x2x1x512xf32>
      %293 = vector.shape_cast %292 : vector<1x2x1x512xf32> to vector<2x512xf32>
      %cst_91 = arith.constant dense<0.000000e+00> : vector<2x512xf32>
      %294 = tpu.matmul %290, %206, %cst_91 {dimension_numbers = #tpu.dot_dimension_numbers<[1], [0], [0], [1], [0, 0, 1, 1], [], []>} : vector<2x128xf32>, vector<128x512xf32>, vector<2x512xf32> -> vector<2x512xf32>
      %295 = arith.addf %294, %293 : vector<2x512xf32>
      %296 = vector.extract_strided_slice %295 {offsets = [0, 0], sizes = [2, 384], strides = [1, 1]} : vector<2x512xf32> to vector<2x384xf32>
      %297 = arith.negf %296 : vector<2x384xf32>
      %298 = math.exp %297 : vector<2x384xf32>
      %cst_92 = arith.constant 1.000000e+00 : f32
      %299 = vector.broadcast %cst_92 : f32 to vector<2x384xf32>
      %300 = arith.addf %299, %298 : vector<2x384xf32>
      %301 = arith.divf %299, %300 : vector<2x384xf32>
      %302 = vector.extract_strided_slice %295 {offsets = [0, 384], sizes = [2, 128], strides = [1, 1]} : vector<2x512xf32> to vector<2x128xf32>
      %303 = math.tanh %302 : vector<2x128xf32>
      %304 = vector.extract_strided_slice %301 {offsets = [0, 128], sizes = [2, 128], strides = [1, 1]} : vector<2x384xf32> to vector<2x128xf32>
      %305 = arith.mulf %304, %287 : vector<2x128xf32>
      %306 = vector.extract_strided_slice %301 {offsets = [0, 0], sizes = [2, 128], strides = [1, 1]} : vector<2x384xf32> to vector<2x128xf32>
      %307 = arith.mulf %306, %303 : vector<2x128xf32>
      %308 = arith.addf %305, %307 : vector<2x128xf32>
      %309 = vector.extract_strided_slice %301 {offsets = [0, 256], sizes = [2, 128], strides = [1, 1]} : vector<2x384xf32> to vector<2x128xf32>
      %310 = math.tanh %308 : vector<2x128xf32>
      %311 = arith.mulf %309, %310 : vector<2x128xf32>
      %312 = arith.index_cast %9 : i32 to index
      %c0_93 = arith.constant 0 : index
      %c5_94 = arith.constant 5 : index
      %c0_95 = arith.constant 0 : index
      %313 = vector.load %arg9[%312, %c0_93, %c5_94, %c0_95] : memref<2x2x8x512xf32, #tpu.memory_space<vmem>>, vector<1x2x1x512xf32>
      %314 = vector.shape_cast %313 : vector<1x2x1x512xf32> to vector<2x512xf32>
      %cst_96 = arith.constant dense<0.000000e+00> : vector<2x512xf32>
      %315 = tpu.matmul %311, %206, %cst_96 {dimension_numbers = #tpu.dot_dimension_numbers<[1], [0], [0], [1], [0, 0, 1, 1], [], []>} : vector<2x128xf32>, vector<128x512xf32>, vector<2x512xf32> -> vector<2x512xf32>
      %316 = arith.addf %315, %314 : vector<2x512xf32>
      %317 = vector.extract_strided_slice %316 {offsets = [0, 0], sizes = [2, 384], strides = [1, 1]} : vector<2x512xf32> to vector<2x384xf32>
      %318 = arith.negf %317 : vector<2x384xf32>
      %319 = math.exp %318 : vector<2x384xf32>
      %cst_97 = arith.constant 1.000000e+00 : f32
      %320 = vector.broadcast %cst_97 : f32 to vector<2x384xf32>
      %321 = arith.addf %320, %319 : vector<2x384xf32>
      %322 = arith.divf %320, %321 : vector<2x384xf32>
      %323 = vector.extract_strided_slice %316 {offsets = [0, 384], sizes = [2, 128], strides = [1, 1]} : vector<2x512xf32> to vector<2x128xf32>
      %324 = math.tanh %323 : vector<2x128xf32>
      %325 = vector.extract_strided_slice %322 {offsets = [0, 128], sizes = [2, 128], strides = [1, 1]} : vector<2x384xf32> to vector<2x128xf32>
      %326 = arith.mulf %325, %308 : vector<2x128xf32>
      %327 = vector.extract_strided_slice %322 {offsets = [0, 0], sizes = [2, 128], strides = [1, 1]} : vector<2x384xf32> to vector<2x128xf32>
      %328 = arith.mulf %327, %324 : vector<2x128xf32>
      %329 = arith.addf %326, %328 : vector<2x128xf32>
      %330 = vector.extract_strided_slice %322 {offsets = [0, 256], sizes = [2, 128], strides = [1, 1]} : vector<2x384xf32> to vector<2x128xf32>
      %331 = math.tanh %329 : vector<2x128xf32>
      %332 = arith.mulf %330, %331 : vector<2x128xf32>
      %333 = arith.index_cast %9 : i32 to index
      %c0_98 = arith.constant 0 : index
      %c6_99 = arith.constant 6 : index
      %c0_100 = arith.constant 0 : index
      %334 = vector.load %arg9[%333, %c0_98, %c6_99, %c0_100] : memref<2x2x8x512xf32, #tpu.memory_space<vmem>>, vector<1x2x1x512xf32>
      %335 = vector.shape_cast %334 : vector<1x2x1x512xf32> to vector<2x512xf32>
      %cst_101 = arith.constant dense<0.000000e+00> : vector<2x512xf32>
      %336 = tpu.matmul %332, %206, %cst_101 {dimension_numbers = #tpu.dot_dimension_numbers<[1], [0], [0], [1], [0, 0, 1, 1], [], []>} : vector<2x128xf32>, vector<128x512xf32>, vector<2x512xf32> -> vector<2x512xf32>
      %337 = arith.addf %336, %335 : vector<2x512xf32>
      %338 = vector.extract_strided_slice %337 {offsets = [0, 0], sizes = [2, 384], strides = [1, 1]} : vector<2x512xf32> to vector<2x384xf32>
      %339 = arith.negf %338 : vector<2x384xf32>
      %340 = math.exp %339 : vector<2x384xf32>
      %cst_102 = arith.constant 1.000000e+00 : f32
      %341 = vector.broadcast %cst_102 : f32 to vector<2x384xf32>
      %342 = arith.addf %341, %340 : vector<2x384xf32>
      %343 = arith.divf %341, %342 : vector<2x384xf32>
      %344 = vector.extract_strided_slice %337 {offsets = [0, 384], sizes = [2, 128], strides = [1, 1]} : vector<2x512xf32> to vector<2x128xf32>
      %345 = math.tanh %344 : vector<2x128xf32>
      %346 = vector.extract_strided_slice %343 {offsets = [0, 128], sizes = [2, 128], strides = [1, 1]} : vector<2x384xf32> to vector<2x128xf32>
      %347 = arith.mulf %346, %329 : vector<2x128xf32>
      %348 = vector.extract_strided_slice %343 {offsets = [0, 0], sizes = [2, 128], strides = [1, 1]} : vector<2x384xf32> to vector<2x128xf32>
      %349 = arith.mulf %348, %345 : vector<2x128xf32>
      %350 = arith.addf %347, %349 : vector<2x128xf32>
      %351 = vector.extract_strided_slice %343 {offsets = [0, 256], sizes = [2, 128], strides = [1, 1]} : vector<2x384xf32> to vector<2x128xf32>
      %352 = math.tanh %350 : vector<2x128xf32>
      %353 = arith.mulf %351, %352 : vector<2x128xf32>
      %354 = arith.index_cast %9 : i32 to index
      %c0_103 = arith.constant 0 : index
      %c7_104 = arith.constant 7 : index
      %c0_105 = arith.constant 0 : index
      %355 = vector.load %arg9[%354, %c0_103, %c7_104, %c0_105] : memref<2x2x8x512xf32, #tpu.memory_space<vmem>>, vector<1x2x1x512xf32>
      %356 = vector.shape_cast %355 : vector<1x2x1x512xf32> to vector<2x512xf32>
      %cst_106 = arith.constant dense<0.000000e+00> : vector<2x512xf32>
      %357 = tpu.matmul %353, %206, %cst_106 {dimension_numbers = #tpu.dot_dimension_numbers<[1], [0], [0], [1], [0, 0, 1, 1], [], []>} : vector<2x128xf32>, vector<128x512xf32>, vector<2x512xf32> -> vector<2x512xf32>
      %358 = arith.addf %357, %356 : vector<2x512xf32>
      %359 = vector.extract_strided_slice %358 {offsets = [0, 0], sizes = [2, 384], strides = [1, 1]} : vector<2x512xf32> to vector<2x384xf32>
      %360 = arith.negf %359 : vector<2x384xf32>
      %361 = math.exp %360 : vector<2x384xf32>
      %cst_107 = arith.constant 1.000000e+00 : f32
      %362 = vector.broadcast %cst_107 : f32 to vector<2x384xf32>
      %363 = arith.addf %362, %361 : vector<2x384xf32>
      %364 = arith.divf %362, %363 : vector<2x384xf32>
      %365 = vector.extract_strided_slice %358 {offsets = [0, 384], sizes = [2, 128], strides = [1, 1]} : vector<2x512xf32> to vector<2x128xf32>
      %366 = math.tanh %365 : vector<2x128xf32>
      %367 = vector.extract_strided_slice %364 {offsets = [0, 128], sizes = [2, 128], strides = [1, 1]} : vector<2x384xf32> to vector<2x128xf32>
      %368 = arith.mulf %367, %350 : vector<2x128xf32>
      %369 = vector.extract_strided_slice %364 {offsets = [0, 0], sizes = [2, 128], strides = [1, 1]} : vector<2x384xf32> to vector<2x128xf32>
      %370 = arith.mulf %369, %366 : vector<2x128xf32>
      %371 = arith.addf %368, %370 : vector<2x128xf32>
      %372 = vector.extract_strided_slice %364 {offsets = [0, 256], sizes = [2, 128], strides = [1, 1]} : vector<2x384xf32> to vector<2x128xf32>
      %373 = math.tanh %371 : vector<2x128xf32>
      %374 = arith.mulf %372, %373 : vector<2x128xf32>
      %c0_108 = arith.constant 0 : index
      %c0_109 = arith.constant 0 : index
      %c0_110 = arith.constant 0 : index
      %375 = vector.load %arg8[%c0_108, %c0_109, %c0_110] : memref<1x2x128xf32, #tpu.memory_space<vmem>>, vector<1x2x128xf32>
      %376 = vector.shape_cast %375 : vector<1x2x128xf32> to vector<2x128xf32>
      %377 = vector.shape_cast %374 : vector<2x128xf32> to vector<1x2x128xf32>
      tpu.vector_store %arg8[%c0_108, %c0_109, %c0_110], %377 {strides = array<i32>} : memref<1x2x128xf32, #tpu.memory_space<vmem>>, vector<1x2x128xf32>,
    } else {
    }
    return
  }
  func.func @transform_0(%arg0: i32, %arg1: i32) -> (i32, i32, i32) {
    %c0_i32 = arith.constant 0 : i32
    %c0_i32_0 = arith.constant 0 : i32
    return %arg0, %arg1, %c0_i32 : i32, i32, i32
  }
  func.func @transform_1(%arg0: i32, %arg1: i32) -> (i32, i32) {
    %c0_i32 = arith.constant 0 : i32
    %c0_i32_0 = arith.constant 0 : i32
    %c0_i32_1 = arith.constant 0 : i32
    return %c0_i32, %c0_i32_0 : i32, i32
  }
  func.func @transform_2(%arg0: i32, %arg1: i32) -> (i32, i32) {
    %c0_i32 = arith.constant 0 : i32
    %c0_i32_0 = arith.constant 0 : i32
    %c0_i32_1 = arith.constant 0 : i32
    return %c0_i32, %c0_i32_0 : i32, i32
  }
  func.func @transform_3(%arg0: i32, %arg1: i32) -> (i32, i32) {
    %c0_i32 = arith.constant 0 : i32
    %c0_i32_0 = arith.constant 0 : i32
    %c0_i32_1 = arith.constant 0 : i32
    return %c0_i32, %c0_i32_0 : i32, i32
  }
  func.func @transform_4(%arg0: i32, %arg1: i32) -> (i32, i32) {
    %c0_i32 = arith.constant 0 : i32
    %c0_i32_0 = arith.constant 0 : i32
    %c0_i32_1 = arith.constant 0 : i32
    return %c0_i32, %c0_i32_0 : i32, i32
  }
  func.func @transform_5(%arg0: i32, %arg1: i32) -> (i32, i32, i32) {
    %c0_i32 = arith.constant 0 : i32
    %c0_i32_0 = arith.constant 0 : i32
    return %arg0, %arg1, %c0_i32 : i32, i32, i32
  }
  func.func @transform_6(%arg0: i32, %arg1: i32) -> (i32, i32, i32) {
    %c0_i32 = arith.constant 0 : i32
    %c0_i32_0 = arith.constant 0 : i32
    %c0_i32_1 = arith.constant 0 : i32
    return %arg0, %c0_i32, %c0_i32_0 : i32, i32, i32
  }
}

</mosaic_0001>

<bundles_post_ra>
// kernel: tpu_custom_call.1
= control target key start
LH: loop header
LB: loop body
LE: loop exit
PB: predicated region body
PF: predicated region fallthrough
CT: control target
= control target key end

     0   :  { %12 = vsyncpa [#allocation6], 0  ;;  %s5616_s0 = inlined_call_operand.hbm [shape: f32[2,8,16], index: 0, kind: input, shape index: {}]   ;;  %s5617_s1 = inlined_call_operand.hbm [shape: f32[16,128], index: 1, kind: input, shape index: {}]   ;;  %s5618_s2 = inlined_call_operand.hbm [shape: f32[128,512], index: 2, kind: input, shape index: {}]   ;;  %s5619_s3 = inlined_call_operand.hbm [shape: f32[128,512], index: 3, kind: input, shape index: {}]   ;;  %s5620_s4 = inlined_call_operand.hbm [shape: f32[1,512], index: 4, kind: input, shape index: {}]   ;;  %s5621_s5 = inlined_call_operand.hbm [shape: f32[2,8,128], index: 5, kind: output, shape index: {0}]   ;;  %s5622_s6 = inlined_call_operand.hbm [shape: f32[1,2,128], index: 6, kind: output, shape index: {1}]  }
   0x1   :  { %13 = vsyncpa [#allocation9], 0 }
   0x2   :  { %14 = vsyncpa [#allocation12], 0 }
   0x3   :  { %15 = vsyncpa [#allocation7], 0 }
   0x4   :  { %16 = vsyncpa [#allocation16], 0  ;;  %s34_s23 = sshll.u32 %s5617_s1, 4  ;;  %s3699_s24 = smov [#allocation8]   ;;  %s35_s23 = int_to_ptr.hbm [resolvable:$true] %s34_s23 }
   0x5   :  { %s36_s25 = sshll.u32 %s3699_s24, 4  ;;  %s3700_s26 = smov 128   ;;  %s37_s25 = int_to_ptr.vmem [resolvable:$true] %s36_s25 }
   0x6   :  { %s3701_s27 = smov 8   ;;  %s60_s30 = sshll.u32 %s5619_s3, 4  ;;  %s61_s30 = int_to_ptr.hbm [resolvable:$true] %s60_s30 }
   0x7   :  { %42 = dma.hbm_to_vmem [thread:$0]  %s35_s23, 256, %s37_s25, [#allocation9], %s3700_s26, %s3700_s26, %s3701_s27  }
   0x8   :  { %s3702_s7 = smov [#allocation11]   ;;  %s21_s1 = sshll.u32 %s5616_s0, 4  ;;  %s22_s1 = int_to_ptr.hbm [resolvable:$true] %s21_s1 }
   0x9   :  { %s62_s8 = sshll.u32 %s3702_s7, 4  ;;  %s3703_s11 = smov 512   ;;  %s63_s8 = int_to_ptr.vmem [resolvable:$true] %s62_s8 }
   0xa   :  { %s3704_s12 = smov 32   ;;  %s47_s15 = sshll.u32 %s5618_s2, 4  ;;  %s48_s15 = int_to_ptr.hbm [resolvable:$true] %s47_s15 }
   0xb   :  { %68 = dma.hbm_to_vmem [thread:$0]  %s61_s30, 8192, %s63_s8, [#allocation12], %s3703_s11, %s3703_s11, %s3704_s12  }
   0xc   :  { %s3705_s16 = smov [#allocation5]   ;;  %s3706_s3 = smov [#allocation10]  }
   0xd   :  { %s23_s17 = sshll.u32 %s3705_s16, 4  ;;  %s49_s18 = sshll.u32 %s3706_s3, 4  ;;  %s24_s17 = int_to_ptr.vmem [resolvable:$true] %s23_s17  ;;  %s50_s18 = int_to_ptr.vmem [resolvable:$true] %s49_s18 }
   0xe   :  { %29 = dma.hbm_to_vmem [thread:$0]  %s22_s1, 256, %s24_s17, [#allocation6], %s3700_s26, %s3700_s26, %s3701_s27  }
   0xf   :  { %s74_s20 = sshll.u32 %s5620_s4, 4  ;;  %s3707_s21 = smov [#allocation13]   ;;  %s75_s20 = int_to_ptr.hbm [resolvable:$true] %s74_s20 }
  0x10   :  { %55 = dma.hbm_to_vmem [thread:$0]  %s48_s15, 8192, %s50_s18, [#allocation9], %s3703_s11, %s3703_s11, %s3704_s12  }
  0x11   :  { %s76_s22 = sshll.u32 %s3707_s21, 4  ;;  %s77_s22 = int_to_ptr.vmem [resolvable:$true] %s76_s22 }
  0x12   :  { %79 = dma.hbm_to_vmem [thread:$0]  %s75_s20, 64, %s77_s22, [#allocation12]  }
  0x13   :  { %3689 = dma.done.wait [#allocation6], 256  }
  0x14   :  { %3690 = vsyncadd [#allocation6], 4294967040 }
  0x15   :  { %3691 = dma.done.wait [#allocation9], 8448  }
  0x16   :  { %3692 = vsyncadd [#allocation9], 4294958848 }
  0x17   :  { %3693 = dma.done.wait [#allocation12], 8256  }
  0x18   :  { %3694 = vsyncadd [#allocation12], 4294959040  ;;  %v127_v0 = vld [vmem:[#allocation8 + $0x8] sm:$0xff]  ;;  %v126_v1 = vld [vmem:[#allocation8] sm:$0xff]  ;;  %vm128_vm0 = vcmask 130048   ;;  %s3040_s23 = sshll.u32 %s5621_s5, 4  ;;  %s3041_s23 = int_to_ptr.hbm [resolvable:$true] %s3040_s23 }
  0x19   :  { %149 = vmatpush.msra.mxu0 %v127_v0  ;;  %v124_v2 = vld [vmem:[#allocation5] sm:$0xff]  ;;  %v219_v4 = vld [vmem:[#allocation10 + $0x1e8] sm:$0xff]  ;;  %v220_v5 = vld [vmem:[#allocation10 + $0x1f0] sm:$0xff]  ;;  %s3709_s24 = smov [#allocation14]   ;;  %s3710_s5 = smov [#allocation15]  }
  0x1a   :  { %v218_v3 = vld [vmem:[#allocation10 + $0x1e0] sm:$0xff]  ;;  %255 = vmatpush.msra.mxu2 %v219_v4  ;;  %v215_v7 = vld [vmem:[#allocation10 + $0x1c8] sm:$0xff]  ;;  %278 = vmatpush.msra.mxu3 %v220_v5  ;;  %v216_v8 = vld [vmem:[#allocation10 + $0x1d0] sm:$0xff]  ;;  %s3038_s25 = sshll.u32 %s3709_s24, 4  ;;  %s3054_s29 = sshll.u32 %s5622_s6, 4  ;;  %s3039_s25 = int_to_ptr.vmem [resolvable:$true] %s3038_s25  ;;  %s3055_s29 = int_to_ptr.hbm [resolvable:$true] %s3054_s29 }
  0x1b   :  { %232 = vmatpush.msra.mxu1 %v218_v3  ;;  %v214_v6 = vld [vmem:[#allocation10 + $0x1c0] sm:$0xff]  ;;  %150 = vmatpush.msra.mxu0 %v126_v1  ;;  %v211_v10 = vld [vmem:[#allocation10 + $0x1a8] sm:$0xff]  ;;  %v212_v11 = vld [vmem:[#allocation10 + $0x1b0] sm:$0xff] }
  0x1c   :  { %v210_v9 = vld [vmem:[#allocation10 + $0x1a0] sm:$0xff]  ;;  %3075 = vmatmul.msk.f32.vlgmr.msra.gmra.mxu0 %vm128_vm0, %v124_v2  ;;  %256 = vmatpush.msra.mxu2 %v215_v7  ;;  %v207_v13 = vld [vmem:[#allocation10 + $0x188] sm:$0xff]  ;;  %v208_v14 = vld [vmem:[#allocation10 + $0x190] sm:$0xff] }
  0x1d   :  { %233 = vmatpush.msra.mxu1 %v214_v6  ;;  %279 = vmatpush.msra.mxu3 %v216_v8  ;;  %v206_v12 = vld [vmem:[#allocation10 + $0x180] sm:$0xff]  ;;  %v203_v16 = vld [vmem:[#allocation10 + $0x168] sm:$0xff]  ;;  %v204_v17 = vld [vmem:[#allocation10 + $0x170] sm:$0xff] }
  0x1e   :  { %257 = vmatpush.msra.mxu2 %v211_v10  ;;  %v202_v15 = vld [vmem:[#allocation10 + $0x160] sm:$0xff]  ;;  %v125_v18 = vld [vmem:[#allocation5 + $0x8] sm:$0xff]  ;;  %v221_v20 = vld [vmem:[#allocation10 + $0x1f8] sm:$0xff] }
  0x1f   :  { %234 = vmatpush.msra.mxu1 %v210_v9  ;;  %280 = vmatpush.msra.mxu3 %v212_v11  ;;  %v198_v19 = vld [vmem:[#allocation10 + $0x140] sm:$0xff]  ;;  %v199_v21 = vld [vmem:[#allocation10 + $0x148] sm:$0xff]  ;;  %v200_v22 = vld [vmem:[#allocation10 + $0x150] sm:$0xff] }
  0x20   :  { %258 = vmatpush.msra.mxu2 %v207_v13  ;;  %301 = vmatpush.msrb.mxu0 %v221_v20  ;;  %v194_v23 = vld [vmem:[#allocation10 + $0x120] sm:$0xff]  ;;  %v217_v24 = vld [vmem:[#allocation10 + $0x1d8] sm:$0xff]  ;;  %v195_v25 = vld [vmem:[#allocation10 + $0x128] sm:$0xff] }
  0x21   :  { %235 = vmatpush.msra.mxu1 %v206_v12  ;;  %281 = vmatpush.msra.mxu3 %v208_v14  ;;  %v196_v26 = vld [vmem:[#allocation10 + $0x130] sm:$0xff]  ;;  %v190_v27 = vld [vmem:[#allocation10 + $0x100] sm:$0xff]  ;;  %v213_v28 = vld [vmem:[#allocation10 + $0x1b8] sm:$0xff] }
  0x22   :  { %259 = vmatpush.msra.mxu2 %v203_v16  ;;  %v191_v29 = vld [vmem:[#allocation10 + $0x108] sm:$0xff]  ;;  %v192_v30 = vld [vmem:[#allocation10 + $0x110] sm:$0xff]  ;;  %302 = vmatpush.msrb.mxu0 %v217_v24  ;;  %v186_v31 = vld [vmem:[#allocation10 + $0xe0] sm:$0xff] }
  0x23   :  { %236 = vmatpush.msra.mxu1 %v202_v15  ;;  %282 = vmatpush.msra.mxu3 %v204_v17  ;;  %v209_v32 = vld [vmem:[#allocation10 + $0x198] sm:$0xff]  ;;  %v187_v33 = vld [vmem:[#allocation10 + $0xe8] sm:$0xff]  ;;  %v188_v34 = vld [vmem:[#allocation10 + $0xf0] sm:$0xff] }
  0x24   :  { %3076 = vmatmul.msk.f32.gmra.mxu0 %vm128_vm0, %v125_v18  ;;  %260 = vmatpush.msra.mxu2 %v199_v21  ;;  %v182_v35 = vld [vmem:[#allocation10 + $0xc0] sm:$0xff]  ;;  %v205_v36 = vld [vmem:[#allocation10 + $0x178] sm:$0xff]  ;;  %v183_v37 = vld [vmem:[#allocation10 + $0xc8] sm:$0xff] }
  0x25   :  { %237 = vmatpush.msra.mxu1 %v198_v19  ;;  %283 = vmatpush.msra.mxu3 %v200_v22  ;;  %v184_v38 = vld [vmem:[#allocation10 + $0xd0] sm:$0xff]  ;;  %v178_v39 = vld [vmem:[#allocation10 + $0xa0] sm:$0xff]  ;;  %v201_v40 = vld [vmem:[#allocation10 + $0x158] sm:$0xff] }
  0x26   :  { %261 = vmatpush.msra.mxu2 %v195_v25  ;;  %303 = vmatpush.msrb.mxu0 %v213_v28  ;;  %v179_v41 = vld [vmem:[#allocation10 + $0xa8] sm:$0xff]  ;;  %v180_v42 = vld [vmem:[#allocation10 + $0xb0] sm:$0xff]  ;;  %v174_v43 = vld [vmem:[#allocation10 + $0x80] sm:$0xff] }
  0x27   :  { %238 = vmatpush.msra.mxu1 %v194_v23  ;;  %284 = vmatpush.msra.mxu3 %v196_v26  ;;  %v197_v44 = vld [vmem:[#allocation10 + $0x138] sm:$0xff]  ;;  %v175_v45 = vld [vmem:[#allocation10 + $0x88] sm:$0xff]  ;;  %v176_v46 = vld [vmem:[#allocation10 + $0x90] sm:$0xff] }
  0x28   :  { %262 = vmatpush.msra.mxu2 %v191_v29  ;;  %304 = vmatpush.msrb.mxu0 %v209_v32  ;;  %v170_v47 = vld [vmem:[#allocation10 + $0x60] sm:$0xff]  ;;  %v193_v48 = vld [vmem:[#allocation10 + $0x118] sm:$0xff]  ;;  %v171_v49 = vld [vmem:[#allocation10 + $0x68] sm:$0xff] }
  0x29   :  { %239 = vmatpush.msra.mxu1 %v190_v27  ;;  %285 = vmatpush.msra.mxu3 %v192_v30  ;;  %v172_v50 = vld [vmem:[#allocation10 + $0x70] sm:$0xff]  ;;  %v166_v51 = vld [vmem:[#allocation10 + $0x40] sm:$0xff]  ;;  %v189_v52 = vld [vmem:[#allocation10 + $0xf8] sm:$0xff] }
  0x2a   :  { %263 = vmatpush.msra.mxu2 %v187_v33  ;;  %305 = vmatpush.msrb.mxu0 %v205_v36  ;;  %v167_v53 = vld [vmem:[#allocation10 + $0x48] sm:$0xff]  ;;  %v168_v54 = vld [vmem:[#allocation10 + $0x50] sm:$0xff]  ;;  %v162_v55 = vld [vmem:[#allocation10 + $0x20] sm:$0xff] }
  0x2b   :  { %240 = vmatpush.msra.mxu1 %v186_v31  ;;  %286 = vmatpush.msra.mxu3 %v188_v34  ;;  %v185_v56 = vld [vmem:[#allocation10 + $0xd8] sm:$0xff]  ;;  %v163_v57 = vld [vmem:[#allocation10 + $0x28] sm:$0xff]  ;;  %v164_v58 = vld [vmem:[#allocation10 + $0x30] sm:$0xff] }
  0x2c   :  { %264 = vmatpush.msra.mxu2 %v183_v37  ;;  %306 = vmatpush.msrb.mxu0 %v201_v40  ;;  %v158_v59 = vld [vmem:[#allocation10] sm:$0xff]  ;;  %v181_v60 = vld [vmem:[#allocation10 + $0xb8] sm:$0xff]  ;;  %v159_v61 = vld [vmem:[#allocation10 + $0x8] sm:$0xff] }
  0x2d   :  { %241 = vmatpush.msra.mxu1 %v182_v35  ;;  %287 = vmatpush.msra.mxu3 %v184_v38  ;;  %v160_v62 = vld [vmem:[#allocation10 + $0x10] sm:$0xff]  ;;  %v3769_v63 = vld [vmem:[#allocation11 + $0x1e0] sm:$0xff]  ;;  %v3771_v0 = vld [vmem:[#allocation11 + $0x1e8] sm:$0xff] }
  0x2e   :  { %265 = vmatpush.msra.mxu2 %v179_v41  ;;  %307 = vmatpush.msrb.mxu0 %v197_v44  ;;  %v3773_v1 = vld [vmem:[#allocation11 + $0x1f0] sm:$0xff]  ;;  %v177_v2 = vld [vmem:[#allocation10 + $0x98] sm:$0xff]  ;;  %v3775_v3 = vld [vmem:[#allocation11 + $0x1c0] sm:$0xff] }
  0x2f   :  { %242 = vmatpush.msra.mxu1 %v178_v39  ;;  %288 = vmatpush.msra.mxu3 %v180_v42  ;;  %v3777_v4 = vld [vmem:[#allocation11 + $0x1c8] sm:$0xff]  ;;  %v3781_v5 = vld [vmem:[#allocation11 + $0x1d0] sm:$0xff]  ;;  %v173_v6 = vld [vmem:[#allocation10 + $0x78] sm:$0xff] }
  0x30   :  { %266 = vmatpush.msra.mxu2 %v175_v45  ;;  %308 = vmatpush.msrb.mxu0 %v193_v48  ;;  %v3784_v7 = vld [vmem:[#allocation11 + $0x1a0] sm:$0xff]  ;;  %v3786_v8 = vld [vmem:[#allocation11 + $0x1a8] sm:$0xff]  ;;  %v3790_v9 = vld [vmem:[#allocation11 + $0x1b0] sm:$0xff]  ;;  %v3708_v45 = vmov 0.0  }
  0x31   :  { %243 = vmatpush.msra.mxu1 %v174_v43  ;;  %289 = vmatpush.msra.mxu3 %v176_v46  ;;  %5845 = vst [vmem:[#allocation22_spill] sm:$0xff] %v3784_v7  ;;  %v169_v10 = vld [vmem:[#allocation10 + $0x58] sm:$0xff]  ;;  %v3793_v11 = vld [vmem:[#allocation11 + $0x180] sm:$0xff]  ;;  %v3795_v12 = vld [vmem:[#allocation11 + $0x188] sm:$0xff] }
  0x32   :  { %267 = vmatpush.msra.mxu2 %v171_v49  ;;  %309 = vmatpush.msrb.mxu0 %v189_v52  ;;  %5846 = vst [vmem:[#allocation23_spill] sm:$0xff] %v3790_v9  ;;  %v3799_v13 = vld [vmem:[#allocation11 + $0x190] sm:$0xff]  ;;  %v165_v14 = vld [vmem:[#allocation10 + $0x38] sm:$0xff]  ;;  %v3802_v15 = vld [vmem:[#allocation11 + $0x160] sm:$0xff] }
  0x33   :  { %244 = vmatpush.msra.mxu1 %v170_v47  ;;  %290 = vmatpush.msra.mxu3 %v172_v50  ;;  %v3804_v16 = vld [vmem:[#allocation11 + $0x168] sm:$0xff]  ;;  %v3808_v17 = vld [vmem:[#allocation11 + $0x170] sm:$0xff]  ;;  %v3811_v18 = vld [vmem:[#allocation11 + $0x140] sm:$0xff]  ;;  %113 = vst [vmem:[#allocation3] sm:$0x3] %v3708_v45 }
  0x34   :  { %268 = vmatpush.msra.mxu2 %v167_v53  ;;  %310 = vmatpush.msrb.mxu0 %v185_v56  ;;  %v3813_v19 = vld [vmem:[#allocation11 + $0x148] sm:$0xff]  ;;  %v3817_v20 = vld [vmem:[#allocation11 + $0x150] sm:$0xff]  ;;  %v3820_v21 = vld [vmem:[#allocation11 + $0x120] sm:$0xff]  ;;  %116 = vst [vmem:[#allocation2 + $0x40] sm:$0xff] %v3708_v45 }
  0x35   :  { %245 = vmatpush.msra.mxu1 %v166_v51  ;;  %291 = vmatpush.msra.mxu3 %v168_v54  ;;  %v3822_v22 = vld [vmem:[#allocation11 + $0x128] sm:$0xff]  ;;  %v3826_v23 = vld [vmem:[#allocation11 + $0x130] sm:$0xff]  ;;  %v161_v24 = vld [vmem:[#allocation10 + $0x18] sm:$0xff]  ;;  %117 = vst [vmem:[#allocation2 + $0x48] sm:$0xff] %v3708_v45 }
  0x36   :  { %269 = vmatpush.msra.mxu2 %v163_v57  ;;  %311 = vmatpush.msrb.mxu0 %v181_v60  ;;  %v3832_v25 = vld [vmem:[#allocation11 + $0x100] sm:$0xff]  ;;  %v3834_v26 = vld [vmem:[#allocation11 + $0x108] sm:$0xff]  ;;  %v3837_v27 = vld [vmem:[#allocation11 + $0x110] sm:$0xff]  ;;  %118 = vst [vmem:[#allocation2 + $0x50] sm:$0xff] %v3708_v45 }
  0x37   :  { %246 = vmatpush.msra.mxu1 %v162_v55  ;;  %292 = vmatpush.msra.mxu3 %v164_v58  ;;  %v3841_v28 = vld [vmem:[#allocation11 + $0xe0] sm:$0xff]  ;;  %v3843_v29 = vld [vmem:[#allocation11 + $0xe8] sm:$0xff]  ;;  %v3845_v30 = vld [vmem:[#allocation11 + $0xf0] sm:$0xff]  ;;  %119 = vst [vmem:[#allocation2 + $0x58] sm:$0xff] %v3708_v45 }
  0x38   :  { %270 = vmatpush.msra.mxu2 %v159_v61  ;;  %312 = vmatpush.msrb.mxu0 %v177_v2  ;;  %v3849_v31 = vld [vmem:[#allocation11 + $0xc0] sm:$0xff]  ;;  %v3851_v32 = vld [vmem:[#allocation11 + $0xc8] sm:$0xff]  ;;  %v3853_v33 = vld [vmem:[#allocation11 + $0xd0] sm:$0xff]  ;;  %120 = vst [vmem:[#allocation2 + $0x60] sm:$0xff] %v3708_v45 }
  0x39   :  { %247 = vmatpush.msra.mxu1 %v158_v59  ;;  %293 = vmatpush.msra.mxu3 %v160_v62  ;;  %v3856_v34 = vld [vmem:[#allocation11 + $0xa0] sm:$0xff]  ;;  %v3858_v35 = vld [vmem:[#allocation11 + $0xa8] sm:$0xff]  ;;  %v3862_v36 = vld [vmem:[#allocation11 + $0xb0] sm:$0xff]  ;;  %121 = vst [vmem:[#allocation2 + $0x68] sm:$0xff] %v3708_v45 }
  0x3a   :  { %429 = vmatpush.msrb.mxu2 %v3771_v0  ;;  %313 = vmatpush.msrb.mxu0 %v173_v6  ;;  %5847 = vst [vmem:[#allocation24_spill] sm:$0xff] %v3856_v34  ;;  %v3864_v37 = vld [vmem:[#allocation11 + $0x1f8] sm:$0xff]  ;;  %v3871_v38 = vld [vmem:[#allocation11 + $0x80] sm:$0xff]  ;;  %v3873_v39 = vld [vmem:[#allocation11 + $0x88] sm:$0xff] }
  0x3b   :  { %409 = vmatpush.msrb.mxu1 %v3769_v63  ;;  %449 = vmatpush.msrb.mxu3 %v3773_v1  ;;  %5848 = vst [vmem:[#allocation25_spill] sm:$0xff] %v3858_v35  ;;  %v3875_v40 = vld [vmem:[#allocation11 + $0x90] sm:$0xff]  ;;  %v3879_v41 = vld [vmem:[#allocation11 + $0x1d8] sm:$0xff]  ;;  %v3883_v42 = vld [vmem:[#allocation11 + $0x60] sm:$0xff] }
  0x3c   :  { %430 = vmatpush.msrb.mxu2 %v3777_v4  ;;  %314 = vmatpush.msrb.mxu0 %v169_v10  ;;  %5849 = vst [vmem:[#allocation26_spill] sm:$0xff] %v3862_v36  ;;  %v3885_v43 = vld [vmem:[#allocation11 + $0x68] sm:$0xff]  ;;  %v3887_v44 = vld [vmem:[#allocation11 + $0x70] sm:$0xff]  ;;  %v3891_v46 = vld [vmem:[#allocation11 + $0x1b8] sm:$0xff] }
  0x3d   :  { %410 = vmatpush.msrb.mxu1 %v3775_v3  ;;  %450 = vmatpush.msrb.mxu3 %v3781_v5  ;;  %5850 = vst [vmem:[#allocation27_spill] sm:$0xff] %v3871_v38  ;;  %v3893_v47 = vld [vmem:[#allocation11 + $0x40] sm:$0xff]  ;;  %v3895_v48 = vld [vmem:[#allocation11 + $0x48] sm:$0xff]  ;;  %v3899_v49 = vld [vmem:[#allocation11 + $0x50] sm:$0xff] }
  0x3e   :  { %431 = vmatpush.msrb.mxu2 %v3786_v8  ;;  %315 = vmatpush.msrb.mxu0 %v165_v14  ;;  %5851 = vst [vmem:[#allocation28_spill] sm:$0xff] %v3873_v39  ;;  %v3901_v50 = vld [vmem:[#allocation11 + $0x198] sm:$0xff]  ;;  %v3903_v51 = vld [vmem:[#allocation11 + $0x20] sm:$0xff]  ;;  %v3907_v52 = vld [vmem:[#allocation11 + $0x28] sm:$0xff] }
  0x3f   :  { %411 = vmatpush.msrb.mxu1 %v3784_v7  ;;  %451 = vmatpush.msrb.mxu3 %v3790_v9  ;;  %5852 = vst [vmem:[#allocation29_spill] sm:$0xff] %v3875_v40  ;;  %v3909_v53 = vld [vmem:[#allocation11 + $0x30] sm:$0xff]  ;;  %v3911_v54 = vld [vmem:[#allocation11 + $0x178] sm:$0xff]  ;;  %v3915_v55 = vld [vmem:[#allocation11] sm:$0xff] }
  0x40   :  { %432 = vmatpush.msrb.mxu2 %v3795_v12  ;;  %316 = vmatpush.msrb.mxu0 %v161_v24  ;;  %5853 = vst [vmem:[#allocation30_spill] sm:$0xff] %v3883_v42  ;;  %v3917_v56 = vld [vmem:[#allocation11 + $0x8] sm:$0xff]  ;;  %v3921_v57 = vld [vmem:[#allocation11 + $0x10] sm:$0xff]  ;;  %v3927_v58 = vld [vmem:[#allocation11 + $0x158] sm:$0xff] }
  0x41   :  { %412 = vmatpush.msrb.mxu1 %v3793_v11  ;;  %452 = vmatpush.msrb.mxu3 %v3799_v13  ;;  %5854 = vst [vmem:[#allocation31_spill] sm:$0xff] %v3885_v43  ;;  %v3931_v59 = vld [vmem:[#allocation11 + $0x138] sm:$0xff] }
  0x42   :  { %433 = vmatpush.msrb.mxu2 %v3804_v16  ;;  %469 = vmatpush.msra.mxu0 %v3864_v37  ;;  %5855 = vst [vmem:[#allocation32_spill] sm:$0xff] %v3887_v44  ;;  %v393_v60 = vld [vmem:[#allocation2 + $0x40] ss:$8 sm:$0xf] }
  0x43   :  { %413 = vmatpush.msrb.mxu1 %v3802_v15  ;;  %453 = vmatpush.msrb.mxu3 %v3808_v17  ;;  %5856 = vst [vmem:[#allocation33_spill] sm:$0xff] %v3893_v47  ;;  %v3934_v61 = vld [vmem:[#allocation11 + $0x118] sm:$0xff] }
  0x44   :  { %434 = vmatpush.msrb.mxu2 %v3813_v19  ;;  %470 = vmatpush.msra.mxu0 %v3879_v41  ;;  %5857 = vst [vmem:[#allocation34_spill] sm:$0xff] %v3895_v48  ;;  %v3937_v62 = vld [vmem:[#allocation11 + $0xf8] sm:$0xff] }
  0x45   :  { %414 = vmatpush.msrb.mxu1 %v3811_v18  ;;  %454 = vmatpush.msrb.mxu3 %v3817_v20  ;;  %5858 = vst [vmem:[#allocation35_spill] sm:$0xff] %v3899_v49  ;;  %v3940_v6 = vld [vmem:[#allocation11 + $0xd8] sm:$0xff] }
  0x46   :  { %435 = vmatpush.msrb.mxu2 %v3822_v22  ;;  %471 = vmatpush.msra.mxu0 %v3891_v46  ;;  %5859 = vst [vmem:[#allocation36_spill] sm:$0xff] %v3903_v51  ;;  %v3943_v10 = vld [vmem:[#allocation11 + $0xb8] sm:$0xff] }
  0x47   :  { %415 = vmatpush.msrb.mxu1 %v3820_v21  ;;  %455 = vmatpush.msrb.mxu3 %v3826_v23  ;;  %5860 = vst [vmem:[#allocation37_spill] sm:$0xff] %v3907_v52  ;;  %v553_v14 = vld [vmem:[#allocation2 + $0x41] ss:$8 sm:$0xf] }
  0x48   :  { %436 = vmatpush.msrb.mxu2 %v3834_v26  ;;  %5861 = vst [vmem:[#allocation38_spill] sm:$0xff] %v3909_v53  ;;  %472 = vmatpush.msra.mxu0 %v3901_v50 }
  0x49   :  { %416 = vmatpush.msrb.mxu1 %v3832_v25  ;;  %456 = vmatpush.msrb.mxu3 %v3837_v27  ;;  %5862 = vst [vmem:[#allocation39_spill] sm:$0xff] %v3915_v55 }
  0x4a   :  { %437 = vmatpush.msrb.mxu2 %v3843_v29  ;;  %5863 = vst [vmem:[#allocation40_spill] sm:$0xff] %v3917_v56  ;;  %473 = vmatpush.msra.mxu0 %v3911_v54 }
  0x4b   :  { %417 = vmatpush.msrb.mxu1 %v3841_v28  ;;  %457 = vmatpush.msrb.mxu3 %v3845_v30  ;;  %5864 = vst [vmem:[#allocation41_spill] sm:$0xff] %v3921_v57 }
  0x4c   :  { %438 = vmatpush.msrb.mxu2 %v3851_v32  ;;  %122 = vst [vmem:[#allocation2 + $0x70] sm:$0xff] %v3708_v45  ;;  %474 = vmatpush.msra.mxu0 %v3927_v58 }
  0x4d   :  { %418 = vmatpush.msrb.mxu1 %v3849_v31  ;;  %458 = vmatpush.msrb.mxu3 %v3853_v33  ;;  %123 = vst [vmem:[#allocation2 + $0x78] sm:$0xff] %v3708_v45 }
  0x4e   :  { %439 = vmatpush.msrb.mxu2 %v3858_v35  ;;  %114 = vst [vmem:[#allocation4] sm:$0x3] %v3708_v45  ;;  %475 = vmatpush.msra.mxu0 %v3931_v59 }
  0x4f   :  { %419 = vmatpush.msrb.mxu1 %v3856_v34  ;;  %459 = vmatpush.msrb.mxu3 %v3862_v36  ;;  %398 = vst [vmem:[#allocation1] ss:$9 sm:$0xff] %v393_v60  ;;  %v3946_v60 = vld [vmem:[#allocation11 + $0x98] sm:$0xff] }
  0x50   :  { %440 = vmatpush.msrb.mxu2 %v3873_v39  ;;  %476 = vmatpush.msra.mxu0 %v3934_v61  ;;  %5865 = vst [vmem:[#allocation42_spill] sm:$0xff] %v3940_v6 }
  0x51   :  { %420 = vmatpush.msrb.mxu1 %v3871_v38  ;;  %460 = vmatpush.msrb.mxu3 %v3875_v40  ;;  %5866 = vst [vmem:[#allocation43_spill] sm:$0xff] %v3943_v10 }
  0x52   :  { %441 = vmatpush.msrb.mxu2 %v3885_v43  ;;  %477 = vmatpush.msra.mxu0 %v3937_v62  ;;  %5867 = vst [vmem:[#allocation44_spill] sm:$0xff] %v3946_v60 }
  0x53   :  { %421 = vmatpush.msrb.mxu1 %v3883_v42  ;;  %461 = vmatpush.msrb.mxu3 %v3887_v44 }
  0x54   :  { %442 = vmatpush.msrb.mxu2 %v3895_v48  ;;  %v395_v2 = vld [vmem:[#allocation2 + $0x60] ss:$8 sm:$0xf]  ;;  %478 = vmatpush.msra.mxu0 %v3940_v6  ;;  %v555_v45 = vld [vmem:[#allocation2 + $0x61] ss:$8 sm:$0xf] }
  0x55   :  { %422 = vmatpush.msrb.mxu1 %v3893_v47  ;;  %462 = vmatpush.msrb.mxu3 %v3899_v49  ;;  %400 = vst [vmem:[#allocation1 + $0x1] ss:$9 sm:$0xff] %v395_v2 }
  0x56   :  { %443 = vmatpush.msrb.mxu2 %v3907_v52  ;;  %479 = vmatpush.msra.mxu0 %v3943_v10  ;;  %v3960_v52 = vld [vmem:[#allocation11 + $0x58] sm:$0xff] }
  0x57   :  { %423 = vmatpush.msrb.mxu1 %v3903_v51  ;;  %463 = vmatpush.msrb.mxu3 %v3909_v53  ;;  %v3956_v53 = vld [vmem:[#allocation11 + $0x78] sm:$0xff]  ;;  %5873 = vst [vmem:[#allocation50_spill] sm:$0xff] %v3960_v52 }
  0x58   :  { %444 = vmatpush.msrb.mxu2 %v3917_v56  ;;  %5872 = vst [vmem:[#allocation49_spill] sm:$0xff] %v3956_v53  ;;  %480 = vmatpush.msra.mxu0 %v3946_v60 }
  0x59   :  { %424 = vmatpush.msrb.mxu1 %v3915_v55  ;;  %464 = vmatpush.msrb.mxu3 %v3921_v57 }
  0x5a   :  { %481 = vmatpush.msra.mxu0 %v3956_v53 }
  0x5c   :  { %v3948_v57 = vld [vmem:[#allocation1] sm:$0xff]  ;;  %v3950_v56 = vld [vmem:[#allocation1 + $0x9] sm:$0xff]  ;;  %v3952_v2 = vld [vmem:[#allocation1 + $0x12] sm:$0xff]  ;;  %482 = vmatpush.msra.mxu0 %v3960_v52 }
  0x5d   :  { %5868 = vst [vmem:[#allocation45_spill] sm:$0xff] %v3948_v57  ;;  %v3954_v55 = vld [vmem:[#allocation1 + $0x1b] sm:$0xff] }
  0x5e   :  { %5869 = vst [vmem:[#allocation46_spill] sm:$0xff] %v3950_v56 }
  0x5f   :  { %5870 = vst [vmem:[#allocation47_spill] sm:$0xff] %v3952_v2  ;;  %v3974_v2 = vld [vmem:[#allocation11 + $0x18] sm:$0xff] }
  0x60   :  { %5871 = vst [vmem:[#allocation48_spill] sm:$0xff] %v3954_v55  ;;  %v715_v55 = vld [vmem:[#allocation2 + $0x62] ss:$8 sm:$0xf] }
  0x61   :  { %558 = vst [vmem:[#allocation1] ss:$9 sm:$0xff] %v553_v14 }
  0x62   :  { %560 = vst [vmem:[#allocation1 + $0x1] ss:$9 sm:$0xff] %v555_v45  ;;  %v713_v45 = vld [vmem:[#allocation2 + $0x42] ss:$8 sm:$0xf] }
  0x63   :  { %5875 = vst [vmem:[#allocation52_spill] sm:$0xff] %v3974_v2 }
  0x69   :  { %v3976_v56 = vld [vmem:[#allocation1] sm:$0xff]  ;;  %v3978_v57 = vld [vmem:[#allocation1 + $0x9] sm:$0xff] }
  0x6a   :  { %5876 = vst [vmem:[#allocation53_spill] sm:$0xff] %v3976_v56  ;;  %v5890_v56 = vld [vmem:[#allocation23_spill] sm:$0xff] }
  0x6b   :  { %5877 = vst [vmem:[#allocation54_spill] sm:$0xff] %v3978_v57 }
  0x99   :  { %v152_v24 = vpop.f32.mrf.mxu0 }
  0x9a   :  { %1674 = vst [vmem:[#allocation14] sm:$0xff] %v152_v24  ;;  %248 = vmatmul.f32.vlgmr.msra.gmra.mxu1 %v152_v24  ;;  %271 = vmatmul.f32.vlgmr.msra.gmra.mxu2 %v152_v24 }
  0x9b   :  { %294 = vmatmul.f32.vlgmr.msra.gmra.mxu3 %v152_v24  ;;  %317 = vmatmul.f32.vlgmr.msrb.gmra.mxu0 %v152_v24  ;;  %v3970_v24 = vld [vmem:[#allocation11 + $0x38] sm:$0xff] }
  0x9c   :  { %569 = vmatpush.msra.mxu1 %v3769_v63  ;;  %589 = vmatpush.msra.mxu2 %v3771_v0  ;;  %5874 = vst [vmem:[#allocation51_spill] sm:$0xff] %v3970_v24 }
  0x9d   :  { %609 = vmatpush.msra.mxu3 %v3773_v1  ;;  %483 = vmatpush.msra.mxu0 %v3970_v24 }
  0x9e   :  { %570 = vmatpush.msra.mxu1 %v3775_v3  ;;  %590 = vmatpush.msra.mxu2 %v3777_v4 }
  0x9f   :  { %610 = vmatpush.msra.mxu3 %v3781_v5  ;;  %484 = vmatpush.msra.mxu0 %v3974_v2 }
  0xa0   :  { %571 = vmatpush.msra.mxu1 %v3784_v7  ;;  %591 = vmatpush.msra.mxu2 %v3786_v8  ;;  %v3980_v7 = vld [vmem:[#allocation1 + $0x12] sm:$0xff] }
  0xa1   :  { %v155_v14 = vpop.f32.mrf.mxu0  ;;  %611 = vmatpush.msra.mxu3 %v3790_v9  ;;  %5878 = vst [vmem:[#allocation55_spill] sm:$0xff] %v3980_v7  ;;  %v3984_v9 = vld [vmem:[#allocation1 + $0x1b] sm:$0xff]  ;;  %629 = vmatpush.msrb.mxu0 %v3864_v37 }
  0xa2   :  { %1675 = vst [vmem:[#allocation14 + $0x8] sm:$0xff] %v155_v14  ;;  %251 = vmatmul.f32.gmra.mxu1 %v155_v14  ;;  %274 = vmatmul.f32.gmra.mxu2 %v155_v14 }
  0xa3   :  { %297 = vmatmul.f32.gmra.mxu3 %v155_v14  ;;  %320 = vmatmul.f32.gmra.mxu0 %v155_v14  ;;  %5879 = vst [vmem:[#allocation56_spill] sm:$0xff] %v3984_v9  ;;  %v324_v14 = vld [vmem:[#allocation3] sm:$0x3]  ;;  %3046 = dma.vmem_to_hbm [thread:$0]  %s3039_s25, 256, %s3041_s23, [#allocation7], %s3700_s26, %s3700_s26, %s3701_s27  }
  0xa4   :  { %572 = vmatpush.msra.mxu1 %v3793_v11  ;;  %592 = vmatpush.msra.mxu2 %v3795_v12  ;;  %718 = vst [vmem:[#allocation1] ss:$9 sm:$0xff] %v713_v45  ;;  %v875_v45 = vld [vmem:[#allocation2 + $0x63] ss:$8 sm:$0xf]  ;;  %s3052_s26 = sshll.u32 %s3710_s5, 4  ;;  %s3053_s26 = int_to_ptr.vmem [resolvable:$true] %s3052_s26 }
  0xa5   :  { %612 = vmatpush.msra.mxu3 %v3799_v13  ;;  %720 = vst [vmem:[#allocation1 + $0x1] ss:$9 sm:$0xff] %v715_v55  ;;  %630 = vmatpush.msrb.mxu0 %v3879_v41  ;;  %v873_v55 = vld [vmem:[#allocation2 + $0x43] ss:$8 sm:$0xf] }
  0xa6   :  { %573 = vmatpush.msra.mxu1 %v3802_v15  ;;  %593 = vmatpush.msra.mxu2 %v3804_v16 }
  0xa7   :  { %613 = vmatpush.msra.mxu3 %v3808_v17  ;;  %631 = vmatpush.msrb.mxu0 %v3891_v46 }
  0xa8   :  { %574 = vmatpush.msra.mxu1 %v3811_v18  ;;  %594 = vmatpush.msra.mxu2 %v3813_v19 }
  0xa9   :  { %614 = vmatpush.msra.mxu3 %v3817_v20  ;;  %632 = vmatpush.msrb.mxu0 %v3901_v50 }
  0xaa   :  { %425 = vmatmul.f32.vlgmr.msrb.gmra.mxu1 %v324_v14  ;;  %445 = vmatmul.f32.vlgmr.msrb.gmra.mxu2 %v324_v14 }
  0xab   :  { %465 = vmatmul.f32.vlgmr.msrb.gmra.mxu3 %v324_v14  ;;  %485 = vmatmul.f32.vlgmr.msra.gmra.mxu0 %v324_v14 }
  0xac   :  { %575 = vmatpush.msra.mxu1 %v3820_v21  ;;  %595 = vmatpush.msra.mxu2 %v3822_v22  ;;  %v4000_v9 = vld [vmem:[#allocation1] sm:$0xff]  ;;  %v4002_v7 = vld [vmem:[#allocation1 + $0x9] sm:$0xff]  ;;  %v4004_v57 = vld [vmem:[#allocation1 + $0x12] sm:$0xff] }
  0xad   :  { %5880 = vst [vmem:[#allocation57_spill] sm:$0xff] %v4000_v9  ;;  %615 = vmatpush.msra.mxu3 %v3826_v23  ;;  %v4008_v14 = vld [vmem:[#allocation1 + $0x1b] sm:$0xff]  ;;  %633 = vmatpush.msrb.mxu0 %v3911_v54 }
  0xae   :  { %5881 = vst [vmem:[#allocation58_spill] sm:$0xff] %v4002_v7  ;;  %576 = vmatpush.msra.mxu1 %v3832_v25  ;;  %596 = vmatpush.msra.mxu2 %v3834_v26  ;;  %v5888_v7 = vld [vmem:[#allocation41_spill] sm:$0xff]  ;;  %v5889_v9 = vld [vmem:[#allocation22_spill] sm:$0xff] }
  0xaf   :  { %5882 = vst [vmem:[#allocation59_spill] sm:$0xff] %v4004_v57  ;;  %616 = vmatpush.msra.mxu3 %v3837_v27  ;;  %634 = vmatpush.msrb.mxu0 %v3927_v58  ;;  %v5887_v57 = vld [vmem:[#allocation40_spill] sm:$0xff] }
  0xb0   :  { %5883 = vst [vmem:[#allocation60_spill] sm:$0xff] %v4008_v14  ;;  %577 = vmatpush.msra.mxu1 %v3841_v28  ;;  %597 = vmatpush.msra.mxu2 %v3843_v29  ;;  %v5886_v14 = vld [vmem:[#allocation39_spill] sm:$0xff] }
  0xb1   :  { %878 = vst [vmem:[#allocation1] ss:$9 sm:$0xff] %v873_v55  ;;  %617 = vmatpush.msra.mxu3 %v3845_v30  ;;  %635 = vmatpush.msrb.mxu0 %v3931_v59  ;;  %v5884_v55 = vld [vmem:[#allocation37_spill] sm:$0xff] }
  0xb2   :  { %880 = vst [vmem:[#allocation1 + $0x1] ss:$9 sm:$0xff] %v875_v45  ;;  %578 = vmatpush.msra.mxu1 %v3849_v31  ;;  %598 = vmatpush.msra.mxu2 %v3851_v32  ;;  %v5885_v45 = vld [vmem:[#allocation38_spill] sm:$0xff] }
  0xb3   :  { %618 = vmatpush.msra.mxu3 %v3853_v33  ;;  %636 = vmatpush.msrb.mxu0 %v3934_v61 }
  0xb4   :  { %579 = vmatpush.msra.mxu1 %v3856_v34  ;;  %599 = vmatpush.msra.mxu2 %v3858_v35 }
  0xb5   :  { %619 = vmatpush.msra.mxu3 %v3862_v36  ;;  %637 = vmatpush.msrb.mxu0 %v3937_v62 }
  0xb6   :  { %580 = vmatpush.msra.mxu1 %v3871_v38  ;;  %600 = vmatpush.msra.mxu2 %v3873_v39 }
  0xb7   :  { %620 = vmatpush.msra.mxu3 %v3875_v40  ;;  %638 = vmatpush.msrb.mxu0 %v3940_v6 }
  0xb8   :  { %581 = vmatpush.msra.mxu1 %v3883_v42  ;;  %601 = vmatpush.msra.mxu2 %v3885_v43 }
  0xb9   :  { %621 = vmatpush.msra.mxu3 %v3887_v44  ;;  %639 = vmatpush.msrb.mxu0 %v3943_v10 }
  0xba   :  { %582 = vmatpush.msra.mxu1 %v3893_v47  ;;  %602 = vmatpush.msra.mxu2 %v3895_v48 }
  0xbb   :  { %622 = vmatpush.msra.mxu3 %v3899_v49  ;;  %640 = vmatpush.msrb.mxu0 %v3946_v60 }
  0xbc   :  { %583 = vmatpush.msra.mxu1 %v3903_v51  ;;  %603 = vmatpush.msra.mxu2 %v5884_v55 }
  0xbd   :  { %623 = vmatpush.msra.mxu3 %v5885_v45  ;;  %641 = vmatpush.msrb.mxu0 %v3956_v53 }
  0xbe   :  { %584 = vmatpush.msra.mxu1 %v5886_v14  ;;  %604 = vmatpush.msra.mxu2 %v5887_v57 }
  0xbf   :  { %624 = vmatpush.msra.mxu3 %v5888_v7  ;;  %642 = vmatpush.msrb.mxu0 %v3960_v52 }
  0xc0   :  { %729 = vmatpush.msrb.mxu1 %v3769_v63  ;;  %749 = vmatpush.msrb.mxu2 %v3771_v0 }
  0xc1   :  { %769 = vmatpush.msrb.mxu3 %v3773_v1  ;;  %643 = vmatpush.msrb.mxu0 %v3970_v24 }
  0xc2   :  { %730 = vmatpush.msrb.mxu1 %v3775_v3  ;;  %750 = vmatpush.msrb.mxu2 %v3777_v4 }
  0xc3   :  { %770 = vmatpush.msrb.mxu3 %v3781_v5  ;;  %644 = vmatpush.msrb.mxu0 %v3974_v2 }
  0xc4   :  { %731 = vmatpush.msrb.mxu1 %v5889_v9  ;;  %751 = vmatpush.msrb.mxu2 %v3786_v8 }
  0xc5   :  { %771 = vmatpush.msrb.mxu3 %v5890_v56  ;;  %789 = vmatpush.msra.mxu0 %v3864_v37 }
  0xc6   :  { %732 = vmatpush.msrb.mxu1 %v3793_v11  ;;  %752 = vmatpush.msrb.mxu2 %v3795_v12 }
  0xc7   :  { %772 = vmatpush.msrb.mxu3 %v3799_v13  ;;  %790 = vmatpush.msra.mxu0 %v3879_v41 }
  0xc8   :  { %733 = vmatpush.msrb.mxu1 %v3802_v15  ;;  %753 = vmatpush.msrb.mxu2 %v3804_v16 }
  0xc9   :  { %773 = vmatpush.msrb.mxu3 %v3808_v17  ;;  %791 = vmatpush.msra.mxu0 %v3891_v46 }
  0xca   :  { %734 = vmatpush.msrb.mxu1 %v3811_v18  ;;  %754 = vmatpush.msrb.mxu2 %v3813_v19 }
  0xcb   :  { %774 = vmatpush.msrb.mxu3 %v3817_v20  ;;  %792 = vmatpush.msra.mxu0 %v3901_v50 }
  0xcc   :  { %735 = vmatpush.msrb.mxu1 %v3820_v21  ;;  %755 = vmatpush.msrb.mxu2 %v3822_v22 }
  0xcd   :  { %775 = vmatpush.msrb.mxu3 %v3826_v23  ;;  %793 = vmatpush.msra.mxu0 %v3911_v54 }
  0xce   :  { %736 = vmatpush.msrb.mxu1 %v3832_v25  ;;  %756 = vmatpush.msrb.mxu2 %v3834_v26 }
  0xcf   :  { %776 = vmatpush.msrb.mxu3 %v3837_v27  ;;  %794 = vmatpush.msra.mxu0 %v3927_v58 }
  0xd0   :  { %737 = vmatpush.msrb.mxu1 %v3841_v28  ;;  %757 = vmatpush.msrb.mxu2 %v3843_v29 }
  0xd1   :  { %777 = vmatpush.msrb.mxu3 %v3845_v30  ;;  %795 = vmatpush.msra.mxu0 %v3931_v59 }
  0xd2   :  { %738 = vmatpush.msrb.mxu1 %v3849_v31  ;;  %758 = vmatpush.msrb.mxu2 %v3851_v32 }
  0xd3   :  { %778 = vmatpush.msrb.mxu3 %v3853_v33  ;;  %796 = vmatpush.msra.mxu0 %v3934_v61 }
  0xd4   :  { %739 = vmatpush.msrb.mxu1 %v3856_v34  ;;  %759 = vmatpush.msrb.mxu2 %v3858_v35 }
  0xd5   :  { %779 = vmatpush.msrb.mxu3 %v3862_v36  ;;  %797 = vmatpush.msra.mxu0 %v3937_v62 }
  0xd6   :  { %740 = vmatpush.msrb.mxu1 %v3871_v38  ;;  %760 = vmatpush.msrb.mxu2 %v3873_v39 }
  0xd7   :  { %780 = vmatpush.msrb.mxu3 %v3875_v40  ;;  %798 = vmatpush.msra.mxu0 %v3940_v6 }
  0xd8   :  { %741 = vmatpush.msrb.mxu1 %v3883_v42  ;;  %761 = vmatpush.msrb.mxu2 %v3885_v43 }
  0xd9   :  { %781 = vmatpush.msrb.mxu3 %v3887_v44  ;;  %799 = vmatpush.msra.mxu0 %v3943_v10 }
  0xda   :  { %742 = vmatpush.msrb.mxu1 %v3893_v47  ;;  %762 = vmatpush.msrb.mxu2 %v3895_v48  ;;  %v4113_v48 = vld [vmem:[#allocation1] sm:$0xff]  ;;  %v4119_v47 = vld [vmem:[#allocation1 + $0x12] sm:$0xff] }
  0xdb   :  { %782 = vmatpush.msrb.mxu3 %v3899_v49  ;;  %800 = vmatpush.msra.mxu0 %v3946_v60  ;;  %v1033_v49 = vld [vmem:[#allocation2 + $0x44] ss:$8 sm:$0xf]  ;;  %5891 = vst [vmem:[#allocation22_spill] sm:$0xff] %v4113_v48 }
  0xdc   :  { %743 = vmatpush.msrb.mxu1 %v3903_v51  ;;  %763 = vmatpush.msrb.mxu2 %v5884_v55  ;;  %v1035_v51 = vld [vmem:[#allocation2 + $0x64] ss:$8 sm:$0xf]  ;;  %5894 = vst [vmem:[#allocation62_spill] sm:$0xff] %v4119_v47 }
  0xdd   :  { %783 = vmatpush.msrb.mxu3 %v5885_v45  ;;  %801 = vmatpush.msra.mxu0 %v3956_v53  ;;  %v4115_v55 = vld [vmem:[#allocation1 + $0x1b] sm:$0xff]  ;;  %v4117_v45 = vld [vmem:[#allocation1 + $0x9] sm:$0xff] }
  0xde   :  { %744 = vmatpush.msrb.mxu1 %v5886_v14  ;;  %764 = vmatpush.msrb.mxu2 %v5887_v57  ;;  %5892 = vst [vmem:[#allocation23_spill] sm:$0xff] %v4115_v55  ;;  %v1193_v57 = vld [vmem:[#allocation2 + $0x45] ss:$8 sm:$0xf] }
  0xdf   :  { %784 = vmatpush.msrb.mxu3 %v5888_v7  ;;  %802 = vmatpush.msra.mxu0 %v3960_v52  ;;  %5893 = vst [vmem:[#allocation61_spill] sm:$0xff] %v4117_v45  ;;  %v1195_v7 = vld [vmem:[#allocation2 + $0x65] ss:$8 sm:$0xf] }
  0xe0   :  { %1038 = vst [vmem:[#allocation1] ss:$9 sm:$0xff] %v1033_v49  ;;  %v1353_v48 = vld [vmem:[#allocation2 + $0x46] ss:$8 sm:$0xf] }
  0xe1   :  { %803 = vmatpush.msra.mxu0 %v3970_v24  ;;  %1040 = vst [vmem:[#allocation1 + $0x1] ss:$9 sm:$0xff] %v1035_v51  ;;  %v1355_v55 = vld [vmem:[#allocation2 + $0x66] ss:$8 sm:$0xf] }
  0xe3   :  { %804 = vmatpush.msra.mxu0 %v3974_v2 }
  0xe8   :  { %v4121_v14 = vld [vmem:[#allocation1] sm:$0xff]  ;;  %v4125_v24 = vld [vmem:[#allocation1 + $0x9] sm:$0xff]  ;;  %v4127_v2 = vld [vmem:[#allocation1 + $0x12] sm:$0xff] }
  0xe9   :  { %5895 = vst [vmem:[#allocation63_spill] sm:$0xff] %v4121_v14  ;;  %v4123_v52 = vld [vmem:[#allocation1 + $0x1b] sm:$0xff] }
  0xea   :  { %5896 = vst [vmem:[#allocation64_spill] sm:$0xff] %v4123_v52  ;;  %v1513_v14 = vld [vmem:[#allocation2 + $0x47] ss:$8 sm:$0xf] }
  0xeb   :  { %5897 = vst [vmem:[#allocation65_spill] sm:$0xff] %v4125_v24  ;;  %v1515_v52 = vld [vmem:[#allocation2 + $0x67] ss:$8 sm:$0xf] }
  0xec   :  { %5898 = vst [vmem:[#allocation66_spill] sm:$0xff] %v4127_v2 }
  0xed   :  { %1198 = vst [vmem:[#allocation1] ss:$9 sm:$0xff] %v1193_v57 }
  0xee   :  { %1200 = vst [vmem:[#allocation1 + $0x1] ss:$9 sm:$0xff] %v1195_v7 }
  0xf5   :  { %v4129_v53 = vld [vmem:[#allocation1] sm:$0xff]  ;;  %v4133_v49 = vld [vmem:[#allocation1 + $0x9] sm:$0xff]  ;;  %v4135_v51 = vld [vmem:[#allocation1 + $0x12] sm:$0xff] }
  0xf6   :  { %5899 = vst [vmem:[#allocation67_spill] sm:$0xff] %v4129_v53  ;;  %v4131_v45 = vld [vmem:[#allocation1 + $0x1b] sm:$0xff]  ;;  %v222_v53 = vld [vmem:[#allocation13] sm:$0xf] }
  0xf7   :  { %5900 = vst [vmem:[#allocation68_spill] sm:$0xff] %v4131_v45  ;;  %v224_v45 = vperm.slane %v222_v53, 0  ;;  %v227_v2 = vperm.slane %v222_v53, 3  ;;  %v226_v43 = vperm.slane %v222_v53, 2 }
  0xf8   :  { %5901 = vst [vmem:[#allocation69_spill] sm:$0xff] %v4133_v49 }
  0xf9   :  { %5902 = vst [vmem:[#allocation70_spill] sm:$0xff] %v4135_v51 }
  0xfa   :  { %1358 = vst [vmem:[#allocation1] ss:$9 sm:$0xff] %v1353_v48 }
  0xfb   :  { %1360 = vst [vmem:[#allocation1 + $0x1] ss:$9 sm:$0xff] %v1355_v55  ;;  %v225_v55 = vperm.slane %v222_v53, 1 }
 0x102   :  { %v4137_v47 = vld [vmem:[#allocation1] sm:$0xff]  ;;  %v4141_v57 = vld [vmem:[#allocation1 + $0x9] sm:$0xff]  ;;  %v4143_v7 = vld [vmem:[#allocation1 + $0x12] sm:$0xff] }
 0x103   :  { %5903 = vst [vmem:[#allocation71_spill] sm:$0xff] %v4137_v47  ;;  %v4139_v24 = vld [vmem:[#allocation1 + $0x1b] sm:$0xff] }
 0x104   :  { %5904 = vst [vmem:[#allocation72_spill] sm:$0xff] %v4139_v24 }
 0x105   :  { %5905 = vst [vmem:[#allocation73_spill] sm:$0xff] %v4141_v57 }
 0x106   :  { %5906 = vst [vmem:[#allocation74_spill] sm:$0xff] %v4143_v7 }
 0x107   :  { %1518 = vst [vmem:[#allocation1] ss:$9 sm:$0xff] %v1513_v14 }
 0x108   :  { %1520 = vst [vmem:[#allocation1 + $0x1] ss:$9 sm:$0xff] %v1515_v52 }
 0x10f   :  { %v4146_v53 = vld [vmem:[#allocation1] sm:$0xff]  ;;  %v4150_v10 = vld [vmem:[#allocation1 + $0x9] sm:$0xff] }
 0x110   :  { %5910 = vst [vmem:[#allocation76_spill] sm:$0xff] %v4150_v10 }
 0x117   :  { %v249_v49 = vpop.f32.mrf.mxu1 }
 0x118   :  { %v250_v44 = vadd.f32 %v249_v49, %v224_v45  ;;  %v318_v51 = vpop.f32.mrf.mxu0 }
 0x119   :  { %v319_v48 = vadd.f32 %v318_v51, %v227_v2 }
 0x11a   :  { %1679 = vst [vmem:[#allocation2] sm:$0xff] %v250_v44  ;;  %v5907_v44 = vld [vmem:[#allocation45_spill] sm:$0xff] }
 0x11b   :  { %1682 = vst [vmem:[#allocation2 + $0x18] sm:$0xff] %v319_v48 }
 0x11c   :  { %5908 = vst [vmem:[#allocation45_spill] sm:$0xff] %v4146_v53 }
 0x11d   :  { %v272_v47 = vpop.f32.mrf.mxu2 }
 0x11e   :  { %v273_v42 = vadd.f32 %v272_v47, %v225_v55  ;;  %v295_v24 = vpop.f32.mrf.mxu3  ;;  %v4148_v47 = vld [vmem:[#allocation1 + $0x1b] sm:$0xff] }
 0x11f   :  { %v296_v60 = vadd.f32 %v295_v24, %v226_v43  ;;  %v252_v57 = vpop.f32.mrf.mxu1  ;;  %5909 = vst [vmem:[#allocation75_spill] sm:$0xff] %v4148_v47 }
 0x120   :  { %1680 = vst [vmem:[#allocation2 + $0x8] sm:$0xff] %v273_v42  ;;  %v253_v7 = vadd.f32 %v252_v57, %v224_v45  ;;  %v321_v14 = vpop.f32.mrf.mxu0  ;;  %v4152_v42 = vld [vmem:[#allocation1 + $0x12] sm:$0xff]  ;;  %v5912_v45 = vld [vmem:[#allocation46_spill] sm:$0xff] }
 0x121   :  { %1681 = vst [vmem:[#allocation2 + $0x10] sm:$0xff] %v296_v60  ;;  %v322_v52 = vadd.f32 %v321_v14, %v227_v2 }
 0x122   :  { %1683 = vst [vmem:[#allocation2 + $0x20] sm:$0xff] %v253_v7 }
 0x123   :  { %1686 = vst [vmem:[#allocation2 + $0x38] sm:$0xff] %v322_v52 }
 0x124   :  { %5911 = vst [vmem:[#allocation77_spill] sm:$0xff] %v4152_v42 }
 0x125   :  { %v275_v40 = vpop.f32.mrf.mxu2 }
 0x126   :  { %v298_v49 = vpop.f32.mrf.mxu3  ;;  %v276_v51 = vadd.f32 %v275_v40, %v225_v55 }
 0x127   :  { %v426_v39 = vpop.f32.mrf.mxu1  ;;  %v299_v48 = vadd.f32 %v298_v49, %v226_v43 }
 0x128   :  { %v427_v38 = vadd.f32 %v426_v39, %v5907_v44  ;;  %v1754_v24 = vld [vmem:[#allocation2] ss:$8 sm:$0xf]  ;;  %1684 = vst [vmem:[#allocation2 + $0x28] sm:$0xff] %v276_v51 }
 0x129   :  { %1685 = vst [vmem:[#allocation2 + $0x30] sm:$0xff] %v299_v48  ;;  %v5913_v39 = vld [vmem:[#allocation47_spill] sm:$0xff] }
 0x12a   :  { %v3077_v60 = vmul.f32 -1.442695, %v427_v38  ;;  %1759 = vst [vmem:[#allocation1] ss:$9 sm:$0xff] %v1754_v24  ;;  %v486_v24 = vpop.f32.mrf.mxu0 }
 0x12c   :  { %3137 = vpow2.f32 %v3077_v60  ;;  %v5914_v60 = vld [vmem:[#allocation48_spill] sm:$0xff] }
 0x12d   :  { %v446_v2 = vpop.f32.mrf.mxu2 }
 0x12e   :  { %v447_v57 = vadd.f32 %v446_v2, %v5912_v45  ;;  %v466_v7 = vpop.f32.mrf.mxu3  ;;  %v487_v2 = vadd.f32 %v486_v24, %v5914_v60 }
 0x12f   :  { %v467_v40 = vadd.f32 %v466_v7, %v5913_v39 }
 0x130   :  { %v3078_v43 = vmul.f32 -1.442695, %v447_v57  ;;  %v1756_v52 = vld [vmem:[#allocation2 + $0x20] ss:$8 sm:$0xf] }
 0x131   :  { %v3079_v55 = vmul.f32 -1.442695, %v467_v40  ;;  %1761 = vst [vmem:[#allocation1 + $0x1] ss:$9 sm:$0xff] %v1756_v52 }
 0x132   :  { %3139 = vpow2.f32 %v3078_v43  ;;  %v3138_v14 = vpop.eup %3137  ;;  %v1914_v40 = vld [vmem:[#allocation2 + $0x1] ss:$8 sm:$0xf] }
 0x133   :  { %3141 = vpow2.f32 %v3079_v55  ;;  %v498_v44 = vadd.f32 1.0, %v3138_v14  ;;  %v1916_v14 = vld [vmem:[#allocation2 + $0x21] ss:$8 sm:$0xf] }
 0x135   :  { %3143 = vrcp.f32 %v498_v44  ;;  %vm506_vm1 = vweird.f32 %v498_v44 }
 0x138   :  { %v3140_v49 = vpop.eup %3139  ;;  %v4160_v45 = vld [vmem:[#allocation1] sm:$0xff]  ;;  %v4164_v7 = vld [vmem:[#allocation1 + $0x9] sm:$0xff]  ;;  %v4166_v43 = vld [vmem:[#allocation1 + $0x12] sm:$0xff] }
 0x139   :  { %v3142_v51 = vpop.eup %3141  ;;  %v499_v38 = vadd.f32 1.0, %v3140_v49  ;;  %5915 = vst [vmem:[#allocation46_spill] sm:$0xff] %v4160_v45  ;;  %v4162_v57 = vld [vmem:[#allocation1 + $0x1b] sm:$0xff]  ;;  %v510_v45 = vand.u32 2147483647, %v498_v44 }
 0x13a   :  { %v4156_v48 = vadd.f32 1.0, %v3142_v51  ;;  %5916 = vst [vmem:[#allocation47_spill] sm:$0xff] %v4162_v57  ;;  %v512_v57 = vand.u32 2147483648, %v498_v44 }
 0x13b   :  { %3145 = vrcp.f32 %v499_v38  ;;  %5917 = vst [vmem:[#allocation48_spill] sm:$0xff] %v4164_v7  ;;  %v3144_v39 = vpop.eup %3143  ;;  %v527_v7 = vand.u32 2147483648, %v499_v38  ;;  %v525_v10 = vand.u32 2147483647, %v499_v38  ;;  %vm521_vm4 = vweird.f32 %v499_v38 }
 0x13c   :  { %3147 = vrcp.f32 %v4156_v48  ;;  %5918 = vst [vmem:[#allocation78_spill] sm:$0xff] %v4166_v43  ;;  %v502_v52 = vmul.f32 %v3144_v39, %v498_v44  ;;  %vm507_vm2 = vweird.f32 %v3144_v39  ;;  %vm511_vm7 = vcmp.eq.f32.partialorder %v510_v45, 8.507059e+37 }
 0x13d   :  { %1919 = vst [vmem:[#allocation1] ss:$9 sm:$0xff] %v1914_v40  ;;  %3149 = vtanh.f32 %v487_v2  ;;  %vm508_vm5 = vmor %vm506_vm1, %vm507_vm2  ;;  %v513_v2 = vor.u32 1.1754944e-38, %v512_v57  ;;  %v528_v35 = vor.u32 1.1754944e-38, %v527_v7  ;;  %vm526_vm8 = vcmp.eq.f32.partialorder %v525_v10, 8.507059e+37 }
 0x13e   :  { %1921 = vst [vmem:[#allocation1 + $0x1] ss:$9 sm:$0xff] %v1916_v14  ;;  %v503_v47 = vsub.f32 1.0, %v502_v52  ;;  %v325_v52 = vld [vmem:[#allocation4] sm:$0x3]  ;;  %vm536_vm9 = vweird.f32 %v4156_v48 }
 0x13f   :  { %v2076_v57 = vld [vmem:[#allocation2 + $0x22] ss:$8 sm:$0xf] }
 0x140   :  { %v504_v43 = vmul.f32 %v3144_v39, %v503_v47 }
 0x141   :  { %v3146_v55 = vpop.eup %3145 }
 0x142   :  { %v4168_v49 = vpop.eup %3147  ;;  %v517_v51 = vmul.f32 %v3146_v55, %v499_v38  ;;  %vm522_vm3 = vweird.f32 %v3146_v55  ;;  %v505_v53 = vadd.f32 %v3144_v39, %v504_v43  ;;  %v2074_v38 = vld [vmem:[#allocation2 + $0x2] ss:$8 sm:$0xf] }
 0x143   :  { %v532_v24 = vmul.f32 %v4168_v49, %v4156_v48  ;;  %vm4172_vm6 = vmor %vm521_vm4, %vm522_vm3  ;;  %v3150_v36 = vpop.eup %3149  ;;  %vm537_vm10 = vweird.f32 %v4168_v49 }
 0x144   :  { %v518_v60 = vsub.f32 1.0, %v517_v51  ;;  %v509_v34 = vsel %vm508_vm5, %v3144_v39, %v505_v53  ;;  %vm538_vm11 = vmor %vm536_vm9, %vm537_vm10 }
 0x145   :  { %v533_v40 = vsub.f32 1.0, %v532_v24  ;;  %v4176_v6 = vld [vmem:[#allocation1] sm:$0xff]  ;;  %v4180_v44 = vld [vmem:[#allocation1 + $0x9] sm:$0xff]  ;;  %v514_v43 = vsel %vm511_vm7, %v513_v2, %v509_v34 }
 0x146   :  { %v519_v42 = vmul.f32 %v3146_v55, %v518_v60  ;;  %5921 = vst [vmem:[#allocation79_spill] sm:$0xff] %v4176_v6  ;;  %v4178_v47 = vld [vmem:[#allocation1 + $0x1b] sm:$0xff]  ;;  %v4184_v60 = vld [vmem:[#allocation1 + $0x12] sm:$0xff]  ;;  %v548_v45 = vmul.f32 %v3150_v36, %v514_v43 }
 0x147   :  { %5922 = vst [vmem:[#allocation80_spill] sm:$0xff] %v4178_v47  ;;  %v534_v7 = vmul.f32 %v4168_v49, %v533_v40  ;;  %v542_v47 = vand.u32 2147483648, %v4156_v48  ;;  %v4494_v6 = vld [vmem:[#allocation11 + $0x10] sm:$0xff] }
 0x148   :  { %v520_v51 = vadd.f32 %v3146_v55, %v519_v42  ;;  %5923 = vst [vmem:[#allocation81_spill] sm:$0xff] %v4180_v44  ;;  %v4491_v44 = vld [vmem:[#allocation11 + $0x8] sm:$0xff] }
 0x149   :  { %5924 = vst [vmem:[#allocation82_spill] sm:$0xff] %v4184_v60  ;;  %v535_v34 = vadd.f32 %v4168_v49, %v534_v7  ;;  %v543_v10 = vor.u32 1.1754944e-38, %v542_v47  ;;  %v4488_v60 = vld [vmem:[#allocation11] sm:$0xff] }
 0x14a   :  { %v524_v24 = vsel %vm4172_vm6, %v3146_v55, %v520_v51  ;;  %2079 = vst [vmem:[#allocation1] ss:$9 sm:$0xff] %v2074_v38  ;;  %v2236_v51 = vld [vmem:[#allocation2 + $0x23] ss:$8 sm:$0xf] }
 0x14b   :  { %v529_v42 = vsel %vm526_vm8, %v528_v35, %v524_v24  ;;  %2081 = vst [vmem:[#allocation1 + $0x1] ss:$9 sm:$0xff] %v2076_v57  ;;  %v540_v35 = vand.u32 2147483647, %v4156_v48  ;;  %v539_v55 = vsel %vm538_vm11, %v4168_v49, %v535_v34 }
 0x14c   :  { %v547_v53 = vmul.f32 %v529_v42, %v325_v52  ;;  %v2234_v52 = vld [vmem:[#allocation2 + $0x3] ss:$8 sm:$0xf]  ;;  %v2394_v57 = vld [vmem:[#allocation2 + $0x4] ss:$8 sm:$0xf] }
 0x14d   :  { %vm541_vm12 = vcmp.eq.f32.partialorder %v540_v35, 8.507059e+37  ;;  %v2876_v35 = vld [vmem:[#allocation2 + $0x27] ss:$8 sm:$0xf]  ;;  %5996 = vst [vmem:[#allocation96_spill] sm:$0xff] %v4488_v60 }
 0x14e   :  { %v4187_v39 = vadd.f32 %v548_v45, %v547_v53  ;;  %v544_v43 = vsel %vm541_vm12, %v543_v10, %v539_v55  ;;  %v2874_v45 = vld [vmem:[#allocation2 + $0x7] ss:$8 sm:$0xf]  ;;  %5997 = vst [vmem:[#allocation97_spill] sm:$0xff] %v4491_v44 }
 0x14f   :  { %v5970_v55 = vld [vmem:[#allocation53_spill] sm:$0xff]  ;;  %5998 = vst [vmem:[#allocation98_spill] sm:$0xff] %v4494_v6 }
 0x150   :  { %3151 = vtanh.f32 %v4187_v39 }
 0x152   :  { %v4196_v36 = vld [vmem:[#allocation1] sm:$0xff]  ;;  %v4200_v14 = vld [vmem:[#allocation1 + $0x9] sm:$0xff]  ;;  %v4202_v2 = vld [vmem:[#allocation1 + $0x12] sm:$0xff] }
 0x153   :  { %5925 = vst [vmem:[#allocation83_spill] sm:$0xff] %v4196_v36  ;;  %v4198_v40 = vld [vmem:[#allocation1 + $0x1b] sm:$0xff]  ;;  %v4485_v36 = vld [vmem:[#allocation11 + $0x38] sm:$0xff] }
 0x154   :  { %5926 = vst [vmem:[#allocation84_spill] sm:$0xff] %v4198_v40  ;;  %v4476_v40 = vld [vmem:[#allocation11 + $0x20] sm:$0xff] }
 0x155   :  { %5927 = vst [vmem:[#allocation85_spill] sm:$0xff] %v4200_v14  ;;  %v4482_v14 = vld [vmem:[#allocation11 + $0x30] sm:$0xff] }
 0x156   :  { %5928 = vst [vmem:[#allocation86_spill] sm:$0xff] %v4202_v2  ;;  %v3152_v38 = vpop.eup %3151  ;;  %v4479_v2 = vld [vmem:[#allocation11 + $0x28] sm:$0xff] }
 0x157   :  { %2239 = vst [vmem:[#allocation1] ss:$9 sm:$0xff] %v2234_v52  ;;  %v551_v48 = vmul.f32 %v3152_v38, %v544_v43  ;;  %v5971_v43 = vld [vmem:[#allocation54_spill] sm:$0xff] }
 0x158   :  { %2241 = vst [vmem:[#allocation1 + $0x1] ss:$9 sm:$0xff] %v2236_v51 }
 0x159   :  { %585 = vmatmul.f32.vlgmr.msra.gmra.mxu1 %v551_v48  ;;  %605 = vmatmul.f32.vlgmr.msra.gmra.mxu2 %v551_v48  ;;  %5992 = vst [vmem:[#allocation54_spill] sm:$0xff] %v4476_v40 }
 0x15a   :  { %625 = vmatmul.f32.vlgmr.msra.gmra.mxu3 %v551_v48  ;;  %645 = vmatmul.f32.vlgmr.msrb.gmra.mxu0 %v551_v48  ;;  %5995 = vst [vmem:[#allocation95_spill] sm:$0xff] %v4485_v36 }
 0x15b   :  { %889 = vmatpush.msra.mxu1 %v3769_v63  ;;  %909 = vmatpush.msra.mxu2 %v3771_v0  ;;  %v2396_v0 = vld [vmem:[#allocation2 + $0x24] ss:$8 sm:$0xf] }
 0x15c   :  { %929 = vmatpush.msra.mxu3 %v3773_v1  ;;  %949 = vmatpush.msrb.mxu0 %v3864_v37  ;;  %v5956_v37 = vld [vmem:[#allocation35_spill] sm:$0xff] }
 0x15d   :  { %890 = vmatpush.msra.mxu1 %v3775_v3  ;;  %910 = vmatpush.msra.mxu2 %v3777_v4 }
 0x15e   :  { %930 = vmatpush.msra.mxu3 %v3781_v5  ;;  %950 = vmatpush.msrb.mxu0 %v3879_v41  ;;  %v2554_v5 = vld [vmem:[#allocation2 + $0x5] ss:$8 sm:$0xf] }
 0x15f   :  { %v4210_v49 = vld [vmem:[#allocation1] sm:$0xff]  ;;  %v4214_v24 = vld [vmem:[#allocation1 + $0x9] sm:$0xff]  ;;  %v4218_v63 = vld [vmem:[#allocation1 + $0x12] sm:$0xff]  ;;  %891 = vmatpush.msra.mxu1 %v5889_v9  ;;  %911 = vmatpush.msra.mxu2 %v3786_v8 }
 0x160   :  { %5929 = vst [vmem:[#allocation87_spill] sm:$0xff] %v4210_v49  ;;  %v4212_v47 = vld [vmem:[#allocation1 + $0x1b] sm:$0xff]  ;;  %931 = vmatpush.msra.mxu3 %v5890_v56  ;;  %951 = vmatpush.msrb.mxu0 %v3891_v46  ;;  %v5958_v46 = vld [vmem:[#allocation36_spill] sm:$0xff]  ;;  %v5961_v56 = vld [vmem:[#allocation51_spill] sm:$0xff] }
 0x161   :  { %5930 = vst [vmem:[#allocation88_spill] sm:$0xff] %v4212_v47  ;;  %892 = vmatpush.msra.mxu1 %v3793_v11  ;;  %912 = vmatpush.msra.mxu2 %v3795_v12  ;;  %v2556_v9 = vld [vmem:[#allocation2 + $0x25] ss:$8 sm:$0xf] }
 0x162   :  { %5931 = vst [vmem:[#allocation89_spill] sm:$0xff] %v4214_v24  ;;  %932 = vmatpush.msra.mxu3 %v3799_v13  ;;  %952 = vmatpush.msrb.mxu0 %v3901_v50  ;;  %v5937_v11 = vld [vmem:[#allocation42_spill] sm:$0xff]  ;;  %v5938_v12 = vld [vmem:[#allocation24_spill] sm:$0xff]  ;;  %v5939_v13 = vld [vmem:[#allocation25_spill] sm:$0xff] }
 0x163   :  { %5932 = vst [vmem:[#allocation90_spill] sm:$0xff] %v4218_v63  ;;  %893 = vmatpush.msra.mxu1 %v3802_v15  ;;  %913 = vmatpush.msra.mxu2 %v3804_v16  ;;  %v5940_v15 = vld [vmem:[#allocation26_spill] sm:$0xff]  ;;  %v5941_v16 = vld [vmem:[#allocation43_spill] sm:$0xff]  ;;  %v5959_v50 = vld [vmem:[#allocation37_spill] sm:$0xff] }
 0x164   :  { %2399 = vst [vmem:[#allocation1] ss:$9 sm:$0xff] %v2394_v57  ;;  %933 = vmatpush.msra.mxu3 %v3808_v17  ;;  %953 = vmatpush.msrb.mxu0 %v3911_v54  ;;  %v5942_v17 = vld [vmem:[#allocation27_spill] sm:$0xff]  ;;  %v5957_v41 = vld [vmem:[#allocation50_spill] sm:$0xff]  ;;  %v4467_v63 = vld [vmem:[#allocation11 + $0x48] sm:$0xff] }
 0x165   :  { %2401 = vst [vmem:[#allocation1 + $0x1] ss:$9 sm:$0xff] %v2396_v0  ;;  %894 = vmatpush.msra.mxu1 %v3811_v18  ;;  %914 = vmatpush.msra.mxu2 %v3813_v19  ;;  %v5943_v18 = vld [vmem:[#allocation28_spill] sm:$0xff]  ;;  %v5960_v54 = vld [vmem:[#allocation38_spill] sm:$0xff]  ;;  %v5972_v0 = vld [vmem:[#allocation55_spill] sm:$0xff] }
 0x166   :  { %934 = vmatpush.msra.mxu3 %v3817_v20  ;;  %954 = vmatpush.msrb.mxu0 %v3927_v58  ;;  %v5962_v58 = vld [vmem:[#allocation39_spill] sm:$0xff]  ;;  %v4470_v24 = vld [vmem:[#allocation11 + $0x50] sm:$0xff]  ;;  %5993 = vst [vmem:[#allocation55_spill] sm:$0xff] %v4479_v2 }
 0x167   :  { %895 = vmatpush.msra.mxu1 %v3820_v21  ;;  %915 = vmatpush.msra.mxu2 %v3822_v22  ;;  %v2714_v22 = vld [vmem:[#allocation2 + $0x6] ss:$8 sm:$0xf] }
 0x168   :  { %935 = vmatpush.msra.mxu3 %v3826_v23  ;;  %955 = vmatpush.msrb.mxu0 %v3931_v59  ;;  %v5947_v23 = vld [vmem:[#allocation29_spill] sm:$0xff]  ;;  %v5963_v59 = vld [vmem:[#allocation40_spill] sm:$0xff]  ;;  %v4473_v49 = vld [vmem:[#allocation11 + $0x58] sm:$0xff] }
 0x169   :  { %896 = vmatpush.msra.mxu1 %v3832_v25  ;;  %916 = vmatpush.msra.mxu2 %v3834_v26  ;;  %v5948_v25 = vld [vmem:[#allocation44_spill] sm:$0xff]  ;;  %5991 = vst [vmem:[#allocation53_spill] sm:$0xff] %v4473_v49 }
 0x16a   :  { %936 = vmatpush.msra.mxu3 %v3837_v27  ;;  %956 = vmatpush.msrb.mxu0 %v3934_v61  ;;  %v2716_v27 = vld [vmem:[#allocation2 + $0x26] ss:$8 sm:$0xf] }
 0x16b   :  { %897 = vmatpush.msra.mxu1 %v3841_v28  ;;  %917 = vmatpush.msra.mxu2 %v3843_v29  ;;  %v5950_v28 = vld [vmem:[#allocation30_spill] sm:$0xff]  ;;  %v5951_v29 = vld [vmem:[#allocation31_spill] sm:$0xff]  ;;  %v5964_v61 = vld [vmem:[#allocation41_spill] sm:$0xff] }
 0x16c   :  { %v4238_v1 = vld [vmem:[#allocation1] sm:$0xff]  ;;  %v4242_v4 = vld [vmem:[#allocation1 + $0x9] sm:$0xff]  ;;  %v4246_v8 = vld [vmem:[#allocation1 + $0x12] sm:$0xff]  ;;  %937 = vmatpush.msra.mxu3 %v3845_v30  ;;  %957 = vmatpush.msrb.mxu0 %v3937_v62  ;;  %5989 = vst [vmem:[#allocation41_spill] sm:$0xff] %v4467_v63 }
 0x16d   :  { %5933 = vst [vmem:[#allocation91_spill] sm:$0xff] %v4238_v1  ;;  %v4240_v3 = vld [vmem:[#allocation1 + $0x1b] sm:$0xff]  ;;  %898 = vmatpush.msra.mxu1 %v3849_v31  ;;  %918 = vmatpush.msra.mxu2 %v3851_v32  ;;  %v5952_v30 = vld [vmem:[#allocation32_spill] sm:$0xff]  ;;  %v4461_v1 = vld [vmem:[#allocation11 + $0x78] sm:$0xff] }
 0x16e   :  { %5934 = vst [vmem:[#allocation92_spill] sm:$0xff] %v4240_v3  ;;  %938 = vmatpush.msra.mxu3 %v3853_v33  ;;  %958 = vmatpush.msrb.mxu0 %v5937_v11  ;;  %v5953_v31 = vld [vmem:[#allocation49_spill] sm:$0xff]  ;;  %v5955_v33 = vld [vmem:[#allocation34_spill] sm:$0xff]  ;;  %v5965_v62 = vld [vmem:[#allocation52_spill] sm:$0xff] }
 0x16f   :  { %5935 = vst [vmem:[#allocation93_spill] sm:$0xff] %v4242_v4  ;;  %899 = vmatpush.msra.mxu1 %v5938_v12  ;;  %919 = vmatpush.msra.mxu2 %v5939_v13  ;;  %v5954_v32 = vld [vmem:[#allocation33_spill] sm:$0xff]  ;;  %v4452_v3 = vld [vmem:[#allocation11 + $0x60] sm:$0xff] }
 0x170   :  { %5936 = vst [vmem:[#allocation94_spill] sm:$0xff] %v4246_v8  ;;  %939 = vmatpush.msra.mxu3 %v5940_v15  ;;  %959 = vmatpush.msrb.mxu0 %v5941_v16  ;;  %v4455_v8 = vld [vmem:[#allocation11 + $0x68] sm:$0xff]  ;;  %v4458_v4 = vld [vmem:[#allocation11 + $0x70] sm:$0xff]  ;;  %v4464_v47 = vld [vmem:[#allocation11 + $0x40] sm:$0xff] }
 0x171   :  { %2559 = vst [vmem:[#allocation1] ss:$9 sm:$0xff] %v2554_v5  ;;  %900 = vmatpush.msra.mxu1 %v5942_v17  ;;  %920 = vmatpush.msra.mxu2 %v5943_v18 }
 0x172   :  { %2561 = vst [vmem:[#allocation1 + $0x1] ss:$9 sm:$0xff] %v2556_v9  ;;  %940 = vmatpush.msra.mxu3 %v5947_v23  ;;  %960 = vmatpush.msrb.mxu0 %v5948_v25 }
 0x173   :  { %901 = vmatpush.msra.mxu1 %v5950_v28  ;;  %921 = vmatpush.msra.mxu2 %v5951_v29  ;;  %5984 = vst [vmem:[#allocation37_spill] sm:$0xff] %v4452_v3 }
 0x174   :  { %941 = vmatpush.msra.mxu3 %v5952_v30  ;;  %961 = vmatpush.msrb.mxu0 %v5953_v31  ;;  %v5973_v30 = vld [vmem:[#allocation56_spill] sm:$0xff]  ;;  %5985 = vst [vmem:[#allocation38_spill] sm:$0xff] %v4455_v8 }
 0x175   :  { %902 = vmatpush.msra.mxu1 %v5954_v32  ;;  %922 = vmatpush.msra.mxu2 %v5955_v33  ;;  %5986 = vst [vmem:[#allocation51_spill] sm:$0xff] %v4458_v4 }
 0x176   :  { %942 = vmatpush.msra.mxu3 %v5956_v37  ;;  %962 = vmatpush.msrb.mxu0 %v5957_v41  ;;  %5987 = vst [vmem:[#allocation39_spill] sm:$0xff] %v4461_v1 }
 0x177   :  { %903 = vmatpush.msra.mxu1 %v5958_v46  ;;  %923 = vmatpush.msra.mxu2 %v5959_v50  ;;  %5988 = vst [vmem:[#allocation40_spill] sm:$0xff] %v4464_v47 }
 0x178   :  { %943 = vmatpush.msra.mxu3 %v5960_v54  ;;  %963 = vmatpush.msrb.mxu0 %v5961_v56  ;;  %5990 = vst [vmem:[#allocation52_spill] sm:$0xff] %v4470_v24 }
 0x179   :  { %v4266_v19 = vld [vmem:[#allocation1] sm:$0xff]  ;;  %v4270_v21 = vld [vmem:[#allocation1 + $0x9] sm:$0xff]  ;;  %v4274_v26 = vld [vmem:[#allocation1 + $0x12] sm:$0xff]  ;;  %904 = vmatpush.msra.mxu1 %v5962_v58  ;;  %924 = vmatpush.msra.mxu2 %v5963_v59  ;;  %5994 = vst [vmem:[#allocation56_spill] sm:$0xff] %v4482_v14 }
 0x17a   :  { %5944 = vst [vmem:[#allocation42_spill] sm:$0xff] %v4266_v19  ;;  %v4268_v20 = vld [vmem:[#allocation1 + $0x1b] sm:$0xff]  ;;  %944 = vmatpush.msra.mxu3 %v5964_v61  ;;  %964 = vmatpush.msrb.mxu0 %v5965_v62  ;;  %v4449_v19 = vld [vmem:[#allocation11 + $0x98] sm:$0xff] }
 0x17b   :  { %5945 = vst [vmem:[#allocation24_spill] sm:$0xff] %v4268_v20  ;;  %v4440_v20 = vld [vmem:[#allocation11 + $0x80] sm:$0xff] }
 0x17c   :  { %5946 = vst [vmem:[#allocation25_spill] sm:$0xff] %v4270_v21  ;;  %v4446_v21 = vld [vmem:[#allocation11 + $0x90] sm:$0xff] }
 0x17d   :  { %5949 = vst [vmem:[#allocation26_spill] sm:$0xff] %v4274_v26  ;;  %v4443_v26 = vld [vmem:[#allocation11 + $0x88] sm:$0xff] }
 0x17e   :  { %2719 = vst [vmem:[#allocation1] ss:$9 sm:$0xff] %v2714_v22 }
 0x17f   :  { %2721 = vst [vmem:[#allocation1 + $0x1] ss:$9 sm:$0xff] %v2716_v27 }
 0x180   :  { %5980 = vst [vmem:[#allocation34_spill] sm:$0xff] %v4440_v20 }
 0x181   :  { %5981 = vst [vmem:[#allocation35_spill] sm:$0xff] %v4443_v26 }
 0x182   :  { %5982 = vst [vmem:[#allocation50_spill] sm:$0xff] %v4446_v21 }
 0x183   :  { %5983 = vst [vmem:[#allocation36_spill] sm:$0xff] %v4449_v19 }
 0x186   :  { %v4292_v42 = vld [vmem:[#allocation1] sm:$0xff]  ;;  %v4296_v53 = vld [vmem:[#allocation1 + $0x9] sm:$0xff]  ;;  %v4298_v34 = vld [vmem:[#allocation1 + $0x12] sm:$0xff] }
 0x187   :  { %5966 = vst [vmem:[#allocation43_spill] sm:$0xff] %v4292_v42  ;;  %v4294_v7 = vld [vmem:[#allocation1 + $0x1b] sm:$0xff]  ;;  %v4437_v42 = vld [vmem:[#allocation11 + $0xb8] sm:$0xff] }
 0x188   :  { %5967 = vst [vmem:[#allocation27_spill] sm:$0xff] %v4294_v7  ;;  %v4428_v7 = vld [vmem:[#allocation11 + $0xa0] sm:$0xff] }
 0x189   :  { %5968 = vst [vmem:[#allocation28_spill] sm:$0xff] %v4296_v53  ;;  %v4434_v53 = vld [vmem:[#allocation11 + $0xb0] sm:$0xff] }
 0x18a   :  { %5969 = vst [vmem:[#allocation29_spill] sm:$0xff] %v4298_v34  ;;  %v4431_v34 = vld [vmem:[#allocation11 + $0xa8] sm:$0xff] }
 0x18b   :  { %2879 = vst [vmem:[#allocation1] ss:$9 sm:$0xff] %v2874_v45 }
 0x18c   :  { %2881 = vst [vmem:[#allocation1 + $0x1] ss:$9 sm:$0xff] %v2876_v35 }
 0x18d   :  { %5976 = vst [vmem:[#allocation31_spill] sm:$0xff] %v4428_v7 }
 0x18e   :  { %5977 = vst [vmem:[#allocation32_spill] sm:$0xff] %v4431_v34 }
 0x18f   :  { %5978 = vst [vmem:[#allocation49_spill] sm:$0xff] %v4434_v53 }
 0x190   :  { %5979 = vst [vmem:[#allocation33_spill] sm:$0xff] %v4437_v42 }
 0x1d6   :  { %v586_v10 = vpop.f32.mrf.mxu1 }
 0x1d7   :  { %v587_v52 = vadd.f32 %v586_v10, %v5970_v55  ;;  %v646_v27 = vpop.f32.mrf.mxu0 }
 0x1d8   :  { %v647_v31 = vadd.f32 %v646_v27, %v5973_v30  ;;  %v4323_v27 = vld [vmem:[#allocation11 + $0x1c8] sm:$0xff]  ;;  %v4332_v30 = vld [vmem:[#allocation11 + $0x1a0] sm:$0xff] }
 0x1d9   :  { %v3080_v51 = vmul.f32 -1.442695, %v587_v52 }
 0x1db   :  { %3153 = vpow2.f32 %v3080_v51 }
 0x1dc   :  { %v606_v38 = vpop.f32.mrf.mxu2 }
 0x1dd   :  { %v607_v48 = vadd.f32 %v606_v38, %v5971_v43  ;;  %v626_v57 = vpop.f32.mrf.mxu3 }
 0x1de   :  { %v627_v5 = vadd.f32 %v626_v57, %v5972_v0 }
 0x1df   :  { %v3081_v9 = vmul.f32 -1.442695, %v607_v48 }
 0x1e0   :  { %v3082_v11 = vmul.f32 -1.442695, %v627_v5 }
 0x1e1   :  { %v3154_v12 = vpop.eup %3153  ;;  %3155 = vpow2.f32 %v3081_v9 }
 0x1e2   :  { %v658_v13 = vadd.f32 1.0, %v3154_v12  ;;  %3157 = vpow2.f32 %v3082_v11 }
 0x1e4   :  { %3159 = vrcp.f32 %v658_v13  ;;  %v672_v41 = vand.u32 2147483648, %v658_v13  ;;  %vm666_vm14 = vweird.f32 %v658_v13  ;;  %v670_v50 = vand.u32 2147483647, %v658_v13 }
 0x1e6   :  { %v673_v62 = vor.u32 1.1754944e-38, %v672_v41  ;;  %vm671_vm1 = vcmp.eq.f32.partialorder %v670_v50, 8.507059e+37  ;;  %v4347_v41 = vld [vmem:[#allocation11 + $0x188] sm:$0xff]  ;;  %v4353_v50 = vld [vmem:[#allocation11 + $0x198] sm:$0xff] }
 0x1e7   :  { %v3156_v15 = vpop.eup %3155 }
 0x1e8   :  { %v3158_v16 = vpop.eup %3157  ;;  %v659_v17 = vadd.f32 1.0, %v3156_v15 }
 0x1e9   :  { %v660_v18 = vadd.f32 1.0, %v3158_v16 }
 0x1ea   :  { %v3160_v22 = vpop.eup %3159  ;;  %3161 = vrcp.f32 %v659_v17  ;;  %v687_v56 = vand.u32 2147483648, %v659_v17  ;;  %v685_v61 = vand.u32 2147483647, %v659_v17  ;;  %vm681_vm2 = vweird.f32 %v659_v17 }
 0x1eb   :  { %v662_v23 = vmul.f32 %v3160_v22, %v658_v13  ;;  %3163 = vrcp.f32 %v660_v18  ;;  %vm667_vm13 = vweird.f32 %v3160_v22  ;;  %v702_v9 = vand.u32 2147483648, %v660_v18 }
 0x1ec   :  { %vm668_vm15 = vmor %vm666_vm14, %vm667_vm13  ;;  %3165 = vtanh.f32 %v647_v31  ;;  %v688_v55 = vor.u32 1.1754944e-38, %v687_v56  ;;  %vm686_vm4 = vcmp.eq.f32.partialorder %v685_v61, 8.507059e+37  ;;  %vm696_vm6 = vweird.f32 %v660_v18  ;;  %v4335_v31 = vld [vmem:[#allocation11 + $0x1a8] sm:$0xff]  ;;  %v4368_v61 = vld [vmem:[#allocation11 + $0x140] sm:$0xff] }
 0x1ed   :  { %v663_v25 = vsub.f32 1.0, %v662_v23  ;;  %v700_v11 = vand.u32 2147483647, %v660_v18  ;;  %v703_v13 = vor.u32 1.1754944e-38, %v702_v9  ;;  %v4317_v23 = vld [vmem:[#allocation11 + $0x1f8] sm:$0xff]  ;;  %v4359_v56 = vld [vmem:[#allocation11 + $0x168] sm:$0xff] }
 0x1ee   :  { %v4407_v9 = vld [vmem:[#allocation11 + $0xe8] sm:$0xff] }
 0x1ef   :  { %v664_v28 = vmul.f32 %v3160_v22, %v663_v25  ;;  %vm701_vm8 = vcmp.eq.f32.partialorder %v700_v11, 8.507059e+37  ;;  %v4320_v25 = vld [vmem:[#allocation11 + $0x1c0] sm:$0xff]  ;;  %v4410_v11 = vld [vmem:[#allocation11 + $0xf0] sm:$0xff] }
 0x1f0   :  { %v3162_v29 = vpop.eup %3161 }
 0x1f1   :  { %v3164_v32 = vpop.eup %3163  ;;  %v665_v33 = vadd.f32 %v3160_v22, %v664_v28  ;;  %v677_v37 = vmul.f32 %v3162_v29, %v659_v17  ;;  %vm682_vm0 = vweird.f32 %v3162_v29  ;;  %v4326_v28 = vld [vmem:[#allocation11 + $0x1d0] sm:$0xff] }
 0x1f2   :  { %v692_v46 = vmul.f32 %v3164_v32, %v660_v18  ;;  %vm683_vm3 = vmor %vm681_vm2, %vm682_vm0  ;;  %v3166_v51 = vpop.eup %3165  ;;  %vm697_vm5 = vweird.f32 %v3164_v32  ;;  %v4314_v18 = vld [vmem:[#allocation11 + $0x1f0] sm:$0xff] }
 0x1f3   :  { %v678_v54 = vsub.f32 1.0, %v677_v37  ;;  %v669_v58 = vsel %vm668_vm15, %v3160_v22, %v665_v33  ;;  %vm698_vm7 = vmor %vm696_vm6, %vm697_vm5  ;;  %v4311_v22 = vld [vmem:[#allocation11 + $0x1e8] sm:$0xff]  ;;  %v4341_v33 = vld [vmem:[#allocation11 + $0x1b8] sm:$0xff] }
 0x1f4   :  { %v693_v45 = vsub.f32 1.0, %v692_v46  ;;  %v674_v10 = vsel %vm671_vm1, %v673_v62, %v669_v58  ;;  %v4344_v37 = vld [vmem:[#allocation11 + $0x180] sm:$0xff]  ;;  %v4350_v46 = vld [vmem:[#allocation11 + $0x190] sm:$0xff]  ;;  %v4371_v62 = vld [vmem:[#allocation11 + $0x148] sm:$0xff] }
 0x1f5   :  { %v679_v59 = vmul.f32 %v3162_v29, %v678_v54  ;;  %v708_v48 = vmul.f32 %v3166_v51, %v674_v10  ;;  %v4356_v54 = vld [vmem:[#allocation11 + $0x160] sm:$0xff]  ;;  %v4362_v58 = vld [vmem:[#allocation11 + $0x170] sm:$0xff]  ;;  %v4389_v51 = vld [vmem:[#allocation11 + $0x138] sm:$0xff] }
 0x1f6   :  { %v694_v43 = vmul.f32 %v3164_v32, %v693_v45  ;;  %v4374_v45 = vld [vmem:[#allocation11 + $0x150] sm:$0xff]  ;;  %v4380_v10 = vld [vmem:[#allocation11 + $0x120] sm:$0xff] }
 0x1f7   :  { %v680_v35 = vadd.f32 %v3162_v29, %v679_v59  ;;  %v4365_v59 = vld [vmem:[#allocation11 + $0x178] sm:$0xff] }
 0x1f8   :  { %v695_v5 = vadd.f32 %v3164_v32, %v694_v43  ;;  %v4395_v43 = vld [vmem:[#allocation11 + $0x108] sm:$0xff] }
 0x1f9   :  { %v684_v52 = vsel %vm683_vm3, %v3162_v29, %v680_v35  ;;  %v4329_v29 = vld [vmem:[#allocation11 + $0x1d8] sm:$0xff] }
 0x1fa   :  { %v689_v38 = vsel %vm686_vm4, %v688_v55, %v684_v52  ;;  %v699_v12 = vsel %vm698_vm7, %v3164_v32, %v695_v5  ;;  %v4338_v32 = vld [vmem:[#allocation11 + $0x1b0] sm:$0xff]  ;;  %v4377_v35 = vld [vmem:[#allocation11 + $0x158] sm:$0xff]  ;;  %v4383_v55 = vld [vmem:[#allocation11 + $0x128] sm:$0xff] }
 0x1fb   :  { %v707_v57 = vmul.f32 %v689_v38, %v4187_v39  ;;  %v704_v16 = vsel %vm701_vm8, %v703_v13, %v699_v12  ;;  %v4308_v39 = vld [vmem:[#allocation11 + $0x1e0] sm:$0xff]  ;;  %v4386_v52 = vld [vmem:[#allocation11 + $0x130] sm:$0xff]  ;;  %v4413_v12 = vld [vmem:[#allocation11 + $0xf8] sm:$0xff] }
 0x1fc   :  { %v4392_v38 = vld [vmem:[#allocation11 + $0x100] sm:$0xff] }
 0x1fd   :  { %v4305_v0 = vadd.f32 %v708_v48, %v707_v57  ;;  %v4398_v48 = vld [vmem:[#allocation11 + $0x110] sm:$0xff]  ;;  %v4401_v57 = vld [vmem:[#allocation11 + $0x118] sm:$0xff]  ;;  %v4404_v5 = vld [vmem:[#allocation11 + $0xe0] sm:$0xff] }
 0x1fe   :  { %v4416_v13 = vld [vmem:[#allocation11 + $0xc0] sm:$0xff] }
 0x1ff   :  { %3167 = vtanh.f32 %v4305_v0 }
 0x205   :  { %v3168_v15 = vpop.eup %3167 }
 0x206   :  { %v711_v17 = vmul.f32 %v3168_v15, %v704_v16  ;;  %v4419_v15 = vld [vmem:[#allocation11 + $0xc8] sm:$0xff]  ;;  %v4422_v16 = vld [vmem:[#allocation11 + $0xd0] sm:$0xff] }
 0x207   :  { %5974 = vst [vmem:[#allocation44_spill] sm:$0xff] %v4422_v16 }
 0x208   :  { %745 = vmatmul.f32.vlgmr.msrb.gmra.mxu1 %v711_v17  ;;  %765 = vmatmul.f32.vlgmr.msrb.gmra.mxu2 %v711_v17 }
 0x209   :  { %785 = vmatmul.f32.vlgmr.msrb.gmra.mxu3 %v711_v17  ;;  %805 = vmatmul.f32.vlgmr.msra.gmra.mxu0 %v711_v17  ;;  %v4425_v17 = vld [vmem:[#allocation11 + $0xd8] sm:$0xff] }
 0x20a   :  { %1049 = vmatpush.msrb.mxu1 %v4308_v39  ;;  %1069 = vmatpush.msrb.mxu2 %v4311_v22  ;;  %5975 = vst [vmem:[#allocation30_spill] sm:$0xff] %v4425_v17 }
 0x20b   :  { %1089 = vmatpush.msrb.mxu3 %v4314_v18  ;;  %1109 = vmatpush.msra.mxu0 %v4317_v23 }
 0x20c   :  { %1050 = vmatpush.msrb.mxu1 %v4320_v25  ;;  %1070 = vmatpush.msrb.mxu2 %v4323_v27 }
 0x20d   :  { %1090 = vmatpush.msrb.mxu3 %v4326_v28  ;;  %1110 = vmatpush.msra.mxu0 %v4329_v29 }
 0x20e   :  { %1051 = vmatpush.msrb.mxu1 %v4332_v30  ;;  %1071 = vmatpush.msrb.mxu2 %v4335_v31 }
 0x20f   :  { %1091 = vmatpush.msrb.mxu3 %v4338_v32  ;;  %1111 = vmatpush.msra.mxu0 %v4341_v33 }
 0x210   :  { %1052 = vmatpush.msrb.mxu1 %v4344_v37  ;;  %1072 = vmatpush.msrb.mxu2 %v4347_v41 }
 0x211   :  { %1092 = vmatpush.msrb.mxu3 %v4350_v46  ;;  %1112 = vmatpush.msra.mxu0 %v4353_v50 }
 0x212   :  { %1053 = vmatpush.msrb.mxu1 %v4356_v54  ;;  %1073 = vmatpush.msrb.mxu2 %v4359_v56 }
 0x213   :  { %1093 = vmatpush.msrb.mxu3 %v4362_v58  ;;  %1113 = vmatpush.msra.mxu0 %v4365_v59 }
 0x214   :  { %1054 = vmatpush.msrb.mxu1 %v4368_v61  ;;  %1074 = vmatpush.msrb.mxu2 %v4371_v62 }
 0x215   :  { %1094 = vmatpush.msrb.mxu3 %v4374_v45  ;;  %1114 = vmatpush.msra.mxu0 %v4377_v35 }
 0x216   :  { %1055 = vmatpush.msrb.mxu1 %v4380_v10  ;;  %1075 = vmatpush.msrb.mxu2 %v4383_v55 }
 0x217   :  { %1095 = vmatpush.msrb.mxu3 %v4386_v52  ;;  %1115 = vmatpush.msra.mxu0 %v4389_v51 }
 0x218   :  { %1056 = vmatpush.msrb.mxu1 %v4392_v38  ;;  %1076 = vmatpush.msrb.mxu2 %v4395_v43 }
 0x219   :  { %1096 = vmatpush.msrb.mxu3 %v4398_v48  ;;  %1116 = vmatpush.msra.mxu0 %v4401_v57 }
 0x21a   :  { %1057 = vmatpush.msrb.mxu1 %v4404_v5  ;;  %1077 = vmatpush.msrb.mxu2 %v4407_v9 }
 0x21b   :  { %1097 = vmatpush.msrb.mxu3 %v4410_v11  ;;  %1117 = vmatpush.msra.mxu0 %v4413_v12 }
 0x21c   :  { %1058 = vmatpush.msrb.mxu1 %v4416_v13  ;;  %1078 = vmatpush.msrb.mxu2 %v4419_v15 }
 0x21d   :  { %1098 = vmatpush.msrb.mxu3 %v4422_v16  ;;  %1118 = vmatpush.msra.mxu0 %v4425_v17 }
 0x21e   :  { %1059 = vmatpush.msrb.mxu1 %v4428_v7  ;;  %1079 = vmatpush.msrb.mxu2 %v4431_v34 }
 0x21f   :  { %1099 = vmatpush.msrb.mxu3 %v4434_v53  ;;  %1119 = vmatpush.msra.mxu0 %v4437_v42 }
 0x220   :  { %1060 = vmatpush.msrb.mxu1 %v4440_v20  ;;  %1080 = vmatpush.msrb.mxu2 %v4443_v26 }
 0x221   :  { %1100 = vmatpush.msrb.mxu3 %v4446_v21  ;;  %1120 = vmatpush.msra.mxu0 %v4449_v19 }
 0x222   :  { %1061 = vmatpush.msrb.mxu1 %v4452_v3  ;;  %1081 = vmatpush.msrb.mxu2 %v4455_v8 }
 0x223   :  { %1101 = vmatpush.msrb.mxu3 %v4458_v4  ;;  %1121 = vmatpush.msra.mxu0 %v4461_v1  ;;  %v6002_v1 = vld [vmem:[#allocation59_spill] sm:$0xff] }
 0x224   :  { %1062 = vmatpush.msrb.mxu1 %v4464_v47  ;;  %1082 = vmatpush.msrb.mxu2 %v4467_v63  ;;  %v6001_v63 = vld [vmem:[#allocation58_spill] sm:$0xff] }
 0x225   :  { %1102 = vmatpush.msrb.mxu3 %v4470_v24  ;;  %1122 = vmatpush.msra.mxu0 %v4473_v49 }
 0x226   :  { %1063 = vmatpush.msrb.mxu1 %v4476_v40  ;;  %1083 = vmatpush.msrb.mxu2 %v4479_v2  ;;  %v4497_v2 = vld [vmem:[#allocation11 + $0x18] sm:$0xff]  ;;  %v6000_v40 = vld [vmem:[#allocation57_spill] sm:$0xff] }
 0x227   :  { %1103 = vmatpush.msrb.mxu3 %v4482_v14  ;;  %1123 = vmatpush.msra.mxu0 %v4485_v36  ;;  %5999 = vst [vmem:[#allocation99_spill] sm:$0xff] %v4497_v2 }
 0x228   :  { %1064 = vmatpush.msrb.mxu1 %v4488_v60  ;;  %1084 = vmatpush.msrb.mxu2 %v4491_v44 }
 0x229   :  { %1104 = vmatpush.msrb.mxu3 %v4494_v6  ;;  %1124 = vmatpush.msra.mxu0 %v4497_v2 }
 0x285   :  { %v746_v14 = vpop.f32.mrf.mxu1 }
 0x286   :  { %v747_v49 = vadd.f32 %v746_v14, %v6000_v40 }
 0x288   :  { %v3083_v36 = vmul.f32 -1.442695, %v747_v49  ;;  %v806_v49 = vpop.f32.mrf.mxu0 }
 0x28a   :  { %3169 = vpow2.f32 %v3083_v36 }
 0x28b   :  { %v766_v24 = vpop.f32.mrf.mxu2 }
 0x28c   :  { %v767_v60 = vadd.f32 %v766_v24, %v6001_v63  ;;  %v786_v47 = vpop.f32.mrf.mxu3 }
 0x28d   :  { %v787_v4 = vadd.f32 %v786_v47, %v6002_v1  ;;  %v6003_v47 = vld [vmem:[#allocation60_spill] sm:$0xff] }
 0x28e   :  { %v3084_v44 = vmul.f32 -1.442695, %v767_v60  ;;  %v807_v60 = vadd.f32 %v806_v49, %v6003_v47 }
 0x28f   :  { %v3085_v8 = vmul.f32 -1.442695, %v787_v4 }
 0x290   :  { %v3170_v3 = vpop.eup %3169  ;;  %3171 = vpow2.f32 %v3084_v44 }
 0x291   :  { %v818_v6 = vadd.f32 1.0, %v3170_v3  ;;  %3173 = vpow2.f32 %v3085_v8 }
 0x293   :  { %3175 = vrcp.f32 %v818_v6  ;;  %v832_v3 = vand.u32 2147483648, %v818_v6  ;;  %vm826_vm10 = vweird.f32 %v818_v6  ;;  %v830_v20 = vand.u32 2147483647, %v818_v6 }
 0x295   :  { %vm831_vm13 = vcmp.eq.f32.partialorder %v830_v20, 8.507059e+37 }
 0x296   :  { %v3172_v19 = vpop.eup %3171 }
 0x297   :  { %v3174_v2 = vpop.eup %3173  ;;  %v819_v21 = vadd.f32 1.0, %v3172_v19 }
 0x298   :  { %v820_v26 = vadd.f32 1.0, %v3174_v2 }
 0x299   :  { %v3176_v40 = vpop.eup %3175  ;;  %3177 = vrcp.f32 %v819_v21  ;;  %v847_v2 = vand.u32 2147483648, %v819_v21  ;;  %vm841_vm14 = vweird.f32 %v819_v21 }
 0x29a   :  { %v822_v36 = vmul.f32 %v3176_v40, %v818_v6  ;;  %3179 = vrcp.f32 %v820_v26  ;;  %vm827_vm9 = vweird.f32 %v3176_v40  ;;  %vm856_vm2 = vweird.f32 %v820_v26 }
 0x29b   :  { %vm828_vm11 = vmor %vm826_vm10, %vm827_vm9  ;;  %3181 = vtanh.f32 %v807_v60  ;;  %v848_v47 = vor.u32 1.1754944e-38, %v847_v2  ;;  %v860_v20 = vand.u32 2147483647, %v820_v26  ;;  %v6012_v2 = vld [vmem:[#allocation50_spill] sm:$0xff] }
 0x29c   :  { %v823_v14 = vsub.f32 1.0, %v822_v36  ;;  %v845_v36 = vand.u32 2147483647, %v819_v21 }
 0x29d   :  { %vm861_vm4 = vcmp.eq.f32.partialorder %v860_v20, 8.507059e+37  ;;  %v6023_v20 = vld [vmem:[#allocation55_spill] sm:$0xff] }
 0x29e   :  { %v824_v24 = vmul.f32 %v3176_v40, %v823_v14  ;;  %v833_v14 = vor.u32 1.1754944e-38, %v832_v3  ;;  %vm846_vm0 = vcmp.eq.f32.partialorder %v845_v36, 8.507059e+37  ;;  %v862_v3 = vand.u32 2147483648, %v820_v26  ;;  %v6013_v36 = vld [vmem:[#allocation36_spill] sm:$0xff] }
 0x29f   :  { %v3178_v63 = vpop.eup %3177 }
 0x2a0   :  { %v3180_v1 = vpop.eup %3179  ;;  %v825_v4 = vadd.f32 %v3176_v40, %v824_v24  ;;  %v837_v44 = vmul.f32 %v3178_v63, %v819_v21  ;;  %vm842_vm12 = vweird.f32 %v3178_v63 }
 0x2a1   :  { %v852_v8 = vmul.f32 %v3180_v1, %v820_v26  ;;  %vm843_vm15 = vmor %vm841_vm14, %vm842_vm12  ;;  %v3182_v17 = vpop.eup %3181  ;;  %vm857_vm1 = vweird.f32 %v3180_v1  ;;  %v6004_v26 = vld [vmem:[#allocation44_spill] sm:$0xff] }
 0x2a2   :  { %v838_v19 = vsub.f32 1.0, %v837_v44  ;;  %v829_v42 = vsel %vm828_vm11, %v3176_v40, %v825_v4  ;;  %vm858_vm3 = vmor %vm856_vm2, %vm857_vm1 }
 0x2a3   :  { %v853_v34 = vsub.f32 1.0, %v852_v8  ;;  %v834_v24 = vsel %vm831_vm13, %v833_v14, %v829_v42  ;;  %v863_v42 = vor.u32 1.1754944e-38, %v862_v3  ;;  %v6010_v8 = vld [vmem:[#allocation34_spill] sm:$0xff]  ;;  %v6014_v14 = vld [vmem:[#allocation37_spill] sm:$0xff] }
 0x2a4   :  { %v839_v53 = vmul.f32 %v3178_v63, %v838_v19  ;;  %v868_v16 = vmul.f32 %v3182_v17, %v834_v24  ;;  %v6008_v17 = vld [vmem:[#allocation49_spill] sm:$0xff]  ;;  %v6011_v19 = vld [vmem:[#allocation35_spill] sm:$0xff]  ;;  %v6022_v3 = vld [vmem:[#allocation54_spill] sm:$0xff] }
 0x2a5   :  { %v854_v44 = vmul.f32 %v3180_v1, %v853_v34  ;;  %v6005_v34 = vld [vmem:[#allocation30_spill] sm:$0xff]  ;;  %v6016_v24 = vld [vmem:[#allocation51_spill] sm:$0xff] }
 0x2a6   :  { %v840_v49 = vadd.f32 %v3178_v63, %v839_v53 }
 0x2a7   :  { %v855_v4 = vadd.f32 %v3180_v1, %v854_v44  ;;  %v6019_v44 = vld [vmem:[#allocation41_spill] sm:$0xff] }
 0x2a8   :  { %v844_v7 = vsel %vm843_vm15, %v3178_v63, %v840_v49  ;;  %v6015_v49 = vld [vmem:[#allocation38_spill] sm:$0xff] }
 0x2a9   :  { %v849_v6 = vsel %vm846_vm0, %v848_v47, %v844_v7  ;;  %v859_v21 = vsel %vm858_vm3, %v3180_v1, %v855_v4  ;;  %v6009_v1 = vld [vmem:[#allocation33_spill] sm:$0xff]  ;;  %v6017_v47 = vld [vmem:[#allocation39_spill] sm:$0xff] }
 0x2aa   :  { %v867_v60 = vmul.f32 %v849_v6, %v4305_v0  ;;  %v864_v63 = vsel %vm861_vm4, %v863_v42, %v859_v21  ;;  %v6006_v0 = vld [vmem:[#allocation31_spill] sm:$0xff]  ;;  %v6018_v6 = vld [vmem:[#allocation40_spill] sm:$0xff]  ;;  %v6021_v4 = vld [vmem:[#allocation53_spill] sm:$0xff] }
 0x2ab   :  { %v6024_v21 = vld [vmem:[#allocation56_spill] sm:$0xff]  ;;  %v6025_v42 = vld [vmem:[#allocation95_spill] sm:$0xff] }
 0x2ac   :  { %v4505_v40 = vadd.f32 %v868_v16, %v867_v60  ;;  %v6007_v16 = vld [vmem:[#allocation32_spill] sm:$0xff] }
 0x2ad   :  { %v6020_v60 = vld [vmem:[#allocation52_spill] sm:$0xff] }
 0x2ae   :  { %3183 = vtanh.f32 %v4505_v40 }
 0x2b4   :  { %v3184_v53 = vpop.eup %3183 }
 0x2b5   :  { %v871_v7 = vmul.f32 %v3184_v53, %v864_v63  ;;  %v6026_v53 = vld [vmem:[#allocation96_spill] sm:$0xff]  ;;  %v6027_v63 = vld [vmem:[#allocation97_spill] sm:$0xff] }
 0x2b7   :  { %905 = vmatmul.f32.vlgmr.msra.gmra.mxu1 %v871_v7  ;;  %925 = vmatmul.f32.vlgmr.msra.gmra.mxu2 %v871_v7 }
 0x2b8   :  { %945 = vmatmul.f32.vlgmr.msra.gmra.mxu3 %v871_v7  ;;  %965 = vmatmul.f32.vlgmr.msrb.gmra.mxu0 %v871_v7  ;;  %v6028_v7 = vld [vmem:[#allocation98_spill] sm:$0xff] }
 0x2b9   :  { %1209 = vmatpush.msra.mxu1 %v4308_v39  ;;  %1229 = vmatpush.msra.mxu2 %v4311_v22 }
 0x2ba   :  { %1249 = vmatpush.msra.mxu3 %v4314_v18  ;;  %1269 = vmatpush.msrb.mxu0 %v4317_v23 }
 0x2bb   :  { %1210 = vmatpush.msra.mxu1 %v4320_v25  ;;  %1230 = vmatpush.msra.mxu2 %v4323_v27 }
 0x2bc   :  { %1250 = vmatpush.msra.mxu3 %v4326_v28  ;;  %1270 = vmatpush.msrb.mxu0 %v4329_v29 }
 0x2bd   :  { %1211 = vmatpush.msra.mxu1 %v4332_v30  ;;  %1231 = vmatpush.msra.mxu2 %v4335_v31 }
 0x2be   :  { %1251 = vmatpush.msra.mxu3 %v4338_v32  ;;  %1271 = vmatpush.msrb.mxu0 %v4341_v33 }
 0x2bf   :  { %1212 = vmatpush.msra.mxu1 %v4344_v37  ;;  %1232 = vmatpush.msra.mxu2 %v4347_v41 }
 0x2c0   :  { %1252 = vmatpush.msra.mxu3 %v4350_v46  ;;  %1272 = vmatpush.msrb.mxu0 %v4353_v50 }
 0x2c1   :  { %1213 = vmatpush.msra.mxu1 %v4356_v54  ;;  %1233 = vmatpush.msra.mxu2 %v4359_v56 }
 0x2c2   :  { %1253 = vmatpush.msra.mxu3 %v4362_v58  ;;  %1273 = vmatpush.msrb.mxu0 %v4365_v59 }
 0x2c3   :  { %1214 = vmatpush.msra.mxu1 %v4368_v61  ;;  %1234 = vmatpush.msra.mxu2 %v4371_v62 }
 0x2c4   :  { %1254 = vmatpush.msra.mxu3 %v4374_v45  ;;  %1274 = vmatpush.msrb.mxu0 %v4377_v35 }
 0x2c5   :  { %1215 = vmatpush.msra.mxu1 %v4380_v10  ;;  %1235 = vmatpush.msra.mxu2 %v4383_v55 }
 0x2c6   :  { %1255 = vmatpush.msra.mxu3 %v4386_v52  ;;  %1275 = vmatpush.msrb.mxu0 %v4389_v51 }
 0x2c7   :  { %1216 = vmatpush.msra.mxu1 %v4392_v38  ;;  %1236 = vmatpush.msra.mxu2 %v4395_v43 }
 0x2c8   :  { %1256 = vmatpush.msra.mxu3 %v4398_v48  ;;  %1276 = vmatpush.msrb.mxu0 %v4401_v57 }
 0x2c9   :  { %1217 = vmatpush.msra.mxu1 %v4404_v5  ;;  %1237 = vmatpush.msra.mxu2 %v4407_v9 }
 0x2ca   :  { %1257 = vmatpush.msra.mxu3 %v4410_v11  ;;  %1277 = vmatpush.msrb.mxu0 %v4413_v12 }
 0x2cb   :  { %1218 = vmatpush.msra.mxu1 %v4416_v13  ;;  %1238 = vmatpush.msra.mxu2 %v4419_v15 }
 0x2cc   :  { %1258 = vmatpush.msra.mxu3 %v6004_v26  ;;  %1278 = vmatpush.msrb.mxu0 %v6005_v34 }
 0x2cd   :  { %1219 = vmatpush.msra.mxu1 %v6006_v0  ;;  %1239 = vmatpush.msra.mxu2 %v6007_v16 }
 0x2ce   :  { %1259 = vmatpush.msra.mxu3 %v6008_v17  ;;  %1279 = vmatpush.msrb.mxu0 %v6009_v1 }
 0x2cf   :  { %1220 = vmatpush.msra.mxu1 %v6010_v8  ;;  %1240 = vmatpush.msra.mxu2 %v6011_v19 }
 0x2d0   :  { %1260 = vmatpush.msra.mxu3 %v6012_v2  ;;  %1280 = vmatpush.msrb.mxu0 %v6013_v36 }
 0x2d1   :  { %1221 = vmatpush.msra.mxu1 %v6014_v14  ;;  %1241 = vmatpush.msra.mxu2 %v6015_v49 }
 0x2d2   :  { %1261 = vmatpush.msra.mxu3 %v6016_v24  ;;  %1281 = vmatpush.msrb.mxu0 %v6017_v47  ;;  %v6031_v24 = vld [vmem:[#allocation61_spill] sm:$0xff] }
 0x2d3   :  { %1222 = vmatpush.msra.mxu1 %v6018_v6  ;;  %1242 = vmatpush.msra.mxu2 %v6019_v44  ;;  %v6029_v6 = vld [vmem:[#allocation99_spill] sm:$0xff] }
 0x2d4   :  { %1262 = vmatpush.msra.mxu3 %v6020_v60  ;;  %1282 = vmatpush.msrb.mxu0 %v6021_v4  ;;  %v6030_v60 = vld [vmem:[#allocation22_spill] sm:$0xff] }
 0x2d5   :  { %1223 = vmatpush.msra.mxu1 %v6022_v3  ;;  %1243 = vmatpush.msra.mxu2 %v6023_v20 }
 0x2d6   :  { %1263 = vmatpush.msra.mxu3 %v6024_v21  ;;  %1283 = vmatpush.msrb.mxu0 %v6025_v42  ;;  %v6032_v21 = vld [vmem:[#allocation62_spill] sm:$0xff] }
 0x2d7   :  { %1224 = vmatpush.msra.mxu1 %v6026_v53  ;;  %1244 = vmatpush.msra.mxu2 %v6027_v63 }
 0x2d8   :  { %1264 = vmatpush.msra.mxu3 %v6028_v7  ;;  %1284 = vmatpush.msrb.mxu0 %v6029_v6 }
 0x334   :  { %v906_v44 = vpop.f32.mrf.mxu1 }
 0x335   :  { %v907_v47 = vadd.f32 %v906_v44, %v6030_v60 }
 0x337   :  { %v3086_v4 = vmul.f32 -1.442695, %v907_v47 }
 0x339   :  { %3185 = vpow2.f32 %v3086_v4 }
 0x33a   :  { %v926_v3 = vpop.f32.mrf.mxu2 }
 0x33b   :  { %v927_v20 = vadd.f32 %v926_v3, %v6031_v24  ;;  %v946_v49 = vpop.f32.mrf.mxu3  ;;  %v966_v24 = vpop.f32.mrf.mxu0 }
 0x33c   :  { %v947_v14 = vadd.f32 %v946_v49, %v6032_v21  ;;  %v6033_v49 = vld [vmem:[#allocation23_spill] sm:$0xff] }
 0x33d   :  { %v3087_v42 = vmul.f32 -1.442695, %v927_v20  ;;  %v967_v20 = vadd.f32 %v966_v24, %v6033_v49 }
 0x33e   :  { %v3088_v36 = vmul.f32 -1.442695, %v947_v14 }
 0x33f   :  { %v3186_v53 = vpop.eup %3185  ;;  %3187 = vpow2.f32 %v3087_v42 }
 0x340   :  { %v978_v63 = vadd.f32 1.0, %v3186_v53  ;;  %3189 = vpow2.f32 %v3088_v36 }
 0x342   :  { %3191 = vrcp.f32 %v978_v63  ;;  %v992_v36 = vand.u32 2147483648, %v978_v63  ;;  %vm986_vm6 = vweird.f32 %v978_v63  ;;  %v990_v8 = vand.u32 2147483647, %v978_v63 }
 0x344   :  { %vm991_vm9 = vcmp.eq.f32.partialorder %v990_v8, 8.507059e+37 }
 0x345   :  { %v3188_v7 = vpop.eup %3187 }
 0x346   :  { %v3190_v6 = vpop.eup %3189  ;;  %v979_v2 = vadd.f32 1.0, %v3188_v7 }
 0x347   :  { %v980_v19 = vadd.f32 1.0, %v3190_v6 }
 0x348   :  { %v3192_v44 = vpop.eup %3191  ;;  %3193 = vrcp.f32 %v979_v2  ;;  %v1007_v6 = vand.u32 2147483648, %v979_v2  ;;  %vm1001_vm10 = vweird.f32 %v979_v2 }
 0x349   :  { %v982_v47 = vmul.f32 %v3192_v44, %v978_v63  ;;  %3195 = vrcp.f32 %v980_v19  ;;  %vm987_vm5 = vweird.f32 %v3192_v44  ;;  %vm1016_vm14 = vweird.f32 %v980_v19 }
 0x34a   :  { %vm988_vm7 = vmor %vm986_vm6, %vm987_vm5  ;;  %3197 = vtanh.f32 %v967_v20  ;;  %v1008_v49 = vor.u32 1.1754944e-38, %v1007_v6  ;;  %v6042_v6 = vld [vmem:[#allocation50_spill] sm:$0xff] }
 0x34b   :  { %v983_v60 = vsub.f32 1.0, %v982_v47  ;;  %v1005_v47 = vand.u32 2147483647, %v979_v2 }
 0x34d   :  { %v984_v4 = vmul.f32 %v3192_v44, %v983_v60  ;;  %v993_v60 = vor.u32 1.1754944e-38, %v992_v36  ;;  %vm1006_vm12 = vcmp.eq.f32.partialorder %v1005_v47, 8.507059e+37  ;;  %v1022_v36 = vand.u32 2147483648, %v980_v19  ;;  %v6043_v47 = vld [vmem:[#allocation36_spill] sm:$0xff] }
 0x34e   :  { %v3194_v3 = vpop.eup %3193 }
 0x34f   :  { %v3196_v14 = vpop.eup %3195  ;;  %v985_v21 = vadd.f32 %v3192_v44, %v984_v4  ;;  %v997_v42 = vmul.f32 %v3194_v3, %v979_v2  ;;  %vm1002_vm8 = vweird.f32 %v3194_v3  ;;  %v1023_v8 = vor.u32 1.1754944e-38, %v1022_v36  ;;  %v6052_v36 = vld [vmem:[#allocation54_spill] sm:$0xff] }
 0x350   :  { %v1012_v53 = vmul.f32 %v3196_v14, %v980_v19  ;;  %vm1003_vm11 = vmor %vm1001_vm10, %vm1002_vm8  ;;  %v3198_v34 = vpop.eup %3197  ;;  %vm1017_vm13 = vweird.f32 %v3196_v14 }
 0x351   :  { %v998_v7 = vsub.f32 1.0, %v997_v42  ;;  %v989_v1 = vsel %vm988_vm7, %v3192_v44, %v985_v21  ;;  %vm1018_vm15 = vmor %vm1016_vm14, %vm1017_vm13 }
 0x352   :  { %v1013_v16 = vsub.f32 1.0, %v1012_v53  ;;  %v994_v4 = vsel %vm991_vm9, %v993_v60, %v989_v1  ;;  %v6040_v53 = vld [vmem:[#allocation34_spill] sm:$0xff]  ;;  %v6044_v60 = vld [vmem:[#allocation37_spill] sm:$0xff] }
 0x353   :  { %v999_v17 = vmul.f32 %v3194_v3, %v998_v7  ;;  %v1028_v26 = vmul.f32 %v3198_v34, %v994_v4  ;;  %v6036_v34 = vld [vmem:[#allocation31_spill] sm:$0xff] }
 0x354   :  { %v1014_v42 = vmul.f32 %v3196_v14, %v1013_v16  ;;  %v6037_v16 = vld [vmem:[#allocation32_spill] sm:$0xff]  ;;  %v6041_v7 = vld [vmem:[#allocation35_spill] sm:$0xff] }
 0x355   :  { %v1000_v24 = vadd.f32 %v3194_v3, %v999_v17  ;;  %v1020_v17 = vand.u32 2147483647, %v980_v19  ;;  %v6038_v19 = vld [vmem:[#allocation49_spill] sm:$0xff]  ;;  %v6046_v4 = vld [vmem:[#allocation51_spill] sm:$0xff] }
 0x356   :  { %v1015_v21 = vadd.f32 %v3196_v14, %v1014_v42  ;;  %v6049_v42 = vld [vmem:[#allocation41_spill] sm:$0xff] }
 0x357   :  { %v1004_v0 = vsel %vm1003_vm11, %v3194_v3, %v1000_v24  ;;  %vm1021_vm0 = vcmp.eq.f32.partialorder %v1020_v17, 8.507059e+37  ;;  %v6045_v24 = vld [vmem:[#allocation38_spill] sm:$0xff]  ;;  %v6053_v17 = vld [vmem:[#allocation55_spill] sm:$0xff] }
 0x358   :  { %v1009_v63 = vsel %vm1006_vm12, %v1008_v49, %v1004_v0  ;;  %v1019_v1 = vsel %vm1018_vm15, %v3196_v14, %v1015_v21  ;;  %v6039_v14 = vld [vmem:[#allocation33_spill] sm:$0xff]  ;;  %v6047_v49 = vld [vmem:[#allocation39_spill] sm:$0xff] }
 0x359   :  { %v1027_v20 = vmul.f32 %v1009_v63, %v4505_v40  ;;  %v1024_v3 = vsel %vm1021_vm0, %v1023_v8, %v1019_v1  ;;  %v6034_v40 = vld [vmem:[#allocation44_spill] sm:$0xff]  ;;  %v6051_v21 = vld [vmem:[#allocation53_spill] sm:$0xff]  ;;  %v6055_v8 = vld [vmem:[#allocation95_spill] sm:$0xff] }
 0x35a   :  { %v6048_v63 = vld [vmem:[#allocation40_spill] sm:$0xff] }
 0x35b   :  { %v4577_v44 = vadd.f32 %v1028_v26, %v1027_v20  ;;  %v6035_v26 = vld [vmem:[#allocation30_spill] sm:$0xff]  ;;  %v6050_v20 = vld [vmem:[#allocation52_spill] sm:$0xff] }
 0x35c   :  { %v6054_v1 = vld [vmem:[#allocation56_spill] sm:$0xff] }
 0x35d   :  { %3199 = vtanh.f32 %v4577_v44 }
 0x363   :  { %v3200_v2 = vpop.eup %3199 }
 0x364   :  { %v1031_v0 = vmul.f32 %v3200_v2, %v1024_v3  ;;  %v6056_v2 = vld [vmem:[#allocation96_spill] sm:$0xff]  ;;  %v6057_v3 = vld [vmem:[#allocation97_spill] sm:$0xff] }
 0x366   :  { %1065 = vmatmul.f32.vlgmr.msrb.gmra.mxu1 %v1031_v0  ;;  %1085 = vmatmul.f32.vlgmr.msrb.gmra.mxu2 %v1031_v0 }
 0x367   :  { %1105 = vmatmul.f32.vlgmr.msrb.gmra.mxu3 %v1031_v0  ;;  %1125 = vmatmul.f32.vlgmr.msra.gmra.mxu0 %v1031_v0  ;;  %v6058_v0 = vld [vmem:[#allocation98_spill] sm:$0xff] }
 0x368   :  { %1369 = vmatpush.msrb.mxu1 %v4308_v39  ;;  %1389 = vmatpush.msrb.mxu2 %v4311_v22 }
 0x369   :  { %1409 = vmatpush.msrb.mxu3 %v4314_v18  ;;  %1429 = vmatpush.msra.mxu0 %v4317_v23 }
 0x36a   :  { %1370 = vmatpush.msrb.mxu1 %v4320_v25  ;;  %1390 = vmatpush.msrb.mxu2 %v4323_v27 }
 0x36b   :  { %1410 = vmatpush.msrb.mxu3 %v4326_v28  ;;  %1430 = vmatpush.msra.mxu0 %v4329_v29 }
 0x36c   :  { %1371 = vmatpush.msrb.mxu1 %v4332_v30  ;;  %1391 = vmatpush.msrb.mxu2 %v4335_v31 }
 0x36d   :  { %1411 = vmatpush.msrb.mxu3 %v4338_v32  ;;  %1431 = vmatpush.msra.mxu0 %v4341_v33 }
 0x36e   :  { %1372 = vmatpush.msrb.mxu1 %v4344_v37  ;;  %1392 = vmatpush.msrb.mxu2 %v4347_v41 }
 0x36f   :  { %1412 = vmatpush.msrb.mxu3 %v4350_v46  ;;  %1432 = vmatpush.msra.mxu0 %v4353_v50 }
 0x370   :  { %1373 = vmatpush.msrb.mxu1 %v4356_v54  ;;  %1393 = vmatpush.msrb.mxu2 %v4359_v56 }
 0x371   :  { %1413 = vmatpush.msrb.mxu3 %v4362_v58  ;;  %1433 = vmatpush.msra.mxu0 %v4365_v59 }
 0x372   :  { %1374 = vmatpush.msrb.mxu1 %v4368_v61  ;;  %1394 = vmatpush.msrb.mxu2 %v4371_v62 }
 0x373   :  { %1414 = vmatpush.msrb.mxu3 %v4374_v45  ;;  %1434 = vmatpush.msra.mxu0 %v4377_v35 }
 0x374   :  { %1375 = vmatpush.msrb.mxu1 %v4380_v10  ;;  %1395 = vmatpush.msrb.mxu2 %v4383_v55 }
 0x375   :  { %1415 = vmatpush.msrb.mxu3 %v4386_v52  ;;  %1435 = vmatpush.msra.mxu0 %v4389_v51 }
 0x376   :  { %1376 = vmatpush.msrb.mxu1 %v4392_v38  ;;  %1396 = vmatpush.msrb.mxu2 %v4395_v43 }
 0x377   :  { %1416 = vmatpush.msrb.mxu3 %v4398_v48  ;;  %1436 = vmatpush.msra.mxu0 %v4401_v57 }
 0x378   :  { %1377 = vmatpush.msrb.mxu1 %v4404_v5  ;;  %1397 = vmatpush.msrb.mxu2 %v4407_v9 }
 0x379   :  { %1417 = vmatpush.msrb.mxu3 %v4410_v11  ;;  %1437 = vmatpush.msra.mxu0 %v4413_v12 }
 0x37a   :  { %1378 = vmatpush.msrb.mxu1 %v4416_v13  ;;  %1398 = vmatpush.msrb.mxu2 %v4419_v15 }
 0x37b   :  { %1418 = vmatpush.msrb.mxu3 %v6034_v40  ;;  %1438 = vmatpush.msra.mxu0 %v6035_v26 }
 0x37c   :  { %1379 = vmatpush.msrb.mxu1 %v6036_v34  ;;  %1399 = vmatpush.msrb.mxu2 %v6037_v16 }
 0x37d   :  { %1419 = vmatpush.msrb.mxu3 %v6038_v19  ;;  %1439 = vmatpush.msra.mxu0 %v6039_v14 }
 0x37e   :  { %1380 = vmatpush.msrb.mxu1 %v6040_v53  ;;  %1400 = vmatpush.msrb.mxu2 %v6041_v7 }
 0x37f   :  { %1420 = vmatpush.msrb.mxu3 %v6042_v6  ;;  %1440 = vmatpush.msra.mxu0 %v6043_v47 }
 0x380   :  { %1381 = vmatpush.msrb.mxu1 %v6044_v60  ;;  %1401 = vmatpush.msrb.mxu2 %v6045_v24 }
 0x381   :  { %1421 = vmatpush.msrb.mxu3 %v6046_v4  ;;  %1441 = vmatpush.msra.mxu0 %v6047_v49  ;;  %v6061_v4 = vld [vmem:[#allocation65_spill] sm:$0xff] }
 0x382   :  { %1382 = vmatpush.msrb.mxu1 %v6048_v63  ;;  %1402 = vmatpush.msrb.mxu2 %v6049_v42  ;;  %v6059_v63 = vld [vmem:[#allocation99_spill] sm:$0xff] }
 0x383   :  { %1422 = vmatpush.msrb.mxu3 %v6050_v20  ;;  %1442 = vmatpush.msra.mxu0 %v6051_v21  ;;  %v6060_v20 = vld [vmem:[#allocation63_spill] sm:$0xff] }
 0x384   :  { %1383 = vmatpush.msrb.mxu1 %v6052_v36  ;;  %1403 = vmatpush.msrb.mxu2 %v6053_v17 }
 0x385   :  { %1423 = vmatpush.msrb.mxu3 %v6054_v1  ;;  %1443 = vmatpush.msra.mxu0 %v6055_v8  ;;  %v6062_v1 = vld [vmem:[#allocation66_spill] sm:$0xff] }
 0x386   :  { %1384 = vmatpush.msrb.mxu1 %v6056_v2  ;;  %1404 = vmatpush.msrb.mxu2 %v6057_v3 }
 0x387   :  { %1424 = vmatpush.msrb.mxu3 %v6058_v0  ;;  %1444 = vmatpush.msra.mxu0 %v6059_v63 }
 0x3e3   :  { %v1066_v42 = vpop.f32.mrf.mxu1 }
 0x3e4   :  { %v1067_v49 = vadd.f32 %v1066_v42, %v6060_v20 }
 0x3e6   :  { %v3089_v21 = vmul.f32 -1.442695, %v1067_v49 }
 0x3e8   :  { %3201 = vpow2.f32 %v3089_v21 }
 0x3e9   :  { %v1086_v36 = vpop.f32.mrf.mxu2 }
 0x3ea   :  { %v1087_v17 = vadd.f32 %v1086_v36, %v6061_v4  ;;  %v1106_v24 = vpop.f32.mrf.mxu3  ;;  %v1126_v4 = vpop.f32.mrf.mxu0 }
 0x3eb   :  { %v1107_v60 = vadd.f32 %v1106_v24, %v6062_v1  ;;  %v6063_v24 = vld [vmem:[#allocation64_spill] sm:$0xff] }
 0x3ec   :  { %v3090_v8 = vmul.f32 -1.442695, %v1087_v17  ;;  %v1127_v17 = vadd.f32 %v1126_v4, %v6063_v24 }
 0x3ed   :  { %v3091_v47 = vmul.f32 -1.442695, %v1107_v60 }
 0x3ee   :  { %v3202_v2 = vpop.eup %3201  ;;  %3203 = vpow2.f32 %v3090_v8 }
 0x3ef   :  { %v1138_v3 = vadd.f32 1.0, %v3202_v2  ;;  %3205 = vpow2.f32 %v3091_v47 }
 0x3f1   :  { %3207 = vrcp.f32 %v1138_v3  ;;  %v1152_v47 = vand.u32 2147483648, %v1138_v3  ;;  %vm1146_vm2 = vweird.f32 %v1138_v3  ;;  %v1150_v53 = vand.u32 2147483647, %v1138_v3 }
 0x3f3   :  { %vm1151_vm5 = vcmp.eq.f32.partialorder %v1150_v53, 8.507059e+37 }
 0x3f4   :  { %v3204_v0 = vpop.eup %3203 }
 0x3f5   :  { %v3206_v63 = vpop.eup %3205  ;;  %v1139_v6 = vadd.f32 1.0, %v3204_v0 }
 0x3f6   :  { %v1140_v7 = vadd.f32 1.0, %v3206_v63 }
 0x3f7   :  { %v3208_v42 = vpop.eup %3207  ;;  %3209 = vrcp.f32 %v1139_v6  ;;  %v1167_v63 = vand.u32 2147483648, %v1139_v6  ;;  %vm1161_vm6 = vweird.f32 %v1139_v6 }
 0x3f8   :  { %v1142_v49 = vmul.f32 %v3208_v42, %v1138_v3  ;;  %3211 = vrcp.f32 %v1140_v7  ;;  %vm1147_vm1 = vweird.f32 %v3208_v42  ;;  %vm1176_vm10 = vweird.f32 %v1140_v7 }
 0x3f9   :  { %vm1148_vm3 = vmor %vm1146_vm2, %vm1147_vm1  ;;  %3213 = vtanh.f32 %v1127_v17  ;;  %v1168_v24 = vor.u32 1.1754944e-38, %v1167_v63 }
 0x3fa   :  { %v1143_v20 = vsub.f32 1.0, %v1142_v49  ;;  %v1165_v49 = vand.u32 2147483647, %v1139_v6 }
 0x3fc   :  { %v1144_v21 = vmul.f32 %v3208_v42, %v1143_v20  ;;  %v1153_v20 = vor.u32 1.1754944e-38, %v1152_v47  ;;  %vm1166_vm8 = vcmp.eq.f32.partialorder %v1165_v49, 8.507059e+37  ;;  %v1182_v47 = vand.u32 2147483648, %v1140_v7 }
 0x3fd   :  { %v3210_v36 = vpop.eup %3209 }
 0x3fe   :  { %v3212_v60 = vpop.eup %3211  ;;  %v1145_v1 = vadd.f32 %v3208_v42, %v1144_v21  ;;  %v1157_v8 = vmul.f32 %v3210_v36, %v1139_v6  ;;  %vm1162_vm4 = vweird.f32 %v3210_v36  ;;  %v1183_v53 = vor.u32 1.1754944e-38, %v1182_v47 }
 0x3ff   :  { %v1172_v2 = vmul.f32 %v3212_v60, %v1140_v7  ;;  %vm1163_vm7 = vmor %vm1161_vm6, %vm1162_vm4  ;;  %v3214_v26 = vpop.eup %3213  ;;  %vm1177_vm9 = vweird.f32 %v3212_v60 }
 0x400   :  { %v1158_v0 = vsub.f32 1.0, %v1157_v8  ;;  %v1149_v14 = vsel %vm1148_vm3, %v3208_v42, %v1145_v1  ;;  %vm1178_vm11 = vmor %vm1176_vm10, %vm1177_vm9 }
 0x401   :  { %v1173_v16 = vsub.f32 1.0, %v1172_v2  ;;  %v1154_v21 = vsel %vm1151_vm5, %v1153_v20, %v1149_v14 }
 0x402   :  { %v1159_v19 = vmul.f32 %v3210_v36, %v1158_v0  ;;  %v1188_v40 = vmul.f32 %v3214_v26, %v1154_v21  ;;  %v6093_v21 = vld [vmem:[#allocation68_spill] sm:$0xff] }
 0x403   :  { %v1174_v8 = vmul.f32 %v3212_v60, %v1173_v16 }
 0x404   :  { %v1160_v4 = vadd.f32 %v3210_v36, %v1159_v19  ;;  %v1180_v19 = vand.u32 2147483647, %v1140_v7 }
 0x405   :  { %v1175_v1 = vadd.f32 %v3212_v60, %v1174_v8 }
 0x406   :  { %v1164_v34 = vsel %vm1163_vm7, %v3210_v36, %v1160_v4  ;;  %vm1181_vm12 = vcmp.eq.f32.partialorder %v1180_v19, 8.507059e+37 }
 0x407   :  { %v1169_v3 = vsel %vm1166_vm8, %v1168_v24, %v1164_v34  ;;  %v1179_v14 = vsel %vm1178_vm11, %v3212_v60, %v1175_v1 }
 0x408   :  { %v1187_v17 = vmul.f32 %v1169_v3, %v4577_v44  ;;  %v1184_v36 = vsel %vm1181_vm12, %v1183_v53, %v1179_v14 }
 0x40a   :  { %v4649_v42 = vadd.f32 %v1188_v40, %v1187_v17 }
 0x40c   :  { %3215 = vtanh.f32 %v4649_v42 }
 0x412   :  { %v3216_v6 = vpop.eup %3215 }
 0x413   :  { %v1191_v34 = vmul.f32 %v3216_v6, %v1184_v36 }
 0x415   :  { %1225 = vmatmul.f32.vlgmr.msra.gmra.mxu1 %v1191_v34  ;;  %1245 = vmatmul.f32.vlgmr.msra.gmra.mxu2 %v1191_v34 }
 0x416   :  { %1265 = vmatmul.f32.vlgmr.msra.gmra.mxu3 %v1191_v34  ;;  %1285 = vmatmul.f32.vlgmr.msrb.gmra.mxu0 %v1191_v34 }
 0x417   :  { %1529 = vmatpush.msra.mxu1 %v4308_v39  ;;  %1549 = vmatpush.msra.mxu2 %v4311_v22  ;;  %v6064_v39 = vld [vmem:[#allocation44_spill] sm:$0xff]  ;;  %v6065_v22 = vld [vmem:[#allocation30_spill] sm:$0xff] }
 0x418   :  { %1569 = vmatpush.msra.mxu3 %v4314_v18  ;;  %1589 = vmatpush.msrb.mxu0 %v4317_v23  ;;  %v6066_v18 = vld [vmem:[#allocation31_spill] sm:$0xff]  ;;  %v6067_v23 = vld [vmem:[#allocation32_spill] sm:$0xff] }
 0x419   :  { %1530 = vmatpush.msra.mxu1 %v4320_v25  ;;  %1550 = vmatpush.msra.mxu2 %v4323_v27  ;;  %v6068_v25 = vld [vmem:[#allocation49_spill] sm:$0xff] }
 0x41a   :  { %1570 = vmatpush.msra.mxu3 %v4326_v28  ;;  %1590 = vmatpush.msrb.mxu0 %v4329_v29  ;;  %v6069_v27 = vld [vmem:[#allocation33_spill] sm:$0xff]  ;;  %v6070_v28 = vld [vmem:[#allocation34_spill] sm:$0xff]  ;;  %v6071_v29 = vld [vmem:[#allocation35_spill] sm:$0xff] }
 0x41b   :  { %1531 = vmatpush.msra.mxu1 %v4332_v30  ;;  %1551 = vmatpush.msra.mxu2 %v4335_v31  ;;  %v6072_v30 = vld [vmem:[#allocation50_spill] sm:$0xff]  ;;  %v6073_v31 = vld [vmem:[#allocation36_spill] sm:$0xff] }
 0x41c   :  { %1571 = vmatpush.msra.mxu3 %v4338_v32  ;;  %1591 = vmatpush.msrb.mxu0 %v4341_v33  ;;  %v6074_v32 = vld [vmem:[#allocation37_spill] sm:$0xff]  ;;  %v6075_v33 = vld [vmem:[#allocation38_spill] sm:$0xff] }
 0x41d   :  { %1532 = vmatpush.msra.mxu1 %v4344_v37  ;;  %1552 = vmatpush.msra.mxu2 %v4347_v41  ;;  %v6076_v37 = vld [vmem:[#allocation51_spill] sm:$0xff] }
 0x41e   :  { %1572 = vmatpush.msra.mxu3 %v4350_v46  ;;  %1592 = vmatpush.msrb.mxu0 %v4353_v50  ;;  %v6077_v41 = vld [vmem:[#allocation39_spill] sm:$0xff]  ;;  %v6078_v46 = vld [vmem:[#allocation40_spill] sm:$0xff]  ;;  %v6079_v50 = vld [vmem:[#allocation41_spill] sm:$0xff] }
 0x41f   :  { %1533 = vmatpush.msra.mxu1 %v4356_v54  ;;  %1553 = vmatpush.msra.mxu2 %v4359_v56  ;;  %v6080_v54 = vld [vmem:[#allocation52_spill] sm:$0xff]  ;;  %v6081_v56 = vld [vmem:[#allocation53_spill] sm:$0xff] }
 0x420   :  { %1573 = vmatpush.msra.mxu3 %v4362_v58  ;;  %1593 = vmatpush.msrb.mxu0 %v4365_v59  ;;  %v6082_v58 = vld [vmem:[#allocation54_spill] sm:$0xff]  ;;  %v6083_v59 = vld [vmem:[#allocation55_spill] sm:$0xff] }
 0x421   :  { %1534 = vmatpush.msra.mxu1 %v4368_v61  ;;  %1554 = vmatpush.msra.mxu2 %v4371_v62  ;;  %v6084_v61 = vld [vmem:[#allocation56_spill] sm:$0xff]  ;;  %v6085_v62 = vld [vmem:[#allocation95_spill] sm:$0xff] }
 0x422   :  { %1574 = vmatpush.msra.mxu3 %v4374_v45  ;;  %1594 = vmatpush.msrb.mxu0 %v4377_v35  ;;  %v6086_v45 = vld [vmem:[#allocation96_spill] sm:$0xff]  ;;  %v6087_v35 = vld [vmem:[#allocation97_spill] sm:$0xff] }
 0x423   :  { %1535 = vmatpush.msra.mxu1 %v4380_v10  ;;  %1555 = vmatpush.msra.mxu2 %v4383_v55  ;;  %v6088_v10 = vld [vmem:[#allocation98_spill] sm:$0xff]  ;;  %v6089_v55 = vld [vmem:[#allocation99_spill] sm:$0xff] }
 0x424   :  { %1575 = vmatpush.msra.mxu3 %v4386_v52  ;;  %1595 = vmatpush.msrb.mxu0 %v4389_v51  ;;  %v6090_v51 = vld [vmem:[#allocation67_spill] sm:$0xff] }
 0x425   :  { %1536 = vmatpush.msra.mxu1 %v4392_v38  ;;  %1556 = vmatpush.msra.mxu2 %v4395_v43 }
 0x426   :  { %1576 = vmatpush.msra.mxu3 %v4398_v48  ;;  %1596 = vmatpush.msrb.mxu0 %v4401_v57  ;;  %v6091_v57 = vld [vmem:[#allocation69_spill] sm:$0xff] }
 0x427   :  { %1537 = vmatpush.msra.mxu1 %v4404_v5  ;;  %1557 = vmatpush.msra.mxu2 %v4407_v9 }
 0x428   :  { %1577 = vmatpush.msra.mxu3 %v4410_v11  ;;  %1597 = vmatpush.msrb.mxu0 %v4413_v12  ;;  %v6092_v11 = vld [vmem:[#allocation70_spill] sm:$0xff] }
 0x429   :  { %1538 = vmatpush.msra.mxu1 %v4416_v13  ;;  %1558 = vmatpush.msra.mxu2 %v4419_v15 }
 0x42a   :  { %1578 = vmatpush.msra.mxu3 %v6064_v39  ;;  %1598 = vmatpush.msrb.mxu0 %v6065_v22 }
 0x42b   :  { %1539 = vmatpush.msra.mxu1 %v6066_v18  ;;  %1559 = vmatpush.msra.mxu2 %v6067_v23 }
 0x42c   :  { %1579 = vmatpush.msra.mxu3 %v6068_v25  ;;  %1599 = vmatpush.msrb.mxu0 %v6069_v27 }
 0x42d   :  { %1540 = vmatpush.msra.mxu1 %v6070_v28  ;;  %1560 = vmatpush.msra.mxu2 %v6071_v29 }
 0x42e   :  { %1580 = vmatpush.msra.mxu3 %v6072_v30  ;;  %1600 = vmatpush.msrb.mxu0 %v6073_v31 }
 0x42f   :  { %1541 = vmatpush.msra.mxu1 %v6074_v32  ;;  %1561 = vmatpush.msra.mxu2 %v6075_v33 }
 0x430   :  { %1581 = vmatpush.msra.mxu3 %v6076_v37  ;;  %1601 = vmatpush.msrb.mxu0 %v6077_v41 }
 0x431   :  { %1542 = vmatpush.msra.mxu1 %v6078_v46  ;;  %1562 = vmatpush.msra.mxu2 %v6079_v50 }
 0x432   :  { %1582 = vmatpush.msra.mxu3 %v6080_v54  ;;  %1602 = vmatpush.msrb.mxu0 %v6081_v56 }
 0x433   :  { %1543 = vmatpush.msra.mxu1 %v6082_v58  ;;  %1563 = vmatpush.msra.mxu2 %v6083_v59 }
 0x434   :  { %1583 = vmatpush.msra.mxu3 %v6084_v61  ;;  %1603 = vmatpush.msrb.mxu0 %v6085_v62  ;;  %v6094_v61 = vld [vmem:[#allocation71_spill] sm:$0xff] }
 0x435   :  { %1544 = vmatpush.msra.mxu1 %v6086_v45  ;;  %1564 = vmatpush.msra.mxu2 %v6087_v35 }
 0x436   :  { %1584 = vmatpush.msra.mxu3 %v6088_v10  ;;  %1604 = vmatpush.msrb.mxu0 %v6089_v55  ;;  %v6095_v10 = vld [vmem:[#allocation73_spill] sm:$0xff] }
 0x492   :  { %v1226_v52 = vpop.f32.mrf.mxu1 }
 0x493   :  { %v1227_v38 = vadd.f32 %v1226_v52, %v6090_v51  ;;  %v1286_v49 = vpop.f32.mrf.mxu0  ;;  %v6096_v51 = vld [vmem:[#allocation74_spill] sm:$0xff] }
 0x494   :  { %v1287_v24 = vadd.f32 %v1286_v49, %v6093_v21 }
 0x495   :  { %v3092_v43 = vmul.f32 -1.442695, %v1227_v38 }
 0x497   :  { %3217 = vpow2.f32 %v3092_v43 }
 0x498   :  { %v1246_v48 = vpop.f32.mrf.mxu2 }
 0x499   :  { %v1247_v5 = vadd.f32 %v1246_v48, %v6091_v57  ;;  %v1266_v9 = vpop.f32.mrf.mxu3 }
 0x49a   :  { %v1267_v12 = vadd.f32 %v1266_v9, %v6092_v11 }
 0x49b   :  { %v3093_v13 = vmul.f32 -1.442695, %v1247_v5 }
 0x49c   :  { %v3094_v15 = vmul.f32 -1.442695, %v1267_v12 }
 0x49d   :  { %v3218_v44 = vpop.eup %3217  ;;  %3219 = vpow2.f32 %v3093_v13 }
 0x49e   :  { %v1298_v40 = vadd.f32 1.0, %v3218_v44  ;;  %3221 = vpow2.f32 %v3094_v15 }
 0x4a0   :  { %3223 = vrcp.f32 %v1298_v40  ;;  %v1312_v1 = vand.u32 2147483648, %v1298_v40  ;;  %vm1306_vm14 = vweird.f32 %v1298_v40  ;;  %v1310_v19 = vand.u32 2147483647, %v1298_v40 }
 0x4a2   :  { %v1313_v39 = vor.u32 1.1754944e-38, %v1312_v1  ;;  %vm1311_vm1 = vcmp.eq.f32.partialorder %v1310_v19, 8.507059e+37 }
 0x4a3   :  { %v3220_v26 = vpop.eup %3219 }
 0x4a4   :  { %v3222_v16 = vpop.eup %3221  ;;  %v1299_v7 = vadd.f32 1.0, %v3220_v26 }
 0x4a5   :  { %v1300_v60 = vadd.f32 1.0, %v3222_v16 }
 0x4a6   :  { %v3224_v2 = vpop.eup %3223  ;;  %3225 = vrcp.f32 %v1299_v7  ;;  %v1327_v53 = vand.u32 2147483648, %v1299_v7  ;;  %v1325_v34 = vand.u32 2147483647, %v1299_v7  ;;  %vm1321_vm2 = vweird.f32 %v1299_v7 }
 0x4a7   :  { %v1302_v0 = vmul.f32 %v3224_v2, %v1298_v40  ;;  %3227 = vrcp.f32 %v1300_v60  ;;  %vm1307_vm13 = vweird.f32 %v3224_v2  ;;  %v1342_v41 = vand.u32 2147483648, %v1300_v60 }
 0x4a8   :  { %vm1308_vm15 = vmor %vm1306_vm14, %vm1307_vm13  ;;  %3229 = vtanh.f32 %v1287_v24  ;;  %v1328_v25 = vor.u32 1.1754944e-38, %v1327_v53  ;;  %vm1326_vm4 = vcmp.eq.f32.partialorder %v1325_v34, 8.507059e+37  ;;  %vm1336_vm6 = vweird.f32 %v1300_v60 }
 0x4a9   :  { %v1303_v63 = vsub.f32 1.0, %v1302_v0  ;;  %v1340_v46 = vand.u32 2147483647, %v1300_v60  ;;  %v1343_v54 = vor.u32 1.1754944e-38, %v1342_v41 }
 0x4ab   :  { %v1304_v20 = vmul.f32 %v3224_v2, %v1303_v63  ;;  %vm1341_vm8 = vcmp.eq.f32.partialorder %v1340_v46, 8.507059e+37  ;;  %v4734_v46 = vld [vmem:[#allocation11 + $0x1e8] sm:$0xff] }
 0x4ac   :  { %v3226_v4 = vpop.eup %3225  ;;  %6099 = vst [vmem:[#allocation58_spill] sm:$0xff] %v4734_v46 }
 0x4ad   :  { %v3228_v3 = vpop.eup %3227  ;;  %v1305_v8 = vadd.f32 %v3224_v2, %v1304_v20  ;;  %v1317_v17 = vmul.f32 %v3226_v4, %v1299_v7  ;;  %vm1322_vm0 = vweird.f32 %v3226_v4 }
 0x4ae   :  { %v1332_v47 = vmul.f32 %v3228_v3, %v1300_v60  ;;  %vm1323_vm3 = vmor %vm1321_vm2, %vm1322_vm0  ;;  %v3230_v28 = vpop.eup %3229  ;;  %vm1337_vm5 = vweird.f32 %v3228_v3  ;;  %v6097_v60 = vld [vmem:[#allocation72_spill] sm:$0xff] }
 0x4af   :  { %v1318_v14 = vsub.f32 1.0, %v1317_v17  ;;  %v1309_v6 = vsel %vm1308_vm15, %v3224_v2, %v1305_v8  ;;  %vm1338_vm7 = vmor %vm1336_vm6, %vm1337_vm5 }
 0x4b0   :  { %v1333_v22 = vsub.f32 1.0, %v1332_v47  ;;  %v1314_v23 = vsel %vm1311_vm1, %v1313_v39, %v1309_v6 }
 0x4b1   :  { %v1319_v36 = vmul.f32 %v3226_v4, %v1318_v14  ;;  %v1348_v31 = vmul.f32 %v3230_v28, %v1314_v23 }
 0x4b2   :  { %v1334_v30 = vmul.f32 %v3228_v3, %v1333_v22 }
 0x4b3   :  { %v1320_v18 = vadd.f32 %v3226_v4, %v1319_v36 }
 0x4b4   :  { %v1335_v37 = vadd.f32 %v3228_v3, %v1334_v30 }
 0x4b5   :  { %v1324_v27 = vsel %vm1323_vm3, %v3226_v4, %v1320_v18 }
 0x4b6   :  { %v1329_v29 = vsel %vm1326_vm4, %v1328_v25, %v1324_v27  ;;  %v1339_v50 = vsel %vm1338_vm7, %v3228_v3, %v1335_v37 }
 0x4b7   :  { %v1347_v32 = vmul.f32 %v1329_v29, %v4649_v42  ;;  %v1344_v58 = vsel %vm1341_vm8, %v1343_v54, %v1339_v50  ;;  %v4736_v50 = vld [vmem:[#allocation11 + $0x1f0] sm:$0xff]  ;;  %v4740_v54 = vld [vmem:[#allocation11 + $0x1f8] sm:$0xff] }
 0x4b9   :  { %v4721_v33 = vadd.f32 %v1348_v31, %v1347_v32 }
 0x4bb   :  { %3231 = vtanh.f32 %v4721_v33 }
 0x4c1   :  { %v3232_v56 = vpop.eup %3231 }
 0x4c2   :  { %v1351_v59 = vmul.f32 %v3232_v56, %v1344_v58  ;;  %v4744_v56 = vld [vmem:[#allocation11 + $0x1c0] sm:$0xff]  ;;  %v4746_v58 = vld [vmem:[#allocation11 + $0x1c8] sm:$0xff] }
 0x4c3   :  { %6100 = vst [vmem:[#allocation59_spill] sm:$0xff] %v4744_v56 }
 0x4c4   :  { %1385 = vmatmul.f32.vlgmr.msrb.gmra.mxu1 %v1351_v59  ;;  %1405 = vmatmul.f32.vlgmr.msrb.gmra.mxu2 %v1351_v59  ;;  %6101 = vst [vmem:[#allocation60_spill] sm:$0xff] %v4746_v58 }
 0x4c5   :  { %1425 = vmatmul.f32.vlgmr.msrb.gmra.mxu3 %v1351_v59  ;;  %1445 = vmatmul.f32.vlgmr.msra.gmra.mxu0 %v1351_v59  ;;  %v4748_v59 = vld [vmem:[#allocation11 + $0x1d0] sm:$0xff] }
 0x4c6   :  { %1790 = vmatpush.msrb.mxu2 %v4734_v46  ;;  %1810 = vmatpush.msrb.mxu3 %v4736_v50 }
 0x4c7   :  { %1830 = vmatpush.msra.mxu0 %v4740_v54 }
 0x4c8   :  { %1791 = vmatpush.msrb.mxu2 %v4746_v58  ;;  %1811 = vmatpush.msrb.mxu3 %v4748_v59 }
 0x541   :  { %v1386_v42 = vpop.f32.mrf.mxu1 }
 0x542   :  { %v1387_v62 = vadd.f32 %v1386_v42, %v6094_v61  ;;  %v1446_v26 = vpop.f32.mrf.mxu0  ;;  %v4752_v42 = vld [vmem:[#allocation11 + $0x1d8] sm:$0xff]  ;;  %v4756_v61 = vld [vmem:[#allocation11 + $0x1a0] sm:$0xff] }
 0x543   :  { %v1447_v2 = vadd.f32 %v1446_v26, %v6097_v60  ;;  %6102 = vst [vmem:[#allocation22_spill] sm:$0xff] %v4752_v42  ;;  %1831 = vmatpush.msra.mxu0 %v4752_v42  ;;  %v4809_v60 = vld [vmem:[#allocation11 + $0x130] sm:$0xff] }
 0x544   :  { %v3095_v45 = vmul.f32 -1.442695, %v1387_v62  ;;  %v4758_v62 = vld [vmem:[#allocation11 + $0x1a8] sm:$0xff] }
 0x545   :  { %1792 = vmatpush.msrb.mxu2 %v4758_v62 }
 0x546   :  { %3233 = vpow2.f32 %v3095_v45  ;;  %v4760_v45 = vld [vmem:[#allocation11 + $0x1b0] sm:$0xff] }
 0x547   :  { %v1406_v35 = vpop.f32.mrf.mxu2  ;;  %1812 = vmatpush.msrb.mxu3 %v4760_v45 }
 0x548   :  { %v1407_v55 = vadd.f32 %v1406_v35, %v6095_v10  ;;  %v1426_v52 = vpop.f32.mrf.mxu3  ;;  %v4764_v35 = vld [vmem:[#allocation11 + $0x1b8] sm:$0xff] }
 0x549   :  { %v1427_v38 = vadd.f32 %v1426_v52, %v6096_v51  ;;  %1832 = vmatpush.msra.mxu0 %v4764_v35  ;;  %v4770_v52 = vld [vmem:[#allocation11 + $0x188] sm:$0xff]  ;;  %v4772_v51 = vld [vmem:[#allocation11 + $0x190] sm:$0xff] }
 0x54a   :  { %v3096_v43 = vmul.f32 -1.442695, %v1407_v55  ;;  %v4768_v55 = vld [vmem:[#allocation11 + $0x180] sm:$0xff]  ;;  %1793 = vmatpush.msrb.mxu2 %v4770_v52  ;;  %1813 = vmatpush.msrb.mxu3 %v4772_v51 }
 0x54b   :  { %v3097_v48 = vmul.f32 -1.442695, %v1427_v38  ;;  %v6103_v38 = vld [vmem:[#allocation45_spill] sm:$0xff] }
 0x54c   :  { %v3234_v57 = vpop.eup %3233  ;;  %3235 = vpow2.f32 %v3096_v43 }
 0x54d   :  { %v1458_v5 = vadd.f32 1.0, %v3234_v57  ;;  %3237 = vpow2.f32 %v3097_v48  ;;  %v4777_v48 = vld [vmem:[#allocation11 + $0x198] sm:$0xff]  ;;  %v4781_v57 = vld [vmem:[#allocation11 + $0x160] sm:$0xff] }
 0x54e   :  { %1833 = vmatpush.msra.mxu0 %v4777_v48 }
 0x54f   :  { %3239 = vrcp.f32 %v1458_v5  ;;  %v1472_v20 = vand.u32 2147483648, %v1458_v5  ;;  %vm1466_vm10 = vweird.f32 %v1458_v5  ;;  %v1470_v21 = vand.u32 2147483647, %v1458_v5 }
 0x551   :  { %v1473_v47 = vor.u32 1.1754944e-38, %v1472_v20  ;;  %vm1471_vm13 = vcmp.eq.f32.partialorder %v1470_v21, 8.507059e+37  ;;  %v6105_v20 = vld [vmem:[#allocation77_spill] sm:$0xff]  ;;  %v4819_v21 = vld [vmem:[#allocation11 + $0x100] sm:$0xff] }
 0x552   :  { %v3236_v9 = vpop.eup %3235 }
 0x553   :  { %v3238_v11 = vpop.eup %3237  ;;  %v1459_v12 = vadd.f32 1.0, %v3236_v9  ;;  %v4785_v9 = vld [vmem:[#allocation11 + $0x170] sm:$0xff] }
 0x554   :  { %v1460_v13 = vadd.f32 1.0, %v3238_v11  ;;  %1814 = vmatpush.msrb.mxu3 %v4785_v9 }
 0x555   :  { %v3240_v15 = vpop.eup %3239  ;;  %3241 = vrcp.f32 %v1459_v12  ;;  %v1487_v3 = vand.u32 2147483648, %v1459_v12  ;;  %v1485_v1 = vand.u32 2147483647, %v1459_v12  ;;  %vm1481_vm14 = vweird.f32 %v1459_v12 }
 0x556   :  { %v1462_v44 = vmul.f32 %v3240_v15, %v1458_v5  ;;  %3243 = vrcp.f32 %v1460_v13  ;;  %vm1467_vm9 = vweird.f32 %v3240_v15  ;;  %v1502_v28 = vand.u32 2147483648, %v1460_v13  ;;  %v4783_v5 = vld [vmem:[#allocation11 + $0x168] sm:$0xff] }
 0x557   :  { %vm1468_vm11 = vmor %vm1466_vm10, %vm1467_vm9  ;;  %3245 = vtanh.f32 %v1447_v2  ;;  %v1488_v6 = vor.u32 1.1754944e-38, %v1487_v3  ;;  %vm1486_vm0 = vcmp.eq.f32.partialorder %v1485_v1, 8.507059e+37  ;;  %vm1496_vm2 = vweird.f32 %v1460_v13  ;;  %1794 = vmatpush.msrb.mxu2 %v4783_v5  ;;  %v6104_v2 = vld [vmem:[#allocation76_spill] sm:$0xff]  ;;  %v4823_v3 = vld [vmem:[#allocation11 + $0x110] sm:$0xff] }
 0x558   :  { %v1463_v40 = vsub.f32 1.0, %v1462_v44  ;;  %v1500_v29 = vand.u32 2147483647, %v1460_v13  ;;  %v1503_v31 = vor.u32 1.1754944e-38, %v1502_v28  ;;  %v4797_v44 = vld [vmem:[#allocation11 + $0x150] sm:$0xff]  ;;  %v4829_v1 = vld [vmem:[#allocation11 + $0xe0] sm:$0xff] }
 0x559   :  { %1815 = vmatpush.msrb.mxu3 %v4797_v44  ;;  %v4859_v28 = vld [vmem:[#allocation11 + $0xb0] sm:$0xff] }
 0x55a   :  { %v1464_v16 = vmul.f32 %v3240_v15, %v1463_v40  ;;  %vm1501_vm4 = vcmp.eq.f32.partialorder %v1500_v29, 8.507059e+37  ;;  %v4801_v40 = vld [vmem:[#allocation11 + $0x158] sm:$0xff]  ;;  %6110 = vst [vmem:[#allocation65_spill] sm:$0xff] %v4859_v28 }
 0x55b   :  { %v3242_v7 = vpop.eup %3241  ;;  %1816 = vmatpush.msrb.mxu3 %v4809_v60  ;;  %v4861_v29 = vld [vmem:[#allocation11 + $0xb8] sm:$0xff] }
 0x55c   :  { %v3244_v0 = vpop.eup %3243  ;;  %v1465_v63 = vadd.f32 %v3240_v15, %v1464_v16  ;;  %v1477_v49 = vmul.f32 %v3242_v7, %v1459_v12  ;;  %vm1482_vm12 = vweird.f32 %v3242_v7  ;;  %v4789_v12 = vld [vmem:[#allocation11 + $0x178] sm:$0xff]  ;;  %v4805_v16 = vld [vmem:[#allocation11 + $0x120] sm:$0xff]  ;;  %6111 = vst [vmem:[#allocation66_spill] sm:$0xff] %v4861_v29 }
 0x55d   :  { %v1492_v4 = vmul.f32 %v3244_v0, %v1460_v13  ;;  %vm1483_vm15 = vmor %vm1481_vm14, %vm1482_vm12  ;;  %v3246_v34 = vpop.eup %3245  ;;  %vm1497_vm1 = vweird.f32 %v3244_v0  ;;  %1834 = vmatpush.msra.mxu0 %v4789_v12  ;;  %v4793_v13 = vld [vmem:[#allocation11 + $0x140] sm:$0xff]  ;;  %1817 = vmatpush.msrb.mxu3 %v4823_v3 }
 0x55e   :  { %v1478_v24 = vsub.f32 1.0, %v1477_v49  ;;  %v1469_v8 = vsel %vm1468_vm11, %v3240_v15, %v1465_v63  ;;  %vm1498_vm3 = vmor %vm1496_vm2, %vm1497_vm1  ;;  %v4795_v15 = vld [vmem:[#allocation11 + $0x148] sm:$0xff]  ;;  %v4814_v49 = vld [vmem:[#allocation11 + $0x138] sm:$0xff] }
 0x55f   :  { %v1493_v19 = vsub.f32 1.0, %v1492_v4  ;;  %v1474_v53 = vsel %vm1471_vm13, %v1473_v47, %v1469_v8  ;;  %1795 = vmatpush.msrb.mxu2 %v4795_v15  ;;  %1835 = vmatpush.msra.mxu0 %v4801_v40  ;;  %v4831_v47 = vld [vmem:[#allocation11 + $0xe8] sm:$0xff] }
 0x560   :  { %v1479_v17 = vmul.f32 %v3242_v7, %v1478_v24  ;;  %v1508_v18 = vmul.f32 %v3246_v34, %v1474_v53  ;;  %v4821_v24 = vld [vmem:[#allocation11 + $0x108] sm:$0xff]  ;;  %v4837_v53 = vld [vmem:[#allocation11 + $0xf8] sm:$0xff] }
 0x561   :  { %v1494_v22 = vmul.f32 %v3244_v0, %v1493_v19  ;;  %1836 = vmatpush.msra.mxu0 %v4814_v49  ;;  %v4843_v34 = vld [vmem:[#allocation11 + $0xc8] sm:$0xff] }
 0x562   :  { %v1480_v14 = vadd.f32 %v3242_v7, %v1479_v17  ;;  %v4827_v17 = vld [vmem:[#allocation11 + $0x118] sm:$0xff] }
 0x563   :  { %v1495_v27 = vadd.f32 %v3244_v0, %v1494_v22  ;;  %1837 = vmatpush.msra.mxu0 %v4827_v17  ;;  %v4847_v22 = vld [vmem:[#allocation11 + $0xd8] sm:$0xff] }
 0x564   :  { %v1484_v36 = vsel %vm1483_vm15, %v3242_v7, %v1480_v14  ;;  %v4807_v7 = vld [vmem:[#allocation11 + $0x128] sm:$0xff]  ;;  %v4835_v14 = vld [vmem:[#allocation11 + $0xf0] sm:$0xff]  ;;  %6107 = vst [vmem:[#allocation62_spill] sm:$0xff] %v4847_v22 }
 0x565   :  { %v1489_v39 = vsel %vm1486_vm0, %v1488_v6, %v1484_v36  ;;  %v1499_v30 = vsel %vm1498_vm3, %v3244_v0, %v1495_v27  ;;  %1796 = vmatpush.msrb.mxu2 %v4807_v7  ;;  %v4839_v6 = vld [vmem:[#allocation11 + $0xc0] sm:$0xff]  ;;  %1818 = vmatpush.msrb.mxu3 %v4835_v14  ;;  %v4855_v27 = vld [vmem:[#allocation11 + $0xa8] sm:$0xff] }
 0x566   :  { %v1507_v23 = vmul.f32 %v1489_v39, %v4721_v33  ;;  %v1504_v37 = vsel %vm1501_vm4, %v1503_v31, %v1499_v30  ;;  %v4732_v33 = vld [vmem:[#allocation11 + $0x1e0] sm:$0xff]  ;;  %v4845_v39 = vld [vmem:[#allocation11 + $0xd0] sm:$0xff]  ;;  %1838 = vmatpush.msra.mxu0 %v4837_v53  ;;  %6109 = vst [vmem:[#allocation63_spill] sm:$0xff] %v4855_v27  ;;  %v4868_v31 = vld [vmem:[#allocation11 + $0x88] sm:$0xff] }
 0x567   :  { %6098 = vst [vmem:[#allocation57_spill] sm:$0xff] %v4732_v33  ;;  %1770 = vmatpush.msrb.mxu1 %v4732_v33  ;;  %1797 = vmatpush.msrb.mxu2 %v4821_v24  ;;  %v4866_v30 = vld [vmem:[#allocation11 + $0x80] sm:$0xff] }
 0x568   :  { %v4729_v25 = vadd.f32 %v1508_v18, %v1507_v23  ;;  %6106 = vst [vmem:[#allocation61_spill] sm:$0xff] %v4845_v39  ;;  %v4853_v23 = vld [vmem:[#allocation11 + $0xa0] sm:$0xff]  ;;  %1819 = vmatpush.msrb.mxu3 %v4845_v39  ;;  %1839 = vmatpush.msra.mxu0 %v4847_v22 }
 0x569   :  { %1771 = vmatpush.msrb.mxu1 %v4744_v56  ;;  %1798 = vmatpush.msrb.mxu2 %v4831_v47  ;;  %6108 = vst [vmem:[#allocation23_spill] sm:$0xff] %v4853_v23 }
 0x56a   :  { %3247 = vtanh.f32 %v4729_v25  ;;  %6112 = vst [vmem:[#allocation64_spill] sm:$0xff] %v4866_v30  ;;  %1820 = vmatpush.msrb.mxu3 %v4859_v28  ;;  %1840 = vmatpush.msra.mxu0 %v4861_v29 }
 0x56b   :  { %1772 = vmatpush.msrb.mxu1 %v4756_v61  ;;  %1799 = vmatpush.msrb.mxu2 %v4843_v34  ;;  %6113 = vst [vmem:[#allocation44_spill] sm:$0xff] %v4868_v31 }
 0x56d   :  { %1773 = vmatpush.msrb.mxu1 %v4768_v55  ;;  %1800 = vmatpush.msrb.mxu2 %v4855_v27 }
 0x56f   :  { %1774 = vmatpush.msrb.mxu1 %v4781_v57  ;;  %1801 = vmatpush.msrb.mxu2 %v4868_v31 }
 0x570   :  { %v3248_v32 = vpop.eup %3247 }
 0x571   :  { %v1511_v41 = vmul.f32 %v3248_v32, %v1504_v37  ;;  %1775 = vmatpush.msrb.mxu1 %v4793_v13  ;;  %v4872_v32 = vld [vmem:[#allocation11 + $0x90] sm:$0xff]  ;;  %v4874_v37 = vld [vmem:[#allocation11 + $0x98] sm:$0xff] }
 0x572   :  { %6114 = vst [vmem:[#allocation30_spill] sm:$0xff] %v4872_v32  ;;  %1821 = vmatpush.msrb.mxu3 %v4872_v32  ;;  %1841 = vmatpush.msra.mxu0 %v4874_v37 }
 0x573   :  { %1545 = vmatmul.f32.vlgmr.msra.gmra.mxu1 %v1511_v41  ;;  %1565 = vmatmul.f32.vlgmr.msra.gmra.mxu2 %v1511_v41  ;;  %6115 = vst [vmem:[#allocation31_spill] sm:$0xff] %v4874_v37 }
 0x574   :  { %1585 = vmatmul.f32.vlgmr.msra.gmra.mxu3 %v1511_v41  ;;  %1605 = vmatmul.f32.vlgmr.msrb.gmra.mxu0 %v1511_v41  ;;  %v4878_v41 = vld [vmem:[#allocation11 + $0x60] sm:$0xff] }
 0x575   :  { %1776 = vmatpush.msrb.mxu1 %v4805_v16  ;;  %6116 = vst [vmem:[#allocation32_spill] sm:$0xff] %v4878_v41 }
 0x577   :  { %1777 = vmatpush.msrb.mxu1 %v4819_v21 }
 0x579   :  { %1778 = vmatpush.msrb.mxu1 %v4829_v1 }
 0x57b   :  { %1779 = vmatpush.msrb.mxu1 %v4839_v6 }
 0x57d   :  { %1780 = vmatpush.msrb.mxu1 %v4853_v23 }
 0x57f   :  { %1781 = vmatpush.msrb.mxu1 %v4866_v30 }
 0x581   :  { %1782 = vmatpush.msrb.mxu1 %v4878_v41  ;;  %v4920_v41 = vld [vmem:[#allocation11 + $0x38] sm:$0xff] }
 0x582   :  { %6127 = vst [vmem:[#allocation40_spill] sm:$0xff] %v4920_v41 }
 0x5f0   :  { %v1546_v10 = vpop.f32.mrf.mxu1 }
 0x5f1   :  { %v1547_v43 = vadd.f32 %v1546_v10, %v6103_v38  ;;  %v4880_v10 = vld [vmem:[#allocation11 + $0x68] sm:$0xff]  ;;  %v1606_v32 = vpop.f32.mrf.mxu0 }
 0x5f2   :  { %6117 = vst [vmem:[#allocation49_spill] sm:$0xff] %v4880_v10  ;;  %1802 = vmatpush.msrb.mxu2 %v4880_v10  ;;  %v4918_v10 = vld [vmem:[#allocation11 + $0x30] sm:$0xff] }
 0x5f3   :  { %v3098_v11 = vmul.f32 -1.442695, %v1547_v43  ;;  %v4884_v43 = vld [vmem:[#allocation11 + $0x70] sm:$0xff]  ;;  %6126 = vst [vmem:[#allocation39_spill] sm:$0xff] %v4918_v10 }
 0x5f4   :  { %6118 = vst [vmem:[#allocation33_spill] sm:$0xff] %v4884_v43  ;;  %1822 = vmatpush.msrb.mxu3 %v4884_v43  ;;  %v4926_v43 = vld [vmem:[#allocation11 + $0x8] sm:$0xff] }
 0x5f5   :  { %3249 = vpow2.f32 %v3098_v11  ;;  %v4886_v11 = vld [vmem:[#allocation11 + $0x78] sm:$0xff]  ;;  %6129 = vst [vmem:[#allocation52_spill] sm:$0xff] %v4926_v43 }
 0x5f6   :  { %v1566_v26 = vpop.f32.mrf.mxu2  ;;  %6119 = vst [vmem:[#allocation34_spill] sm:$0xff] %v4886_v11  ;;  %1842 = vmatpush.msra.mxu0 %v4886_v11  ;;  %v4924_v11 = vld [vmem:[#allocation11] sm:$0xff] }
 0x5f7   :  { %v1567_v0 = vadd.f32 %v1566_v26, %v6104_v2  ;;  %v1586_v63 = vpop.f32.mrf.mxu3  ;;  %6128 = vst [vmem:[#allocation41_spill] sm:$0xff] %v4924_v11 }
 0x5f8   :  { %v1587_v4 = vadd.f32 %v1586_v63, %v6105_v20  ;;  %v4894_v63 = vld [vmem:[#allocation11 + $0x48] sm:$0xff] }
 0x5f9   :  { %v3099_v8 = vmul.f32 -1.442695, %v1567_v0  ;;  %v4892_v0 = vld [vmem:[#allocation11 + $0x40] sm:$0xff]  ;;  %6121 = vst [vmem:[#allocation50_spill] sm:$0xff] %v4894_v63  ;;  %1803 = vmatpush.msrb.mxu2 %v4894_v63  ;;  %v4932_v63 = vld [vmem:[#allocation11 + $0x18] sm:$0xff] }
 0x5fa   :  { %v3100_v19 = vmul.f32 -1.442695, %v1587_v4  ;;  %6120 = vst [vmem:[#allocation35_spill] sm:$0xff] %v4892_v0  ;;  %v4900_v4 = vld [vmem:[#allocation11 + $0x50] sm:$0xff]  ;;  %1783 = vmatpush.msrb.mxu1 %v4892_v0 }
 0x5fb   :  { %v3250_v36 = vpop.eup %3249  ;;  %3251 = vpow2.f32 %v3099_v8  ;;  %6122 = vst [vmem:[#allocation36_spill] sm:$0xff] %v4900_v4  ;;  %v4902_v8 = vld [vmem:[#allocation11 + $0x58] sm:$0xff]  ;;  %1823 = vmatpush.msrb.mxu3 %v4900_v4  ;;  %v4930_v0 = vld [vmem:[#allocation11 + $0x10] sm:$0xff] }
 0x5fc   :  { %v4849_v18 = vadd.f32 1.0, %v3250_v36  ;;  %3253 = vpow2.f32 %v3100_v19  ;;  %6123 = vst [vmem:[#allocation37_spill] sm:$0xff] %v4902_v8  ;;  %v4909_v36 = vld [vmem:[#allocation11 + $0x20] sm:$0xff]  ;;  %1843 = vmatpush.msra.mxu0 %v4902_v8 }
 0x5fd   :  { %6124 = vst [vmem:[#allocation38_spill] sm:$0xff] %v4909_v36  ;;  %1784 = vmatpush.msrb.mxu1 %v4909_v36  ;;  %1824 = vmatpush.msrb.mxu3 %v4918_v10  ;;  %v6132_v4 = vld [vmem:[#allocation75_spill] sm:$0xff] }
 0x5fe   :  { %3255 = vrcp.f32 %v4849_v18  ;;  %6130 = vst [vmem:[#allocation53_spill] sm:$0xff] %v4930_v0  ;;  %1844 = vmatpush.msra.mxu0 %v4920_v41  ;;  %v1607_v31 = vadd.f32 %v1606_v32, %v6132_v4  ;;  %vm1626_vm6 = vweird.f32 %v4849_v18  ;;  %v1630_v4 = vand.u32 2147483647, %v4849_v18 }
 0x5ff   :  { %6131 = vst [vmem:[#allocation54_spill] sm:$0xff] %v4932_v63  ;;  %1785 = vmatpush.msrb.mxu1 %v4924_v11  ;;  %1825 = vmatpush.msrb.mxu3 %v4930_v0 }
 0x600   :  { %1845 = vmatpush.msra.mxu0 %v4932_v63  ;;  %vm1631_vm9 = vcmp.eq.f32.partialorder %v1630_v4, 8.507059e+37 }
 0x601   :  { %v3252_v38 = vpop.eup %3251  ;;  %1930 = vmatpush.msra.mxu1 %v4732_v33  ;;  %1970 = vmatpush.msra.mxu3 %v4736_v50 }
 0x602   :  { %v3254_v26 = vpop.eup %3253  ;;  %v4888_v2 = vadd.f32 1.0, %v3252_v38  ;;  %v4911_v38 = vld [vmem:[#allocation11 + $0x28] sm:$0xff]  ;;  %1990 = vmatpush.msrb.mxu0 %v4740_v54 }
 0x603   :  { %v4896_v20 = vadd.f32 1.0, %v3254_v26  ;;  %6125 = vst [vmem:[#allocation51_spill] sm:$0xff] %v4911_v38  ;;  %1804 = vmatpush.msrb.mxu2 %v4911_v38  ;;  %1931 = vmatpush.msra.mxu1 %v4744_v56 }
 0x604   :  { %v4904_v19 = vpop.eup %3255  ;;  %3257 = vrcp.f32 %v4888_v2  ;;  %v1647_v33 = vand.u32 2147483648, %v4888_v2  ;;  %1971 = vmatpush.msra.mxu3 %v4748_v59  ;;  %1991 = vmatpush.msrb.mxu0 %v4752_v42  ;;  %v1645_v56 = vand.u32 2147483647, %v4888_v2  ;;  %vm1641_vm10 = vweird.f32 %v4888_v2 }
 0x605   :  { %v1622_v26 = vmul.f32 %v4904_v19, %v4849_v18  ;;  %3259 = vrcp.f32 %v4896_v20  ;;  %1805 = vmatpush.msrb.mxu2 %v4926_v43  ;;  %vm1627_vm5 = vweird.f32 %v4904_v19  ;;  %1932 = vmatpush.msra.mxu1 %v4756_v61  ;;  %vm1656_vm14 = vweird.f32 %v4896_v20 }
 0x606   :  { %vm4958_vm7 = vmor %vm1626_vm6, %vm1627_vm5  ;;  %3261 = vtanh.f32 %v1607_v31  ;;  %1972 = vmatpush.msra.mxu3 %v4760_v45  ;;  %1992 = vmatpush.msrb.mxu0 %v4764_v35  ;;  %vm1646_vm12 = vcmp.eq.f32.partialorder %v1645_v56, 8.507059e+37 }
 0x607   :  { %v1623_v37 = vsub.f32 1.0, %v1622_v26  ;;  %1950 = vmatpush.msra.mxu2 %v4734_v46  ;;  %1933 = vmatpush.msra.mxu1 %v4768_v55 }
 0x608   :  { %1973 = vmatpush.msra.mxu3 %v4772_v51  ;;  %1993 = vmatpush.msrb.mxu0 %v4777_v48 }
 0x609   :  { %v1624_v8 = vmul.f32 %v4904_v19, %v1623_v37  ;;  %v1632_v37 = vand.u32 2147483648, %v4849_v18  ;;  %1951 = vmatpush.msra.mxu2 %v4746_v58  ;;  %1934 = vmatpush.msra.mxu1 %v4781_v57 }
 0x60a   :  { %v3258_v26 = vpop.eup %3257  ;;  %1974 = vmatpush.msra.mxu3 %v4785_v9  ;;  %1994 = vmatpush.msrb.mxu0 %v4789_v12 }
 0x60b   :  { %v4942_v38 = vpop.eup %3259  ;;  %v1625_v36 = vadd.f32 %v4904_v19, %v1624_v8  ;;  %v1637_v41 = vmul.f32 %v3258_v26, %v4888_v2  ;;  %vm1642_vm8 = vweird.f32 %v3258_v26  ;;  %1952 = vmatpush.msra.mxu2 %v4758_v62  ;;  %v1633_v58 = vor.u32 1.1754944e-38, %v1632_v37  ;;  %1935 = vmatpush.msra.mxu1 %v4793_v13 }
 0x60c   :  { %v1652_v32 = vmul.f32 %v4942_v38, %v4896_v20  ;;  %vm1643_vm11 = vmor %vm1641_vm10, %vm1642_vm8  ;;  %v3262_v37 = vpop.eup %3261  ;;  %1975 = vmatpush.msra.mxu3 %v4797_v44  ;;  %1995 = vmatpush.msrb.mxu0 %v4801_v40  ;;  %vm1657_vm13 = vweird.f32 %v4942_v38 }
 0x60d   :  { %v1638_v8 = vsub.f32 1.0, %v1637_v41  ;;  %v1629_v18 = vsel %vm4958_vm7, %v4904_v19, %v1625_v36  ;;  %1953 = vmatpush.msra.mxu2 %v4770_v52  ;;  %v1648_v19 = vor.u32 1.1754944e-38, %v1647_v33  ;;  %1936 = vmatpush.msra.mxu1 %v4805_v16  ;;  %vm1658_vm15 = vmor %vm1656_vm14, %vm1657_vm13 }
 0x60e   :  { %v1653_v31 = vsub.f32 1.0, %v1652_v32  ;;  %v1634_v46 = vsel %vm1631_vm9, %v1633_v58, %v1629_v18  ;;  %1976 = vmatpush.msra.mxu3 %v4809_v60  ;;  %1996 = vmatpush.msrb.mxu0 %v4814_v49 }
 0x60f   :  { %v1639_v41 = vmul.f32 %v3258_v26, %v1638_v8  ;;  %1954 = vmatpush.msra.mxu2 %v4783_v5  ;;  %v1668_v58 = vmul.f32 %v3262_v37, %v1634_v46  ;;  %1937 = vmatpush.msra.mxu1 %v4819_v21  ;;  %v6138_v46 = vld [vmem:[#allocation31_spill] sm:$0xff]  ;;  %v6141_v37 = vld [vmem:[#allocation33_spill] sm:$0xff] }
 0x610   :  { %v1654_v2 = vmul.f32 %v4942_v38, %v1653_v31  ;;  %1977 = vmatpush.msra.mxu3 %v4823_v3  ;;  %1997 = vmatpush.msrb.mxu0 %v4827_v17  ;;  %v6137_v31 = vld [vmem:[#allocation30_spill] sm:$0xff] }
 0x611   :  { %v1640_v42 = vadd.f32 %v3258_v26, %v1639_v41  ;;  %1955 = vmatpush.msra.mxu2 %v4795_v15  ;;  %1938 = vmatpush.msra.mxu1 %v4829_v1  ;;  %v6136_v41 = vld [vmem:[#allocation44_spill] sm:$0xff] }
 0x612   :  { %1978 = vmatpush.msra.mxu3 %v4835_v14  ;;  %1998 = vmatpush.msrb.mxu0 %v4837_v53 }
 0x613   :  { %v1644_v36 = vsel %vm1643_vm11, %v3258_v26, %v1640_v42  ;;  %1956 = vmatpush.msra.mxu2 %v4807_v7  ;;  %v1655_v42 = vadd.f32 %v4942_v38, %v1654_v2  ;;  %v1660_v26 = vand.u32 2147483647, %v4896_v20  ;;  %1939 = vmatpush.msra.mxu1 %v4839_v6  ;;  %v6143_v2 = vld [vmem:[#allocation35_spill] sm:$0xff] }
 0x614   :  { %v1649_v32 = vsel %vm1646_vm12, %v1648_v19, %v1644_v36  ;;  %1979 = vmatpush.msra.mxu3 %v4845_v39  ;;  %1999 = vmatpush.msrb.mxu0 %v4847_v22  ;;  %v6139_v19 = vld [vmem:[#allocation32_spill] sm:$0xff]  ;;  %v6140_v36 = vld [vmem:[#allocation49_spill] sm:$0xff] }
 0x615   :  { %v1667_v33 = vmul.f32 %v1649_v32, %v4729_v25  ;;  %v1662_v25 = vand.u32 2147483648, %v4896_v20  ;;  %1957 = vmatpush.msra.mxu2 %v4821_v24  ;;  %v1659_v4 = vsel %vm1658_vm15, %v4942_v38, %v1655_v42  ;;  %vm1661_vm0 = vcmp.eq.f32.partialorder %v1660_v26, 8.507059e+37  ;;  %1940 = vmatpush.msra.mxu1 %v4853_v23  ;;  %v6142_v32 = vld [vmem:[#allocation34_spill] sm:$0xff]  ;;  %v6146_v42 = vld [vmem:[#allocation37_spill] sm:$0xff]  ;;  %v6148_v26 = vld [vmem:[#allocation51_spill] sm:$0xff] }
 0x616   :  { %1980 = vmatpush.msra.mxu3 %v4859_v28  ;;  %2000 = vmatpush.msrb.mxu0 %v4861_v29 }
 0x617   :  { %v4988_v56 = vadd.f32 %v1668_v58, %v1667_v33  ;;  %1958 = vmatpush.msra.mxu2 %v4831_v47  ;;  %v1663_v8 = vor.u32 1.1754944e-38, %v1662_v25  ;;  %1941 = vmatpush.msra.mxu1 %v4866_v30  ;;  %v6144_v58 = vld [vmem:[#allocation50_spill] sm:$0xff]  ;;  %v6145_v33 = vld [vmem:[#allocation36_spill] sm:$0xff] }
 0x618   :  { %1981 = vmatpush.msra.mxu3 %v6137_v31  ;;  %2001 = vmatpush.msrb.mxu0 %v6138_v46  ;;  %v6147_v25 = vld [vmem:[#allocation38_spill] sm:$0xff] }
 0x619   :  { %6135 = vst [vmem:[#allocation55_spill] sm:$0xff] %v4988_v56  ;;  %3263 = vtanh.f32 %v4988_v56  ;;  %1959 = vmatpush.msra.mxu2 %v4843_v34  ;;  %v1664_v18 = vsel %vm1661_vm0, %v1663_v8, %v1659_v4  ;;  %1942 = vmatpush.msra.mxu1 %v6139_v19  ;;  %v6149_v4 = vld [vmem:[#allocation40_spill] sm:$0xff]  ;;  %v6150_v8 = vld [vmem:[#allocation57_spill] sm:$0xff] }
 0x61a   :  { %1673 = vst [vmem:[#allocation4] sm:$0x3] %v4988_v56  ;;  %1982 = vmatpush.msra.mxu3 %v6141_v37  ;;  %2002 = vmatpush.msrb.mxu0 %v6142_v32  ;;  %v6154_v56 = vld [vmem:[#allocation22_spill] sm:$0xff] }
 0x61b   :  { %1960 = vmatpush.msra.mxu2 %v4855_v27  ;;  %1943 = vmatpush.msra.mxu1 %v6143_v2 }
 0x61c   :  { %1983 = vmatpush.msra.mxu3 %v6145_v33  ;;  %2003 = vmatpush.msrb.mxu0 %v6146_v42 }
 0x61d   :  { %1961 = vmatpush.msra.mxu2 %v6136_v41  ;;  %1944 = vmatpush.msra.mxu1 %v6147_v25 }
 0x61e   :  { %1984 = vmatpush.msra.mxu3 %v4918_v10  ;;  %2004 = vmatpush.msrb.mxu0 %v6149_v4 }
 0x61f   :  { %v3264_v20 = vpop.eup %3263  ;;  %1962 = vmatpush.msra.mxu2 %v6140_v36  ;;  %1945 = vmatpush.msra.mxu1 %v4924_v11 }
 0x620   :  { %v1671_v38 = vmul.f32 %v3264_v20, %v1664_v18  ;;  %1985 = vmatpush.msra.mxu3 %v4930_v0  ;;  %2005 = vmatpush.msrb.mxu0 %v4932_v63  ;;  %v6151_v20 = vld [vmem:[#allocation58_spill] sm:$0xff]  ;;  %v6152_v18 = vld [vmem:[#allocation59_spill] sm:$0xff] }
 0x621   :  { %1963 = vmatpush.msra.mxu2 %v6144_v58 }
 0x622   :  { %1672 = vst [vmem:[#allocation3] sm:$0x3] %v1671_v38  ;;  %1786 = vmatmul.f32.vlgmr.msrb.gmra.mxu1 %v1671_v38  ;;  %1806 = vmatmul.f32.vlgmr.msrb.gmra.mxu2 %v1671_v38 }
 0x623   :  { %1826 = vmatmul.f32.vlgmr.msrb.gmra.mxu3 %v1671_v38  ;;  %1846 = vmatmul.f32.vlgmr.msra.gmra.mxu0 %v1671_v38  ;;  %v6153_v38 = vld [vmem:[#allocation60_spill] sm:$0xff] }
 0x624   :  { %1964 = vmatpush.msra.mxu2 %v6148_v26  ;;  %2090 = vmatpush.msrb.mxu1 %v6150_v8 }
 0x625   :  { %2130 = vmatpush.msrb.mxu3 %v4736_v50  ;;  %2150 = vmatpush.msra.mxu0 %v4740_v54 }
 0x626   :  { %1965 = vmatpush.msra.mxu2 %v4926_v43  ;;  %2091 = vmatpush.msrb.mxu1 %v6152_v18 }
 0x627   :  { %2131 = vmatpush.msrb.mxu3 %v4748_v59  ;;  %2151 = vmatpush.msra.mxu0 %v6154_v56 }
 0x628   :  { %2110 = vmatpush.msrb.mxu2 %v6151_v20  ;;  %2092 = vmatpush.msrb.mxu1 %v4756_v61 }
 0x629   :  { %2132 = vmatpush.msrb.mxu3 %v4760_v45  ;;  %2152 = vmatpush.msra.mxu0 %v4764_v35 }
 0x62a   :  { %2111 = vmatpush.msrb.mxu2 %v6153_v38  ;;  %2093 = vmatpush.msrb.mxu1 %v4768_v55 }
 0x62b   :  { %2133 = vmatpush.msrb.mxu3 %v4772_v51  ;;  %2153 = vmatpush.msra.mxu0 %v4777_v48 }
 0x62c   :  { %2112 = vmatpush.msrb.mxu2 %v4758_v62  ;;  %2094 = vmatpush.msrb.mxu1 %v4781_v57 }
 0x62d   :  { %2134 = vmatpush.msrb.mxu3 %v4785_v9  ;;  %2154 = vmatpush.msra.mxu0 %v4789_v12 }
 0x62e   :  { %2113 = vmatpush.msrb.mxu2 %v4770_v52  ;;  %2095 = vmatpush.msrb.mxu1 %v4793_v13 }
 0x62f   :  { %2135 = vmatpush.msrb.mxu3 %v4797_v44  ;;  %2155 = vmatpush.msra.mxu0 %v4801_v40 }
 0x630   :  { %2114 = vmatpush.msrb.mxu2 %v4783_v5  ;;  %2096 = vmatpush.msrb.mxu1 %v4805_v16 }
 0x631   :  { %2136 = vmatpush.msrb.mxu3 %v4809_v60  ;;  %2156 = vmatpush.msra.mxu0 %v4814_v49 }
 0x632   :  { %2115 = vmatpush.msrb.mxu2 %v4795_v15  ;;  %2097 = vmatpush.msrb.mxu1 %v4819_v21 }
 0x633   :  { %2137 = vmatpush.msrb.mxu3 %v4823_v3  ;;  %2157 = vmatpush.msra.mxu0 %v4827_v17 }
 0x634   :  { %2116 = vmatpush.msrb.mxu2 %v4807_v7  ;;  %2098 = vmatpush.msrb.mxu1 %v4829_v1 }
 0x635   :  { %2138 = vmatpush.msrb.mxu3 %v4835_v14  ;;  %2158 = vmatpush.msra.mxu0 %v4837_v53 }
 0x636   :  { %2117 = vmatpush.msrb.mxu2 %v4821_v24  ;;  %2099 = vmatpush.msrb.mxu1 %v4839_v6 }
 0x637   :  { %2139 = vmatpush.msrb.mxu3 %v4845_v39  ;;  %2159 = vmatpush.msra.mxu0 %v4847_v22 }
 0x638   :  { %2118 = vmatpush.msrb.mxu2 %v4831_v47  ;;  %2100 = vmatpush.msrb.mxu1 %v4853_v23 }
 0x639   :  { %2140 = vmatpush.msrb.mxu3 %v4859_v28  ;;  %2160 = vmatpush.msra.mxu0 %v4861_v29 }
 0x63a   :  { %2119 = vmatpush.msrb.mxu2 %v4843_v34  ;;  %2101 = vmatpush.msrb.mxu1 %v4866_v30 }
 0x63b   :  { %2141 = vmatpush.msrb.mxu3 %v6137_v31  ;;  %2161 = vmatpush.msra.mxu0 %v6138_v46 }
 0x63c   :  { %2120 = vmatpush.msrb.mxu2 %v4855_v27  ;;  %2102 = vmatpush.msrb.mxu1 %v6139_v19 }
 0x63d   :  { %2142 = vmatpush.msrb.mxu3 %v6141_v37  ;;  %2162 = vmatpush.msra.mxu0 %v6142_v32  ;;  %v6156_v32 = vld [vmem:[#allocation48_spill] sm:$0xff] }
 0x63e   :  { %2121 = vmatpush.msrb.mxu2 %v6136_v41  ;;  %2103 = vmatpush.msrb.mxu1 %v6143_v2 }
 0x63f   :  { %2143 = vmatpush.msrb.mxu3 %v6145_v33  ;;  %2163 = vmatpush.msra.mxu0 %v6146_v42  ;;  %v6155_v33 = vld [vmem:[#allocation46_spill] sm:$0xff] }
 0x640   :  { %2122 = vmatpush.msrb.mxu2 %v6140_v36  ;;  %2104 = vmatpush.msrb.mxu1 %v6147_v25 }
 0x641   :  { %2144 = vmatpush.msrb.mxu3 %v4918_v10  ;;  %2164 = vmatpush.msra.mxu0 %v6149_v4  ;;  %v6157_v10 = vld [vmem:[#allocation78_spill] sm:$0xff] }
 0x642   :  { %2123 = vmatpush.msrb.mxu2 %v6144_v58  ;;  %2105 = vmatpush.msrb.mxu1 %v4924_v11 }
 0x643   :  { %2145 = vmatpush.msrb.mxu3 %v4930_v0  ;;  %2165 = vmatpush.msra.mxu0 %v4932_v63 }
 0x644   :  { %2124 = vmatpush.msrb.mxu2 %v6148_v26 }
 0x646   :  { %2125 = vmatpush.msrb.mxu2 %v4926_v43 }
 0x69f   :  { %v1787_v58 = vpop.f32.mrf.mxu1 }
 0x6a0   :  { %v1788_v2 = vadd.f32 %v1787_v58, %v6155_v33 }
 0x6a2   :  { %v3101_v42 = vmul.f32 -1.442695, %v1788_v2 }
 0x6a4   :  { %3265 = vpow2.f32 %v3101_v42 }
 0x6a5   :  { %v1807_v25 = vpop.f32.mrf.mxu2 }
 0x6a6   :  { %v1808_v26 = vadd.f32 %v1807_v25, %v6156_v32  ;;  %v1827_v37 = vpop.f32.mrf.mxu3  ;;  %v1847_v32 = vpop.f32.mrf.mxu0 }
 0x6a7   :  { %v1828_v36 = vadd.f32 %v1827_v37, %v6157_v10  ;;  %v6158_v10 = vld [vmem:[#allocation47_spill] sm:$0xff] }
 0x6a8   :  { %v3102_v4 = vmul.f32 -1.442695, %v1808_v26  ;;  %v1848_v37 = vadd.f32 %v1847_v32, %v6158_v10 }
 0x6a9   :  { %v3103_v19 = vmul.f32 -1.442695, %v1828_v36 }
 0x6aa   :  { %v3266_v11 = vpop.eup %3265  ;;  %3267 = vpow2.f32 %v3102_v4 }
 0x6ab   :  { %v1859_v43 = vadd.f32 1.0, %v3266_v11  ;;  %3269 = vpow2.f32 %v3103_v19 }
 0x6ad   :  { %3271 = vrcp.f32 %v1859_v43  ;;  %v1873_v19 = vand.u32 2147483648, %v1859_v43  ;;  %vm1867_vm2 = vweird.f32 %v1859_v43  ;;  %v1871_v41 = vand.u32 2147483647, %v1859_v43 }
 0x6af   :  { %vm1872_vm5 = vcmp.eq.f32.partialorder %v1871_v41, 8.507059e+37 }
 0x6b0   :  { %v3268_v0 = vpop.eup %3267 }
 0x6b1   :  { %v3270_v63 = vpop.eup %3269  ;;  %v1860_v46 = vadd.f32 1.0, %v3268_v0 }
 0x6b2   :  { %v1861_v31 = vadd.f32 1.0, %v3270_v63 }
 0x6b3   :  { %v3272_v58 = vpop.eup %3271  ;;  %3273 = vrcp.f32 %v1860_v46  ;;  %v1888_v63 = vand.u32 2147483648, %v1860_v46  ;;  %vm1882_vm6 = vweird.f32 %v1860_v46 }
 0x6b4   :  { %v1863_v2 = vmul.f32 %v3272_v58, %v1859_v43  ;;  %3275 = vrcp.f32 %v1861_v31  ;;  %vm1868_vm1 = vweird.f32 %v3272_v58  ;;  %vm1897_vm10 = vweird.f32 %v1861_v31 }
 0x6b5   :  { %vm1869_vm3 = vmor %vm1867_vm2, %vm1868_vm1  ;;  %3277 = vtanh.f32 %v1848_v37  ;;  %v1889_v10 = vor.u32 1.1754944e-38, %v1888_v63  ;;  %v6159_v37 = vld [vmem:[#allocation55_spill] sm:$0xff] }
 0x6b6   :  { %v1864_v33 = vsub.f32 1.0, %v1863_v2  ;;  %v1886_v2 = vand.u32 2147483647, %v1860_v46 }
 0x6b8   :  { %v1865_v42 = vmul.f32 %v3272_v58, %v1864_v33  ;;  %v1874_v33 = vor.u32 1.1754944e-38, %v1873_v19  ;;  %vm1887_vm8 = vcmp.eq.f32.partialorder %v1886_v2, 8.507059e+37  ;;  %v1903_v19 = vand.u32 2147483648, %v1861_v31 }
 0x6b9   :  { %v3274_v25 = vpop.eup %3273 }
 0x6ba   :  { %v3276_v36 = vpop.eup %3275  ;;  %v1866_v26 = vadd.f32 %v3272_v58, %v1865_v42  ;;  %v1878_v11 = vmul.f32 %v3274_v25, %v1860_v46  ;;  %vm1883_vm4 = vweird.f32 %v3274_v25  ;;  %v1904_v41 = vor.u32 1.1754944e-38, %v1903_v19 }
 0x6bb   :  { %v1893_v4 = vmul.f32 %v3276_v36, %v1861_v31  ;;  %vm1884_vm7 = vmor %vm1882_vm6, %vm1883_vm4  ;;  %v3278_v23 = vpop.eup %3277  ;;  %vm1898_vm9 = vweird.f32 %v3276_v36 }
 0x6bc   :  { %v1879_v0 = vsub.f32 1.0, %v1878_v11  ;;  %v1870_v30 = vsel %vm1869_vm3, %v3272_v58, %v1866_v26  ;;  %vm1899_vm11 = vmor %vm1897_vm10, %vm1898_vm9 }
 0x6bd   :  { %v1894_v28 = vsub.f32 1.0, %v1893_v4  ;;  %v1875_v42 = vsel %vm1872_vm5, %v1874_v33, %v1870_v30 }
 0x6be   :  { %v1880_v29 = vmul.f32 %v3274_v25, %v1879_v0  ;;  %v1909_v22 = vmul.f32 %v3278_v23, %v1875_v42  ;;  %v6187_v23 = vld [vmem:[#allocation81_spill] sm:$0xff] }
 0x6bf   :  { %v1895_v11 = vmul.f32 %v3276_v36, %v1894_v28 }
 0x6c0   :  { %v1881_v32 = vadd.f32 %v3274_v25, %v1880_v29  ;;  %v1901_v29 = vand.u32 2147483647, %v1861_v31  ;;  %v6188_v31 = vld [vmem:[#allocation82_spill] sm:$0xff] }
 0x6c1   :  { %v1896_v26 = vadd.f32 %v3276_v36, %v1895_v11 }
 0x6c2   :  { %v1885_v27 = vsel %vm1884_vm7, %v3274_v25, %v1881_v32  ;;  %vm1902_vm12 = vcmp.eq.f32.partialorder %v1901_v29, 8.507059e+37 }
 0x6c3   :  { %v1890_v43 = vsel %vm1887_vm8, %v1889_v10, %v1885_v27  ;;  %v1900_v30 = vsel %vm1899_vm11, %v3276_v36, %v1896_v26 }
 0x6c4   :  { %v1908_v39 = vmul.f32 %v1890_v43, %v6159_v37  ;;  %v1905_v25 = vsel %vm1902_vm12, %v1904_v41, %v1900_v30  ;;  %v6189_v37 = vld [vmem:[#allocation80_spill] sm:$0xff] }
 0x6c6   :  { %v5107_v58 = vadd.f32 %v1909_v22, %v1908_v39 }
 0x6c8   :  { %3279 = vtanh.f32 %v5107_v58 }
 0x6ce   :  { %v3280_v46 = vpop.eup %3279 }
 0x6cf   :  { %v1912_v27 = vmul.f32 %v3280_v46, %v1905_v25 }
 0x6d1   :  { %1946 = vmatmul.f32.vlgmr.msra.gmra.mxu1 %v1912_v27  ;;  %1966 = vmatmul.f32.vlgmr.msra.gmra.mxu2 %v1912_v27 }
 0x6d2   :  { %1986 = vmatmul.f32.vlgmr.msra.gmra.mxu3 %v1912_v27  ;;  %2006 = vmatmul.f32.vlgmr.msrb.gmra.mxu0 %v1912_v27 }
 0x6d3   :  { %2250 = vmatpush.msra.mxu1 %v6150_v8  ;;  %2270 = vmatpush.msra.mxu2 %v6151_v20 }
 0x6d4   :  { %2290 = vmatpush.msra.mxu3 %v4736_v50  ;;  %2310 = vmatpush.msrb.mxu0 %v4740_v54  ;;  %v6160_v50 = vld [vmem:[#allocation61_spill] sm:$0xff]  ;;  %v6161_v54 = vld [vmem:[#allocation62_spill] sm:$0xff] }
 0x6d5   :  { %2251 = vmatpush.msra.mxu1 %v6152_v18  ;;  %2271 = vmatpush.msra.mxu2 %v6153_v38 }
 0x6d6   :  { %2291 = vmatpush.msra.mxu3 %v4748_v59  ;;  %2311 = vmatpush.msrb.mxu0 %v6154_v56  ;;  %v6162_v59 = vld [vmem:[#allocation23_spill] sm:$0xff] }
 0x6d7   :  { %2252 = vmatpush.msra.mxu1 %v4756_v61  ;;  %2272 = vmatpush.msra.mxu2 %v4758_v62  ;;  %v6163_v61 = vld [vmem:[#allocation63_spill] sm:$0xff]  ;;  %v6164_v62 = vld [vmem:[#allocation65_spill] sm:$0xff] }
 0x6d8   :  { %2292 = vmatpush.msra.mxu3 %v4760_v45  ;;  %2312 = vmatpush.msrb.mxu0 %v4764_v35  ;;  %v6165_v45 = vld [vmem:[#allocation66_spill] sm:$0xff]  ;;  %v6166_v35 = vld [vmem:[#allocation64_spill] sm:$0xff] }
 0x6d9   :  { %2253 = vmatpush.msra.mxu1 %v4768_v55  ;;  %2273 = vmatpush.msra.mxu2 %v4770_v52  ;;  %v6167_v55 = vld [vmem:[#allocation44_spill] sm:$0xff]  ;;  %v6168_v52 = vld [vmem:[#allocation30_spill] sm:$0xff] }
 0x6da   :  { %2293 = vmatpush.msra.mxu3 %v4772_v51  ;;  %2313 = vmatpush.msrb.mxu0 %v4777_v48  ;;  %v6169_v51 = vld [vmem:[#allocation31_spill] sm:$0xff]  ;;  %v6170_v48 = vld [vmem:[#allocation32_spill] sm:$0xff] }
 0x6db   :  { %2254 = vmatpush.msra.mxu1 %v4781_v57  ;;  %2274 = vmatpush.msra.mxu2 %v4783_v5  ;;  %v6171_v57 = vld [vmem:[#allocation49_spill] sm:$0xff] }
 0x6dc   :  { %2294 = vmatpush.msra.mxu3 %v4785_v9  ;;  %2314 = vmatpush.msrb.mxu0 %v4789_v12  ;;  %v6172_v5 = vld [vmem:[#allocation33_spill] sm:$0xff]  ;;  %v6173_v9 = vld [vmem:[#allocation34_spill] sm:$0xff]  ;;  %v6174_v12 = vld [vmem:[#allocation35_spill] sm:$0xff] }
 0x6dd   :  { %2255 = vmatpush.msra.mxu1 %v4793_v13  ;;  %2275 = vmatpush.msra.mxu2 %v4795_v15  ;;  %v6175_v13 = vld [vmem:[#allocation50_spill] sm:$0xff]  ;;  %v6176_v15 = vld [vmem:[#allocation36_spill] sm:$0xff] }
 0x6de   :  { %2295 = vmatpush.msra.mxu3 %v4797_v44  ;;  %2315 = vmatpush.msrb.mxu0 %v4801_v40  ;;  %v6177_v44 = vld [vmem:[#allocation37_spill] sm:$0xff]  ;;  %v6178_v40 = vld [vmem:[#allocation38_spill] sm:$0xff] }
 0x6df   :  { %2256 = vmatpush.msra.mxu1 %v4805_v16  ;;  %2276 = vmatpush.msra.mxu2 %v4807_v7  ;;  %v6179_v16 = vld [vmem:[#allocation51_spill] sm:$0xff] }
 0x6e0   :  { %2296 = vmatpush.msra.mxu3 %v4809_v60  ;;  %2316 = vmatpush.msrb.mxu0 %v4814_v49  ;;  %v6180_v7 = vld [vmem:[#allocation39_spill] sm:$0xff]  ;;  %v6181_v60 = vld [vmem:[#allocation40_spill] sm:$0xff]  ;;  %v6182_v49 = vld [vmem:[#allocation41_spill] sm:$0xff] }
 0x6e1   :  { %2257 = vmatpush.msra.mxu1 %v4819_v21  ;;  %2277 = vmatpush.msra.mxu2 %v4821_v24  ;;  %v6183_v21 = vld [vmem:[#allocation52_spill] sm:$0xff]  ;;  %v6184_v24 = vld [vmem:[#allocation53_spill] sm:$0xff] }
 0x6e2   :  { %2297 = vmatpush.msra.mxu3 %v4823_v3  ;;  %2317 = vmatpush.msrb.mxu0 %v4827_v17  ;;  %v6185_v3 = vld [vmem:[#allocation54_spill] sm:$0xff] }
 0x6e3   :  { %2258 = vmatpush.msra.mxu1 %v4829_v1  ;;  %2278 = vmatpush.msra.mxu2 %v4831_v47  ;;  %v6186_v1 = vld [vmem:[#allocation79_spill] sm:$0xff] }
 0x6e4   :  { %2298 = vmatpush.msra.mxu3 %v4835_v14  ;;  %2318 = vmatpush.msrb.mxu0 %v4837_v53 }
 0x6e5   :  { %2259 = vmatpush.msra.mxu1 %v4839_v6  ;;  %2279 = vmatpush.msra.mxu2 %v4843_v34 }
 0x6e6   :  { %2299 = vmatpush.msra.mxu3 %v6160_v50  ;;  %2319 = vmatpush.msrb.mxu0 %v6161_v54 }
 0x6e7   :  { %2260 = vmatpush.msra.mxu1 %v6162_v59  ;;  %2280 = vmatpush.msra.mxu2 %v6163_v61 }
 0x6e8   :  { %2300 = vmatpush.msra.mxu3 %v6164_v62  ;;  %2320 = vmatpush.msrb.mxu0 %v6165_v45 }
 0x6e9   :  { %2261 = vmatpush.msra.mxu1 %v6166_v35  ;;  %2281 = vmatpush.msra.mxu2 %v6167_v55 }
 0x6ea   :  { %2301 = vmatpush.msra.mxu3 %v6168_v52  ;;  %2321 = vmatpush.msrb.mxu0 %v6169_v51 }
 0x6eb   :  { %2262 = vmatpush.msra.mxu1 %v6170_v48  ;;  %2282 = vmatpush.msra.mxu2 %v6171_v57 }
 0x6ec   :  { %2302 = vmatpush.msra.mxu3 %v6172_v5  ;;  %2322 = vmatpush.msrb.mxu0 %v6173_v9 }
 0x6ed   :  { %2263 = vmatpush.msra.mxu1 %v6174_v12  ;;  %2283 = vmatpush.msra.mxu2 %v6175_v13 }
 0x6ee   :  { %2303 = vmatpush.msra.mxu3 %v6176_v15  ;;  %2323 = vmatpush.msrb.mxu0 %v6177_v44 }
 0x6ef   :  { %2264 = vmatpush.msra.mxu1 %v6178_v40  ;;  %2284 = vmatpush.msra.mxu2 %v6179_v16 }
 0x6f0   :  { %2304 = vmatpush.msra.mxu3 %v6180_v7  ;;  %2324 = vmatpush.msrb.mxu0 %v6181_v60 }
 0x6f1   :  { %2265 = vmatpush.msra.mxu1 %v6182_v49  ;;  %2285 = vmatpush.msra.mxu2 %v6183_v21 }
 0x6f2   :  { %2305 = vmatpush.msra.mxu3 %v6184_v24  ;;  %2325 = vmatpush.msrb.mxu0 %v6185_v3 }
 0x74e   :  { %v1947_v17 = vpop.f32.mrf.mxu1 }
 0x74f   :  { %v1948_v47 = vadd.f32 %v1947_v17, %v6186_v1  ;;  %v2007_v10 = vpop.f32.mrf.mxu0 }
 0x750   :  { %v2008_v26 = vadd.f32 %v2007_v10, %v6189_v37 }
 0x751   :  { %v3104_v39 = vmul.f32 -1.442695, %v1948_v47 }
 0x753   :  { %3281 = vpow2.f32 %v3104_v39 }
 0x754   :  { %v1967_v22 = vpop.f32.mrf.mxu2 }
 0x755   :  { %v1968_v28 = vadd.f32 %v1967_v22, %v6187_v23  ;;  %v1987_v56 = vpop.f32.mrf.mxu3 }
 0x756   :  { %v1988_v8 = vadd.f32 %v1987_v56, %v6188_v31 }
 0x757   :  { %v3105_v20 = vmul.f32 -1.442695, %v1968_v28 }
 0x758   :  { %v3106_v18 = vmul.f32 -1.442695, %v1988_v8 }
 0x759   :  { %v3282_v38 = vpop.eup %3281  ;;  %3283 = vpow2.f32 %v3105_v20 }
 0x75a   :  { %v2019_v36 = vadd.f32 1.0, %v3282_v38  ;;  %3285 = vpow2.f32 %v3106_v18 }
 0x75c   :  { %3287 = vrcp.f32 %v2019_v36  ;;  %v2033_v41 = vand.u32 2147483648, %v2019_v36  ;;  %vm2027_vm14 = vweird.f32 %v2019_v36  ;;  %v2031_v25 = vand.u32 2147483647, %v2019_v36 }
 0x75e   :  { %v2034_v22 = vor.u32 1.1754944e-38, %v2033_v41  ;;  %vm2032_vm1 = vcmp.eq.f32.partialorder %v2031_v25, 8.507059e+37  ;;  %v5200_v41 = vld [vmem:[#allocation11 + $0x1d0] sm:$0xff]  ;;  %v5206_v25 = vld [vmem:[#allocation11 + $0x1a0] sm:$0xff] }
 0x75f   :  { %v3284_v4 = vpop.eup %3283 }
 0x760   :  { %v3286_v0 = vpop.eup %3285  ;;  %v2020_v63 = vadd.f32 1.0, %v3284_v4 }
 0x761   :  { %v2021_v2 = vadd.f32 1.0, %v3286_v0 }
 0x762   :  { %v3288_v33 = vpop.eup %3287  ;;  %3289 = vrcp.f32 %v2020_v63  ;;  %v2048_v17 = vand.u32 2147483648, %v2020_v63  ;;  %v2046_v39 = vand.u32 2147483647, %v2020_v63  ;;  %vm2042_vm2 = vweird.f32 %v2020_v63 }
 0x763   :  { %v2023_v32 = vmul.f32 %v3288_v33, %v2019_v36  ;;  %3291 = vrcp.f32 %v2021_v2  ;;  %vm2028_vm13 = vweird.f32 %v3288_v33  ;;  %vm2057_vm6 = vweird.f32 %v2021_v2 }
 0x764   :  { %vm2029_vm15 = vmor %vm2027_vm14, %vm2028_vm13  ;;  %3293 = vtanh.f32 %v2008_v26  ;;  %v2049_v31 = vor.u32 1.1754944e-38, %v2048_v17  ;;  %vm2047_vm4 = vcmp.eq.f32.partialorder %v2046_v39, 8.507059e+37  ;;  %v5185_v26 = vld [vmem:[#allocation11 + $0x1e8] sm:$0xff]  ;;  %v5212_v17 = vld [vmem:[#allocation11 + $0x1b0] sm:$0xff] }
 0x765   :  { %v2024_v42 = vsub.f32 1.0, %v2023_v32  ;;  %v2063_v32 = vand.u32 2147483648, %v2021_v2  ;;  %v5221_v39 = vld [vmem:[#allocation11 + $0x188] sm:$0xff] }
 0x767   :  { %v2025_v43 = vmul.f32 %v3288_v33, %v2024_v42  ;;  %v2064_v10 = vor.u32 1.1754944e-38, %v2063_v32  ;;  %v5260_v32 = vld [vmem:[#allocation11 + $0x130] sm:$0xff] }
 0x768   :  { %v3290_v11 = vpop.eup %3289 }
 0x769   :  { %v3292_v19 = vpop.eup %3291  ;;  %v2026_v29 = vadd.f32 %v3288_v33, %v2025_v43  ;;  %v2038_v30 = vmul.f32 %v3290_v11, %v2020_v63  ;;  %vm2043_vm0 = vweird.f32 %v3290_v11  ;;  %v2061_v63 = vand.u32 2147483647, %v2021_v2 }
 0x76a   :  { %v2053_v46 = vmul.f32 %v3292_v19, %v2021_v2  ;;  %vm2044_vm3 = vmor %vm2042_vm2, %vm2043_vm0  ;;  %v3294_v20 = vpop.eup %3293  ;;  %vm2058_vm5 = vweird.f32 %v3292_v19  ;;  %v5188_v2 = vld [vmem:[#allocation11 + $0x1f0] sm:$0xff] }
 0x76b   :  { %v2039_v27 = vsub.f32 1.0, %v2038_v30  ;;  %v2030_v1 = vsel %vm2029_vm15, %v3288_v33, %v2026_v29  ;;  %vm2059_vm7 = vmor %vm2057_vm6, %vm2058_vm5  ;;  %vm2062_vm8 = vcmp.eq.f32.partialorder %v2061_v63, 8.507059e+37  ;;  %v5194_v29 = vld [vmem:[#allocation11 + $0x1c0] sm:$0xff]  ;;  %v5197_v30 = vld [vmem:[#allocation11 + $0x1c8] sm:$0xff] }
 0x76c   :  { %v2054_v23 = vsub.f32 1.0, %v2053_v46  ;;  %v2035_v56 = vsel %vm2032_vm1, %v2034_v22, %v2030_v1  ;;  %v5203_v46 = vld [vmem:[#allocation11 + $0x1d8] sm:$0xff]  ;;  %v5224_v22 = vld [vmem:[#allocation11 + $0x190] sm:$0xff] }
 0x76d   :  { %v2040_v47 = vmul.f32 %v3290_v11, %v2039_v27  ;;  %v2069_v36 = vmul.f32 %v3294_v20, %v2035_v56  ;;  %v5209_v27 = vld [vmem:[#allocation11 + $0x1a8] sm:$0xff]  ;;  %v5215_v1 = vld [vmem:[#allocation11 + $0x1b8] sm:$0xff]  ;;  %v5242_v20 = vld [vmem:[#allocation11 + $0x140] sm:$0xff] }
 0x76e   :  { %v2055_v38 = vmul.f32 %v3292_v19, %v2054_v23  ;;  %v5227_v23 = vld [vmem:[#allocation11 + $0x198] sm:$0xff]  ;;  %v5233_v56 = vld [vmem:[#allocation11 + $0x168] sm:$0xff] }
 0x76f   :  { %v2041_v28 = vadd.f32 %v3290_v11, %v2040_v47  ;;  %v5218_v47 = vld [vmem:[#allocation11 + $0x180] sm:$0xff]  ;;  %v5263_v63 = vld [vmem:[#allocation11 + $0x138] sm:$0xff] }
 0x770   :  { %v2056_v33 = vadd.f32 %v3292_v19, %v2055_v38  ;;  %v5248_v38 = vld [vmem:[#allocation11 + $0x150] sm:$0xff]  ;;  %6190 = vst [vmem:[#allocation56_spill] sm:$0xff] %v5263_v63 }
 0x771   :  { %v2045_v8 = vsel %vm2044_vm3, %v3290_v11, %v2041_v28  ;;  %v5230_v28 = vld [vmem:[#allocation11 + $0x160] sm:$0xff] }
 0x772   :  { %v2050_v18 = vsel %vm2047_vm4, %v2049_v31, %v2045_v8  ;;  %v2060_v42 = vsel %vm2059_vm7, %v3292_v19, %v2056_v33  ;;  %v5191_v19 = vld [vmem:[#allocation11 + $0x1f8] sm:$0xff]  ;;  %v5236_v31 = vld [vmem:[#allocation11 + $0x170] sm:$0xff]  ;;  %v5257_v33 = vld [vmem:[#allocation11 + $0x128] sm:$0xff] }
 0x773   :  { %v2068_v4 = vmul.f32 %v2050_v18, %v5107_v58  ;;  %v2065_v11 = vsel %vm2062_vm8, %v2064_v10, %v2060_v42  ;;  %v5182_v58 = vld [vmem:[#allocation11 + $0x1e0] sm:$0xff]  ;;  %v5239_v8 = vld [vmem:[#allocation11 + $0x178] sm:$0xff]  ;;  %v5245_v18 = vld [vmem:[#allocation11 + $0x148] sm:$0xff] }
 0x774   :  { %v5266_v42 = vld [vmem:[#allocation11 + $0x100] sm:$0xff]  ;;  %v5269_v10 = vld [vmem:[#allocation11 + $0x108] sm:$0xff] }
 0x775   :  { %v5179_v0 = vadd.f32 %v2069_v36, %v2068_v4  ;;  %v5251_v36 = vld [vmem:[#allocation11 + $0x158] sm:$0xff]  ;;  %v5254_v4 = vld [vmem:[#allocation11 + $0x120] sm:$0xff] }
 0x777   :  { %3295 = vtanh.f32 %v5179_v0 }
 0x77d   :  { %v3296_v43 = vpop.eup %3295 }
 0x77e   :  { %v2072_v37 = vmul.f32 %v3296_v43, %v2065_v11  ;;  %v5272_v43 = vld [vmem:[#allocation11 + $0x110] sm:$0xff]  ;;  %v5275_v11 = vld [vmem:[#allocation11 + $0x118] sm:$0xff] }
 0x780   :  { %2106 = vmatmul.f32.vlgmr.msrb.gmra.mxu1 %v2072_v37  ;;  %2126 = vmatmul.f32.vlgmr.msrb.gmra.mxu2 %v2072_v37 }
 0x781   :  { %2146 = vmatmul.f32.vlgmr.msrb.gmra.mxu3 %v2072_v37  ;;  %2166 = vmatmul.f32.vlgmr.msra.gmra.mxu0 %v2072_v37  ;;  %v5278_v37 = vld [vmem:[#allocation11 + $0xe0] sm:$0xff] }
 0x782   :  { %2410 = vmatpush.msrb.mxu1 %v5182_v58  ;;  %2430 = vmatpush.msrb.mxu2 %v5185_v26 }
 0x783   :  { %2450 = vmatpush.msrb.mxu3 %v5188_v2  ;;  %2470 = vmatpush.msra.mxu0 %v5191_v19 }
 0x784   :  { %2411 = vmatpush.msrb.mxu1 %v5194_v29  ;;  %2431 = vmatpush.msrb.mxu2 %v5197_v30 }
 0x785   :  { %2451 = vmatpush.msrb.mxu3 %v5200_v41  ;;  %2471 = vmatpush.msra.mxu0 %v5203_v46 }
 0x786   :  { %2412 = vmatpush.msrb.mxu1 %v5206_v25  ;;  %2432 = vmatpush.msrb.mxu2 %v5209_v27 }
 0x787   :  { %2452 = vmatpush.msrb.mxu3 %v5212_v17  ;;  %2472 = vmatpush.msra.mxu0 %v5215_v1 }
 0x788   :  { %2413 = vmatpush.msrb.mxu1 %v5218_v47  ;;  %2433 = vmatpush.msrb.mxu2 %v5221_v39 }
 0x789   :  { %2453 = vmatpush.msrb.mxu3 %v5224_v22  ;;  %2473 = vmatpush.msra.mxu0 %v5227_v23 }
 0x78a   :  { %2414 = vmatpush.msrb.mxu1 %v5230_v28  ;;  %2434 = vmatpush.msrb.mxu2 %v5233_v56 }
 0x78b   :  { %2454 = vmatpush.msrb.mxu3 %v5236_v31  ;;  %2474 = vmatpush.msra.mxu0 %v5239_v8 }
 0x78c   :  { %2415 = vmatpush.msrb.mxu1 %v5242_v20  ;;  %2435 = vmatpush.msrb.mxu2 %v5245_v18 }
 0x78d   :  { %2455 = vmatpush.msrb.mxu3 %v5248_v38  ;;  %2475 = vmatpush.msra.mxu0 %v5251_v36 }
 0x78e   :  { %2416 = vmatpush.msrb.mxu1 %v5254_v4  ;;  %2436 = vmatpush.msrb.mxu2 %v5257_v33 }
 0x78f   :  { %2456 = vmatpush.msrb.mxu3 %v5260_v32  ;;  %2476 = vmatpush.msra.mxu0 %v5263_v63  ;;  %v5281_v63 = vld [vmem:[#allocation11 + $0xe8] sm:$0xff] }
 0x790   :  { %2417 = vmatpush.msrb.mxu1 %v5266_v42  ;;  %2437 = vmatpush.msrb.mxu2 %v5269_v10 }
 0x791   :  { %2457 = vmatpush.msrb.mxu3 %v5272_v43  ;;  %2477 = vmatpush.msra.mxu0 %v5275_v11 }
 0x792   :  { %2418 = vmatpush.msrb.mxu1 %v5278_v37  ;;  %2438 = vmatpush.msrb.mxu2 %v5281_v63 }
 0x793   :  { %2458 = vmatpush.msrb.mxu3 %v4835_v14  ;;  %2478 = vmatpush.msra.mxu0 %v4837_v53  ;;  %v6191_v53 = vld [vmem:[#allocation83_spill] sm:$0xff] }
 0x794   :  { %2419 = vmatpush.msrb.mxu1 %v4839_v6  ;;  %2439 = vmatpush.msrb.mxu2 %v4843_v34 }
 0x795   :  { %2459 = vmatpush.msrb.mxu3 %v6160_v50  ;;  %2479 = vmatpush.msra.mxu0 %v6161_v54  ;;  %v6192_v54 = vld [vmem:[#allocation85_spill] sm:$0xff] }
 0x796   :  { %2420 = vmatpush.msrb.mxu1 %v6162_v59  ;;  %2440 = vmatpush.msrb.mxu2 %v6163_v61 }
 0x797   :  { %2460 = vmatpush.msrb.mxu3 %v6164_v62  ;;  %2480 = vmatpush.msra.mxu0 %v6165_v45  ;;  %v6193_v62 = vld [vmem:[#allocation86_spill] sm:$0xff] }
 0x798   :  { %2421 = vmatpush.msrb.mxu1 %v6166_v35  ;;  %2441 = vmatpush.msrb.mxu2 %v6167_v55 }
 0x799   :  { %2461 = vmatpush.msrb.mxu3 %v6168_v52  ;;  %2481 = vmatpush.msra.mxu0 %v6169_v51 }
 0x79a   :  { %2422 = vmatpush.msrb.mxu1 %v6170_v48  ;;  %2442 = vmatpush.msrb.mxu2 %v6171_v57 }
 0x79b   :  { %2462 = vmatpush.msrb.mxu3 %v6172_v5  ;;  %2482 = vmatpush.msra.mxu0 %v6173_v9 }
 0x79c   :  { %2423 = vmatpush.msrb.mxu1 %v6174_v12  ;;  %2443 = vmatpush.msrb.mxu2 %v6175_v13 }
 0x79d   :  { %2463 = vmatpush.msrb.mxu3 %v6176_v15  ;;  %2483 = vmatpush.msra.mxu0 %v6177_v44 }
 0x79e   :  { %2424 = vmatpush.msrb.mxu1 %v6178_v40  ;;  %2444 = vmatpush.msrb.mxu2 %v6179_v16 }
 0x79f   :  { %2464 = vmatpush.msrb.mxu3 %v6180_v7  ;;  %2484 = vmatpush.msra.mxu0 %v6181_v60  ;;  %v6194_v7 = vld [vmem:[#allocation84_spill] sm:$0xff] }
 0x7a0   :  { %2425 = vmatpush.msrb.mxu1 %v6182_v49  ;;  %2445 = vmatpush.msrb.mxu2 %v6183_v21 }
 0x7a1   :  { %2465 = vmatpush.msrb.mxu3 %v6184_v24  ;;  %2485 = vmatpush.msra.mxu0 %v6185_v3 }
 0x7fd   :  { %v2107_v14 = vpop.f32.mrf.mxu1 }
 0x7fe   :  { %v2108_v6 = vadd.f32 %v2107_v14, %v6191_v53  ;;  %v2167_v44 = vpop.f32.mrf.mxu0 }
 0x7ff   :  { %v2168_v60 = vadd.f32 %v2167_v44, %v6194_v7 }
 0x800   :  { %v3107_v34 = vmul.f32 -1.442695, %v2108_v6 }
 0x802   :  { %3297 = vpow2.f32 %v3107_v34 }
 0x803   :  { %v2127_v50 = vpop.f32.mrf.mxu2 }
 0x804   :  { %v2128_v59 = vadd.f32 %v2127_v50, %v6192_v54  ;;  %v2147_v61 = vpop.f32.mrf.mxu3 }
 0x805   :  { %v2148_v45 = vadd.f32 %v2147_v61, %v6193_v62 }
 0x806   :  { %v3108_v35 = vmul.f32 -1.442695, %v2128_v59 }
 0x807   :  { %v3109_v55 = vmul.f32 -1.442695, %v2148_v45 }
 0x808   :  { %v3298_v52 = vpop.eup %3297  ;;  %3299 = vpow2.f32 %v3108_v35 }
 0x809   :  { %v2179_v51 = vadd.f32 1.0, %v3298_v52  ;;  %3301 = vpow2.f32 %v3109_v55 }
 0x80b   :  { %3303 = vrcp.f32 %v2179_v51  ;;  %v2193_v3 = vand.u32 2147483648, %v2179_v51  ;;  %vm2187_vm10 = vweird.f32 %v2179_v51  ;;  %v2191_v53 = vand.u32 2147483647, %v2179_v51 }
 0x80d   :  { %v2194_v61 = vor.u32 1.1754944e-38, %v2193_v3  ;;  %vm2192_vm13 = vcmp.eq.f32.partialorder %v2191_v53, 8.507059e+37  ;;  %v5362_v3 = vld [vmem:[#allocation11 + $0xc0] sm:$0xff]  ;;  %v5368_v53 = vld [vmem:[#allocation11 + $0xd0] sm:$0xff] }
 0x80e   :  { %v3300_v48 = vpop.eup %3299  ;;  %6196 = vst [vmem:[#allocation95_spill] sm:$0xff] %v5368_v53 }
 0x80f   :  { %v3302_v57 = vpop.eup %3301  ;;  %v2180_v5 = vadd.f32 1.0, %v3300_v48 }
 0x810   :  { %v2181_v9 = vadd.f32 1.0, %v3302_v57 }
 0x811   :  { %v3304_v12 = vpop.eup %3303  ;;  %3305 = vrcp.f32 %v2180_v5  ;;  %v2208_v34 = vand.u32 2147483648, %v2180_v5  ;;  %v2206_v59 = vand.u32 2147483647, %v2180_v5  ;;  %vm2202_vm14 = vweird.f32 %v2180_v5 }
 0x812   :  { %v2183_v13 = vmul.f32 %v3304_v12, %v2179_v51  ;;  %3307 = vrcp.f32 %v2181_v9  ;;  %vm2188_vm9 = vweird.f32 %v3304_v12  ;;  %vm2217_vm2 = vweird.f32 %v2181_v9 }
 0x813   :  { %vm2189_vm11 = vmor %vm2187_vm10, %vm2188_vm9  ;;  %3309 = vtanh.f32 %v2168_v60  ;;  %v2209_v55 = vor.u32 1.1754944e-38, %v2208_v34  ;;  %vm2207_vm0 = vcmp.eq.f32.partialorder %v2206_v59, 8.507059e+37  ;;  %v5374_v34 = vld [vmem:[#allocation11 + $0xa0] sm:$0xff]  ;;  %v5383_v59 = vld [vmem:[#allocation11 + $0xb8] sm:$0xff] }
 0x814   :  { %v2184_v15 = vsub.f32 1.0, %v2183_v13  ;;  %6198 = vst [vmem:[#allocation97_spill] sm:$0xff] %v5374_v34 }
 0x815   :  { %6201 = vst [vmem:[#allocation67_spill] sm:$0xff] %v5383_v59 }
 0x816   :  { %v2185_v40 = vmul.f32 %v3304_v12, %v2184_v15 }
 0x817   :  { %v3306_v16 = vpop.eup %3305 }
 0x818   :  { %v3308_v49 = vpop.eup %3307  ;;  %v2186_v21 = vadd.f32 %v3304_v12, %v2185_v40  ;;  %v2198_v24 = vmul.f32 %v3306_v16, %v2180_v5  ;;  %vm2203_vm12 = vweird.f32 %v3306_v16  ;;  %v2223_v40 = vand.u32 2147483648, %v2181_v9 }
 0x819   :  { %v2213_v14 = vmul.f32 %v3308_v49, %v2181_v9  ;;  %vm2204_vm15 = vmor %vm2202_vm14, %vm2203_vm12  ;;  %v3310_v48 = vpop.eup %3309  ;;  %vm2218_vm1 = vweird.f32 %v3308_v49  ;;  %v2221_v5 = vand.u32 2147483647, %v2181_v9  ;;  %v5356_v9 = vld [vmem:[#allocation11 + $0xf0] sm:$0xff] }
 0x81a   :  { %v2199_v6 = vsub.f32 1.0, %v2198_v24  ;;  %v2190_v50 = vsel %vm2189_vm11, %v3304_v12, %v2186_v21  ;;  %vm2219_vm3 = vmor %vm2217_vm2, %vm2218_vm1  ;;  %v2224_v60 = vor.u32 1.1754944e-38, %v2223_v40  ;;  %v5422_v40 = vld [vmem:[#allocation11 + $0x20] sm:$0xff] }
 0x81b   :  { %v2214_v62 = vsub.f32 1.0, %v2213_v14  ;;  %v2195_v35 = vsel %vm2192_vm13, %v2194_v61, %v2190_v50  ;;  %vm2222_vm4 = vcmp.eq.f32.partialorder %v2221_v5, 8.507059e+37  ;;  %v5365_v14 = vld [vmem:[#allocation11 + $0xc8] sm:$0xff]  ;;  %v5386_v61 = vld [vmem:[#allocation11 + $0x80] sm:$0xff]  ;;  %6214 = vst [vmem:[#allocation58_spill] sm:$0xff] %v5422_v40 }
 0x81c   :  { %v2200_v54 = vmul.f32 %v3306_v16, %v2199_v6  ;;  %v2229_v13 = vmul.f32 %v3310_v48, %v2195_v35  ;;  %v5371_v6 = vld [vmem:[#allocation11 + $0xd8] sm:$0xff]  ;;  %v5377_v50 = vld [vmem:[#allocation11 + $0xa8] sm:$0xff]  ;;  %6202 = vst [vmem:[#allocation69_spill] sm:$0xff] %v5386_v61  ;;  %v5404_v48 = vld [vmem:[#allocation11 + $0x70] sm:$0xff] }
 0x81d   :  { %v2215_v57 = vmul.f32 %v3308_v49, %v2214_v62  ;;  %6197 = vst [vmem:[#allocation96_spill] sm:$0xff] %v5371_v6  ;;  %v5389_v62 = vld [vmem:[#allocation11 + $0x88] sm:$0xff]  ;;  %v5395_v35 = vld [vmem:[#allocation11 + $0x98] sm:$0xff] }
 0x81e   :  { %v2201_v45 = vadd.f32 %v3306_v16, %v2200_v54  ;;  %6199 = vst [vmem:[#allocation98_spill] sm:$0xff] %v5377_v50  ;;  %v5380_v54 = vld [vmem:[#allocation11 + $0xb0] sm:$0xff]  ;;  %v5425_v5 = vld [vmem:[#allocation11 + $0x28] sm:$0xff] }
 0x81f   :  { %v2216_v44 = vadd.f32 %v3308_v49, %v2215_v57  ;;  %6200 = vst [vmem:[#allocation99_spill] sm:$0xff] %v5380_v54  ;;  %v5410_v57 = vld [vmem:[#allocation11 + $0x40] sm:$0xff] }
 0x820   :  { %v2205_v52 = vsel %vm2204_vm15, %v3306_v16, %v2201_v45  ;;  %6203 = vst [vmem:[#allocation70_spill] sm:$0xff] %v5389_v62  ;;  %v5392_v45 = vld [vmem:[#allocation11 + $0x90] sm:$0xff] }
 0x821   :  { %v2210_v51 = vsel %vm2207_vm0, %v2209_v55, %v2205_v52  ;;  %v2220_v7 = vsel %vm2219_vm3, %v3308_v49, %v2216_v44  ;;  %v5359_v49 = vld [vmem:[#allocation11 + $0xf8] sm:$0xff]  ;;  %6204 = vst [vmem:[#allocation68_spill] sm:$0xff] %v5392_v45  ;;  %v5398_v55 = vld [vmem:[#allocation11 + $0x60] sm:$0xff]  ;;  %v5401_v52 = vld [vmem:[#allocation11 + $0x68] sm:$0xff] }
 0x822   :  { %v2228_v15 = vmul.f32 %v2210_v51, %v5179_v0  ;;  %v2225_v21 = vsel %vm2222_vm4, %v2224_v60, %v2220_v7  ;;  %v6195_v0 = vld [vmem:[#allocation56_spill] sm:$0xff]  ;;  %6205 = vst [vmem:[#allocation71_spill] sm:$0xff] %v5395_v35  ;;  %v5407_v51 = vld [vmem:[#allocation11 + $0x78] sm:$0xff]  ;;  %v5428_v7 = vld [vmem:[#allocation11 + $0x30] sm:$0xff] }
 0x823   :  { %6206 = vst [vmem:[#allocation73_spill] sm:$0xff] %v5398_v55  ;;  %v5419_v44 = vld [vmem:[#allocation11 + $0x58] sm:$0xff] }
 0x824   :  { %v5319_v12 = vadd.f32 %v2229_v13, %v2228_v15  ;;  %6207 = vst [vmem:[#allocation74_spill] sm:$0xff] %v5401_v52  ;;  %v5413_v13 = vld [vmem:[#allocation11 + $0x48] sm:$0xff]  ;;  %v5416_v15 = vld [vmem:[#allocation11 + $0x50] sm:$0xff]  ;;  %v5431_v60 = vld [vmem:[#allocation11 + $0x38] sm:$0xff] }
 0x825   :  { %6208 = vst [vmem:[#allocation72_spill] sm:$0xff] %v5404_v48 }
 0x826   :  { %3311 = vtanh.f32 %v5319_v12  ;;  %6209 = vst [vmem:[#allocation45_spill] sm:$0xff] %v5407_v51 }
 0x827   :  { %6210 = vst [vmem:[#allocation76_spill] sm:$0xff] %v5410_v57 }
 0x828   :  { %6211 = vst [vmem:[#allocation77_spill] sm:$0xff] %v5413_v13 }
 0x829   :  { %6212 = vst [vmem:[#allocation75_spill] sm:$0xff] %v5416_v15 }
 0x82a   :  { %6213 = vst [vmem:[#allocation57_spill] sm:$0xff] %v5419_v44 }
 0x82b   :  { %6215 = vst [vmem:[#allocation59_spill] sm:$0xff] %v5425_v5 }
 0x82c   :  { %v3312_v16 = vpop.eup %3311  ;;  %6216 = vst [vmem:[#allocation60_spill] sm:$0xff] %v5428_v7 }
 0x82d   :  { %v2232_v24 = vmul.f32 %v3312_v16, %v2225_v21  ;;  %6217 = vst [vmem:[#allocation22_spill] sm:$0xff] %v5431_v60  ;;  %v5434_v16 = vld [vmem:[#allocation11] sm:$0xff]  ;;  %v5437_v21 = vld [vmem:[#allocation11 + $0x8] sm:$0xff] }
 0x82e   :  { %6218 = vst [vmem:[#allocation46_spill] sm:$0xff] %v5434_v16 }
 0x82f   :  { %2266 = vmatmul.f32.vlgmr.msra.gmra.mxu1 %v2232_v24  ;;  %2286 = vmatmul.f32.vlgmr.msra.gmra.mxu2 %v2232_v24  ;;  %6219 = vst [vmem:[#allocation48_spill] sm:$0xff] %v5437_v21 }
 0x830   :  { %2306 = vmatmul.f32.vlgmr.msra.gmra.mxu3 %v2232_v24  ;;  %2326 = vmatmul.f32.vlgmr.msrb.gmra.mxu0 %v2232_v24  ;;  %v5440_v24 = vld [vmem:[#allocation11 + $0x10] sm:$0xff] }
 0x831   :  { %2570 = vmatpush.msra.mxu1 %v5182_v58  ;;  %2590 = vmatpush.msra.mxu2 %v5185_v26  ;;  %6220 = vst [vmem:[#allocation78_spill] sm:$0xff] %v5440_v24 }
 0x832   :  { %2610 = vmatpush.msra.mxu3 %v5188_v2  ;;  %2630 = vmatpush.msrb.mxu0 %v5191_v19 }
 0x833   :  { %2571 = vmatpush.msra.mxu1 %v5194_v29  ;;  %2591 = vmatpush.msra.mxu2 %v5197_v30 }
 0x834   :  { %2611 = vmatpush.msra.mxu3 %v5200_v41  ;;  %2631 = vmatpush.msrb.mxu0 %v5203_v46 }
 0x835   :  { %2572 = vmatpush.msra.mxu1 %v5206_v25  ;;  %2592 = vmatpush.msra.mxu2 %v5209_v27 }
 0x836   :  { %2612 = vmatpush.msra.mxu3 %v5212_v17  ;;  %2632 = vmatpush.msrb.mxu0 %v5215_v1 }
 0x837   :  { %2573 = vmatpush.msra.mxu1 %v5218_v47  ;;  %2593 = vmatpush.msra.mxu2 %v5221_v39 }
 0x838   :  { %2613 = vmatpush.msra.mxu3 %v5224_v22  ;;  %2633 = vmatpush.msrb.mxu0 %v5227_v23 }
 0x839   :  { %2574 = vmatpush.msra.mxu1 %v5230_v28  ;;  %2594 = vmatpush.msra.mxu2 %v5233_v56 }
 0x83a   :  { %2614 = vmatpush.msra.mxu3 %v5236_v31  ;;  %2634 = vmatpush.msrb.mxu0 %v5239_v8 }
 0x83b   :  { %2575 = vmatpush.msra.mxu1 %v5242_v20  ;;  %2595 = vmatpush.msra.mxu2 %v5245_v18 }
 0x83c   :  { %2615 = vmatpush.msra.mxu3 %v5248_v38  ;;  %2635 = vmatpush.msrb.mxu0 %v5251_v36 }
 0x83d   :  { %2576 = vmatpush.msra.mxu1 %v5254_v4  ;;  %2596 = vmatpush.msra.mxu2 %v5257_v33 }
 0x83e   :  { %2616 = vmatpush.msra.mxu3 %v5260_v32  ;;  %2636 = vmatpush.msrb.mxu0 %v6195_v0 }
 0x83f   :  { %2577 = vmatpush.msra.mxu1 %v5266_v42  ;;  %2597 = vmatpush.msra.mxu2 %v5269_v10 }
 0x840   :  { %2617 = vmatpush.msra.mxu3 %v5272_v43  ;;  %2637 = vmatpush.msrb.mxu0 %v5275_v11 }
 0x841   :  { %2578 = vmatpush.msra.mxu1 %v5278_v37  ;;  %2598 = vmatpush.msra.mxu2 %v5281_v63 }
 0x842   :  { %2618 = vmatpush.msra.mxu3 %v5356_v9  ;;  %2638 = vmatpush.msrb.mxu0 %v5359_v49 }
 0x843   :  { %2579 = vmatpush.msra.mxu1 %v5362_v3  ;;  %2599 = vmatpush.msra.mxu2 %v5365_v14 }
 0x844   :  { %2619 = vmatpush.msra.mxu3 %v5368_v53  ;;  %2639 = vmatpush.msrb.mxu0 %v5371_v6 }
 0x845   :  { %2580 = vmatpush.msra.mxu1 %v5374_v34  ;;  %2600 = vmatpush.msra.mxu2 %v5377_v50 }
 0x846   :  { %2620 = vmatpush.msra.mxu3 %v5380_v54  ;;  %2640 = vmatpush.msrb.mxu0 %v5383_v59 }
 0x847   :  { %2581 = vmatpush.msra.mxu1 %v5386_v61  ;;  %2601 = vmatpush.msra.mxu2 %v5389_v62 }
 0x848   :  { %2621 = vmatpush.msra.mxu3 %v5392_v45  ;;  %2641 = vmatpush.msrb.mxu0 %v5395_v35 }
 0x849   :  { %2582 = vmatpush.msra.mxu1 %v5398_v55  ;;  %2602 = vmatpush.msra.mxu2 %v5401_v52 }
 0x84a   :  { %2622 = vmatpush.msra.mxu3 %v5404_v48  ;;  %2642 = vmatpush.msrb.mxu0 %v5407_v51  ;;  %v6224_v51 = vld [vmem:[#allocation90_spill] sm:$0xff] }
 0x84b   :  { %2583 = vmatpush.msra.mxu1 %v5410_v57  ;;  %2603 = vmatpush.msra.mxu2 %v5413_v13  ;;  %v6223_v13 = vld [vmem:[#allocation89_spill] sm:$0xff] }
 0x84c   :  { %2623 = vmatpush.msra.mxu3 %v5416_v15  ;;  %2643 = vmatpush.msrb.mxu0 %v5419_v44 }
 0x84d   :  { %2584 = vmatpush.msra.mxu1 %v5422_v40  ;;  %2604 = vmatpush.msra.mxu2 %v5425_v5  ;;  %v5443_v5 = vld [vmem:[#allocation11 + $0x18] sm:$0xff] }
 0x84e   :  { %2624 = vmatpush.msra.mxu3 %v5428_v7  ;;  %2644 = vmatpush.msrb.mxu0 %v5431_v60  ;;  %6221 = vst [vmem:[#allocation47_spill] sm:$0xff] %v5443_v5  ;;  %v6222_v40 = vld [vmem:[#allocation87_spill] sm:$0xff] }
 0x84f   :  { %2585 = vmatpush.msra.mxu1 %v5434_v16  ;;  %2605 = vmatpush.msra.mxu2 %v5437_v21 }
 0x850   :  { %2625 = vmatpush.msra.mxu3 %v5440_v24  ;;  %2645 = vmatpush.msrb.mxu0 %v5443_v5 }
 0x8ac   :  { %v2267_v7 = vpop.f32.mrf.mxu1 }
 0x8ad   :  { %v2268_v44 = vadd.f32 %v2267_v7, %v6222_v40 }
 0x8af   :  { %v3110_v60 = vmul.f32 -1.442695, %v2268_v44 }
 0x8b1   :  { %3313 = vpow2.f32 %v3110_v60 }
 0x8b2   :  { %v2287_v15 = vpop.f32.mrf.mxu2 }
 0x8b3   :  { %v2288_v16 = vadd.f32 %v2287_v15, %v6223_v13  ;;  %v2307_v57 = vpop.f32.mrf.mxu3  ;;  %v2327_v13 = vpop.f32.mrf.mxu0 }
 0x8b4   :  { %v2308_v48 = vadd.f32 %v2307_v57, %v6224_v51  ;;  %v6225_v51 = vld [vmem:[#allocation88_spill] sm:$0xff] }
 0x8b5   :  { %v3111_v21 = vmul.f32 -1.442695, %v2288_v16  ;;  %v2328_v57 = vadd.f32 %v2327_v13, %v6225_v51 }
 0x8b6   :  { %v3112_v52 = vmul.f32 -1.442695, %v2308_v48 }
 0x8b7   :  { %v3314_v55 = vpop.eup %3313  ;;  %3315 = vpow2.f32 %v3111_v21 }
 0x8b8   :  { %v2339_v24 = vadd.f32 1.0, %v3314_v55  ;;  %3317 = vpow2.f32 %v3112_v52 }
 0x8ba   :  { %3319 = vrcp.f32 %v2339_v24  ;;  %v2353_v52 = vand.u32 2147483648, %v2339_v24  ;;  %vm2347_vm6 = vweird.f32 %v2339_v24  ;;  %v2351_v61 = vand.u32 2147483647, %v2339_v24 }
 0x8bc   :  { %vm2352_vm9 = vcmp.eq.f32.partialorder %v2351_v61, 8.507059e+37 }
 0x8bd   :  { %v3316_v35 = vpop.eup %3315 }
 0x8be   :  { %v3318_v5 = vpop.eup %3317  ;;  %v2340_v45 = vadd.f32 1.0, %v3316_v35 }
 0x8bf   :  { %v2341_v62 = vadd.f32 1.0, %v3318_v5 }
 0x8c0   :  { %v3320_v40 = vpop.eup %3319  ;;  %3321 = vrcp.f32 %v2340_v45  ;;  %v2368_v5 = vand.u32 2147483648, %v2340_v45  ;;  %vm2362_vm10 = vweird.f32 %v2340_v45 }
 0x8c1   :  { %v2343_v44 = vmul.f32 %v3320_v40, %v2339_v24  ;;  %3323 = vrcp.f32 %v2341_v62  ;;  %vm2348_vm5 = vweird.f32 %v3320_v40  ;;  %vm2377_vm14 = vweird.f32 %v2341_v62 }
 0x8c2   :  { %vm2349_vm7 = vmor %vm2347_vm6, %vm2348_vm5  ;;  %3325 = vtanh.f32 %v2328_v57  ;;  %v2369_v51 = vor.u32 1.1754944e-38, %v2368_v5  ;;  %v6234_v5 = vld [vmem:[#allocation68_spill] sm:$0xff] }
 0x8c3   :  { %v2344_v7 = vsub.f32 1.0, %v2343_v44  ;;  %v2366_v44 = vand.u32 2147483647, %v2340_v45 }
 0x8c5   :  { %v2345_v15 = vmul.f32 %v3320_v40, %v2344_v7  ;;  %v2354_v7 = vor.u32 1.1754944e-38, %v2353_v52  ;;  %vm2367_vm12 = vcmp.eq.f32.partialorder %v2366_v44, 8.507059e+37  ;;  %v2383_v52 = vand.u32 2147483648, %v2341_v62  ;;  %v6235_v44 = vld [vmem:[#allocation71_spill] sm:$0xff] }
 0x8c6   :  { %v3322_v60 = vpop.eup %3321 }
 0x8c7   :  { %v3324_v48 = vpop.eup %3323  ;;  %v2346_v16 = vadd.f32 %v3320_v40, %v2345_v15  ;;  %v2358_v55 = vmul.f32 %v3322_v60, %v2340_v45  ;;  %vm2363_vm8 = vweird.f32 %v3322_v60  ;;  %v2384_v61 = vor.u32 1.1754944e-38, %v2383_v52  ;;  %v6244_v52 = vld [vmem:[#allocation58_spill] sm:$0xff] }
 0x8c8   :  { %v2373_v21 = vmul.f32 %v3324_v48, %v2341_v62  ;;  %vm2364_vm11 = vmor %vm2362_vm10, %vm2363_vm8  ;;  %v3326_v6 = vpop.eup %3325  ;;  %vm2378_vm13 = vweird.f32 %v3324_v48 }
 0x8c9   :  { %v2359_v35 = vsub.f32 1.0, %v2358_v55  ;;  %v2350_v59 = vsel %vm2349_vm7, %v3320_v40, %v2346_v16  ;;  %vm2379_vm15 = vmor %vm2377_vm14, %vm2378_vm13 }
 0x8ca   :  { %v2374_v50 = vsub.f32 1.0, %v2373_v21  ;;  %v2355_v15 = vsel %vm2352_vm9, %v2354_v7, %v2350_v59  ;;  %v6232_v21 = vld [vmem:[#allocation69_spill] sm:$0xff] }
 0x8cb   :  { %v2360_v54 = vmul.f32 %v3322_v60, %v2359_v35  ;;  %v2389_v53 = vmul.f32 %v3326_v6, %v2355_v15  ;;  %v6228_v6 = vld [vmem:[#allocation97_spill] sm:$0xff]  ;;  %v6233_v35 = vld [vmem:[#allocation70_spill] sm:$0xff]  ;;  %v6238_v15 = vld [vmem:[#allocation72_spill] sm:$0xff] }
 0x8cc   :  { %v2375_v55 = vmul.f32 %v3324_v48, %v2374_v50  ;;  %v6229_v50 = vld [vmem:[#allocation98_spill] sm:$0xff]  ;;  %v6236_v7 = vld [vmem:[#allocation73_spill] sm:$0xff] }
 0x8cd   :  { %v2361_v13 = vadd.f32 %v3322_v60, %v2360_v54  ;;  %v2381_v54 = vand.u32 2147483647, %v2341_v62  ;;  %v6230_v62 = vld [vmem:[#allocation99_spill] sm:$0xff] }
 0x8ce   :  { %v2376_v16 = vadd.f32 %v3324_v48, %v2375_v55  ;;  %v6241_v55 = vld [vmem:[#allocation77_spill] sm:$0xff] }
 0x8cf   :  { %v2365_v34 = vsel %vm2364_vm11, %v3322_v60, %v2361_v13  ;;  %vm2382_vm0 = vcmp.eq.f32.partialorder %v2381_v54, 8.507059e+37  ;;  %v6237_v13 = vld [vmem:[#allocation74_spill] sm:$0xff]  ;;  %v6245_v54 = vld [vmem:[#allocation59_spill] sm:$0xff] }
 0x8d0   :  { %v2370_v24 = vsel %vm2367_vm12, %v2369_v51, %v2365_v34  ;;  %v2380_v59 = vsel %vm2379_vm15, %v3324_v48, %v2376_v16  ;;  %v6231_v48 = vld [vmem:[#allocation67_spill] sm:$0xff]  ;;  %v6239_v51 = vld [vmem:[#allocation45_spill] sm:$0xff] }
 0x8d1   :  { %v2388_v57 = vmul.f32 %v2370_v24, %v5319_v12  ;;  %v2385_v60 = vsel %vm2382_vm0, %v2384_v61, %v2380_v59  ;;  %v6226_v12 = vld [vmem:[#allocation95_spill] sm:$0xff]  ;;  %v6240_v24 = vld [vmem:[#allocation76_spill] sm:$0xff]  ;;  %v6243_v16 = vld [vmem:[#allocation57_spill] sm:$0xff] }
 0x8d2   :  { %v6246_v59 = vld [vmem:[#allocation60_spill] sm:$0xff]  ;;  %v6247_v61 = vld [vmem:[#allocation22_spill] sm:$0xff] }
 0x8d3   :  { %v5451_v40 = vadd.f32 %v2389_v53, %v2388_v57  ;;  %v6227_v53 = vld [vmem:[#allocation96_spill] sm:$0xff]  ;;  %v6242_v57 = vld [vmem:[#allocation75_spill] sm:$0xff] }
 0x8d5   :  { %3327 = vtanh.f32 %v5451_v40 }
 0x8db   :  { %v3328_v45 = vpop.eup %3327 }
 0x8dc   :  { %v2392_v34 = vmul.f32 %v3328_v45, %v2385_v60  ;;  %v6248_v45 = vld [vmem:[#allocation46_spill] sm:$0xff]  ;;  %v6249_v60 = vld [vmem:[#allocation48_spill] sm:$0xff] }
 0x8de   :  { %2426 = vmatmul.f32.vlgmr.msrb.gmra.mxu1 %v2392_v34  ;;  %2446 = vmatmul.f32.vlgmr.msrb.gmra.mxu2 %v2392_v34 }
 0x8df   :  { %2466 = vmatmul.f32.vlgmr.msrb.gmra.mxu3 %v2392_v34  ;;  %2486 = vmatmul.f32.vlgmr.msra.gmra.mxu0 %v2392_v34  ;;  %v6250_v34 = vld [vmem:[#allocation78_spill] sm:$0xff] }
 0x8e0   :  { %2730 = vmatpush.msrb.mxu1 %v5182_v58  ;;  %2750 = vmatpush.msrb.mxu2 %v5185_v26 }
 0x8e1   :  { %2770 = vmatpush.msrb.mxu3 %v5188_v2  ;;  %2790 = vmatpush.msra.mxu0 %v5191_v19 }
 0x8e2   :  { %2731 = vmatpush.msrb.mxu1 %v5194_v29  ;;  %2751 = vmatpush.msrb.mxu2 %v5197_v30 }
 0x8e3   :  { %2771 = vmatpush.msrb.mxu3 %v5200_v41  ;;  %2791 = vmatpush.msra.mxu0 %v5203_v46 }
 0x8e4   :  { %2732 = vmatpush.msrb.mxu1 %v5206_v25  ;;  %2752 = vmatpush.msrb.mxu2 %v5209_v27 }
 0x8e5   :  { %2772 = vmatpush.msrb.mxu3 %v5212_v17  ;;  %2792 = vmatpush.msra.mxu0 %v5215_v1 }
 0x8e6   :  { %2733 = vmatpush.msrb.mxu1 %v5218_v47  ;;  %2753 = vmatpush.msrb.mxu2 %v5221_v39 }
 0x8e7   :  { %2773 = vmatpush.msrb.mxu3 %v5224_v22  ;;  %2793 = vmatpush.msra.mxu0 %v5227_v23 }
 0x8e8   :  { %2734 = vmatpush.msrb.mxu1 %v5230_v28  ;;  %2754 = vmatpush.msrb.mxu2 %v5233_v56 }
 0x8e9   :  { %2774 = vmatpush.msrb.mxu3 %v5236_v31  ;;  %2794 = vmatpush.msra.mxu0 %v5239_v8 }
 0x8ea   :  { %2735 = vmatpush.msrb.mxu1 %v5242_v20  ;;  %2755 = vmatpush.msrb.mxu2 %v5245_v18 }
 0x8eb   :  { %2775 = vmatpush.msrb.mxu3 %v5248_v38  ;;  %2795 = vmatpush.msra.mxu0 %v5251_v36 }
 0x8ec   :  { %2736 = vmatpush.msrb.mxu1 %v5254_v4  ;;  %2756 = vmatpush.msrb.mxu2 %v5257_v33 }
 0x8ed   :  { %2776 = vmatpush.msrb.mxu3 %v5260_v32  ;;  %2796 = vmatpush.msra.mxu0 %v6195_v0 }
 0x8ee   :  { %2737 = vmatpush.msrb.mxu1 %v5266_v42  ;;  %2757 = vmatpush.msrb.mxu2 %v5269_v10 }
 0x8ef   :  { %2777 = vmatpush.msrb.mxu3 %v5272_v43  ;;  %2797 = vmatpush.msra.mxu0 %v5275_v11 }
 0x8f0   :  { %2738 = vmatpush.msrb.mxu1 %v5278_v37  ;;  %2758 = vmatpush.msrb.mxu2 %v5281_v63 }
 0x8f1   :  { %2778 = vmatpush.msrb.mxu3 %v5356_v9  ;;  %2798 = vmatpush.msra.mxu0 %v5359_v49 }
 0x8f2   :  { %2739 = vmatpush.msrb.mxu1 %v5362_v3  ;;  %2759 = vmatpush.msrb.mxu2 %v5365_v14 }
 0x8f3   :  { %2779 = vmatpush.msrb.mxu3 %v6226_v12  ;;  %2799 = vmatpush.msra.mxu0 %v6227_v53 }
 0x8f4   :  { %2740 = vmatpush.msrb.mxu1 %v6228_v6  ;;  %2760 = vmatpush.msrb.mxu2 %v6229_v50 }
 0x8f5   :  { %2780 = vmatpush.msrb.mxu3 %v6230_v62  ;;  %2800 = vmatpush.msra.mxu0 %v6231_v48 }
 0x8f6   :  { %2741 = vmatpush.msrb.mxu1 %v6232_v21  ;;  %2761 = vmatpush.msrb.mxu2 %v6233_v35 }
 0x8f7   :  { %2781 = vmatpush.msrb.mxu3 %v6234_v5  ;;  %2801 = vmatpush.msra.mxu0 %v6235_v44 }
 0x8f8   :  { %2742 = vmatpush.msrb.mxu1 %v6236_v7  ;;  %2762 = vmatpush.msrb.mxu2 %v6237_v13 }
 0x8f9   :  { %2782 = vmatpush.msrb.mxu3 %v6238_v15  ;;  %2802 = vmatpush.msra.mxu0 %v6239_v51  ;;  %v6253_v15 = vld [vmem:[#allocation93_spill] sm:$0xff] }
 0x8fa   :  { %2743 = vmatpush.msrb.mxu1 %v6240_v24  ;;  %2763 = vmatpush.msrb.mxu2 %v6241_v55  ;;  %v6251_v24 = vld [vmem:[#allocation47_spill] sm:$0xff] }
 0x8fb   :  { %2783 = vmatpush.msrb.mxu3 %v6242_v57  ;;  %2803 = vmatpush.msra.mxu0 %v6243_v16  ;;  %v6252_v57 = vld [vmem:[#allocation91_spill] sm:$0xff] }
 0x8fc   :  { %2744 = vmatpush.msrb.mxu1 %v6244_v52  ;;  %2764 = vmatpush.msrb.mxu2 %v6245_v54 }
 0x8fd   :  { %2784 = vmatpush.msrb.mxu3 %v6246_v59  ;;  %2804 = vmatpush.msra.mxu0 %v6247_v61  ;;  %v6254_v59 = vld [vmem:[#allocation94_spill] sm:$0xff] }
 0x8fe   :  { %2745 = vmatpush.msrb.mxu1 %v6248_v45  ;;  %2765 = vmatpush.msrb.mxu2 %v6249_v60 }
 0x8ff   :  { %2785 = vmatpush.msrb.mxu3 %v6250_v34  ;;  %2805 = vmatpush.msra.mxu0 %v6251_v24 }
 0x95b   :  { %v2427_v55 = vpop.f32.mrf.mxu1 }
 0x95c   :  { %v2428_v51 = vadd.f32 %v2427_v55, %v6252_v57 }
 0x95e   :  { %v3113_v16 = vmul.f32 -1.442695, %v2428_v51 }
 0x960   :  { %3329 = vpow2.f32 %v3113_v16 }
 0x961   :  { %v2447_v52 = vpop.f32.mrf.mxu2 }
 0x962   :  { %v2448_v54 = vadd.f32 %v2447_v52, %v6253_v15  ;;  %v2467_v13 = vpop.f32.mrf.mxu3  ;;  %v2487_v15 = vpop.f32.mrf.mxu0 }
 0x963   :  { %v2468_v7 = vadd.f32 %v2467_v13, %v6254_v59  ;;  %v6255_v13 = vld [vmem:[#allocation92_spill] sm:$0xff] }
 0x964   :  { %v3114_v61 = vmul.f32 -1.442695, %v2448_v54  ;;  %v2488_v54 = vadd.f32 %v2487_v15, %v6255_v13 }
 0x965   :  { %v3115_v44 = vmul.f32 -1.442695, %v2468_v7 }
 0x966   :  { %v3330_v45 = vpop.eup %3329  ;;  %3331 = vpow2.f32 %v3114_v61 }
 0x967   :  { %v2499_v60 = vadd.f32 1.0, %v3330_v45  ;;  %3333 = vpow2.f32 %v3115_v44 }
 0x969   :  { %3335 = vrcp.f32 %v2499_v60  ;;  %v2513_v44 = vand.u32 2147483648, %v2499_v60  ;;  %vm2507_vm2 = vweird.f32 %v2499_v60  ;;  %v2511_v21 = vand.u32 2147483647, %v2499_v60 }
 0x96b   :  { %vm2512_vm5 = vcmp.eq.f32.partialorder %v2511_v21, 8.507059e+37 }
 0x96c   :  { %v3332_v34 = vpop.eup %3331 }
 0x96d   :  { %v3334_v24 = vpop.eup %3333  ;;  %v2500_v5 = vadd.f32 1.0, %v3332_v34 }
 0x96e   :  { %v2501_v35 = vadd.f32 1.0, %v3334_v24 }
 0x96f   :  { %v3336_v55 = vpop.eup %3335  ;;  %3337 = vrcp.f32 %v2500_v5  ;;  %v2528_v24 = vand.u32 2147483648, %v2500_v5  ;;  %vm2522_vm6 = vweird.f32 %v2500_v5 }
 0x970   :  { %v2503_v51 = vmul.f32 %v3336_v55, %v2499_v60  ;;  %3339 = vrcp.f32 %v2501_v35  ;;  %vm2508_vm1 = vweird.f32 %v3336_v55  ;;  %vm2537_vm10 = vweird.f32 %v2501_v35 }
 0x971   :  { %vm2509_vm3 = vmor %vm2507_vm2, %vm2508_vm1  ;;  %3341 = vtanh.f32 %v2488_v54  ;;  %v2529_v13 = vor.u32 1.1754944e-38, %v2528_v24 }
 0x972   :  { %v2504_v57 = vsub.f32 1.0, %v2503_v51  ;;  %v2526_v51 = vand.u32 2147483647, %v2500_v5 }
 0x974   :  { %v2505_v16 = vmul.f32 %v3336_v55, %v2504_v57  ;;  %v2514_v57 = vor.u32 1.1754944e-38, %v2513_v44  ;;  %vm2527_vm8 = vcmp.eq.f32.partialorder %v2526_v51, 8.507059e+37  ;;  %v2543_v44 = vand.u32 2147483648, %v2501_v35 }
 0x975   :  { %v3338_v52 = vpop.eup %3337 }
 0x976   :  { %v3340_v7 = vpop.eup %3339  ;;  %v2506_v59 = vadd.f32 %v3336_v55, %v2505_v16  ;;  %v2518_v61 = vmul.f32 %v3338_v52, %v2500_v5  ;;  %vm2523_vm4 = vweird.f32 %v3338_v52  ;;  %v2544_v21 = vor.u32 1.1754944e-38, %v2543_v44 }
 0x977   :  { %v2533_v45 = vmul.f32 %v3340_v7, %v2501_v35  ;;  %vm2524_vm7 = vmor %vm2522_vm6, %vm2523_vm4  ;;  %v3342_v53 = vpop.eup %3341  ;;  %vm2538_vm9 = vweird.f32 %v3340_v7 }
 0x978   :  { %v2519_v34 = vsub.f32 1.0, %v2518_v61  ;;  %v2510_v48 = vsel %vm2509_vm3, %v3336_v55, %v2506_v59  ;;  %vm2539_vm11 = vmor %vm2537_vm10, %vm2538_vm9 }
 0x979   :  { %v2534_v50 = vsub.f32 1.0, %v2533_v45  ;;  %v2515_v16 = vsel %vm2512_vm5, %v2514_v57, %v2510_v48 }
 0x97a   :  { %v2520_v62 = vmul.f32 %v3338_v52, %v2519_v34  ;;  %v2549_v12 = vmul.f32 %v3342_v53, %v2515_v16  ;;  %v6285_v16 = vld [vmem:[#allocation24_spill] sm:$0xff] }
 0x97b   :  { %v2535_v61 = vmul.f32 %v3340_v7, %v2534_v50 }
 0x97c   :  { %v2521_v15 = vadd.f32 %v3338_v52, %v2520_v62  ;;  %v2541_v62 = vand.u32 2147483647, %v2501_v35 }
 0x97d   :  { %v2536_v59 = vadd.f32 %v3340_v7, %v2535_v61 }
 0x97e   :  { %v2525_v6 = vsel %vm2524_vm7, %v3338_v52, %v2521_v15  ;;  %vm2542_vm12 = vcmp.eq.f32.partialorder %v2541_v62, 8.507059e+37 }
 0x97f   :  { %v2530_v60 = vsel %vm2527_vm8, %v2529_v13, %v2525_v6  ;;  %v2540_v48 = vsel %vm2539_vm11, %v3340_v7, %v2536_v59 }
 0x980   :  { %v2548_v54 = vmul.f32 %v2530_v60, %v5451_v40  ;;  %v2545_v52 = vsel %vm2542_vm12, %v2544_v21, %v2540_v48 }
 0x982   :  { %v5523_v55 = vadd.f32 %v2549_v12, %v2548_v54 }
 0x984   :  { %3343 = vtanh.f32 %v5523_v55 }
 0x98a   :  { %v3344_v5 = vpop.eup %3343 }
 0x98b   :  { %v2552_v6 = vmul.f32 %v3344_v5, %v2545_v52 }
 0x98d   :  { %2586 = vmatmul.f32.vlgmr.msra.gmra.mxu1 %v2552_v6  ;;  %2606 = vmatmul.f32.vlgmr.msra.gmra.mxu2 %v2552_v6 }
 0x98e   :  { %2626 = vmatmul.f32.vlgmr.msra.gmra.mxu3 %v2552_v6  ;;  %2646 = vmatmul.f32.vlgmr.msrb.gmra.mxu0 %v2552_v6 }
 0x98f   :  { %2890 = vmatpush.msra.mxu1 %v5182_v58  ;;  %2910 = vmatpush.msra.mxu2 %v5185_v26  ;;  %v6256_v58 = vld [vmem:[#allocation95_spill] sm:$0xff]  ;;  %v6257_v26 = vld [vmem:[#allocation96_spill] sm:$0xff] }
 0x990   :  { %2930 = vmatpush.msra.mxu3 %v5188_v2  ;;  %2950 = vmatpush.msrb.mxu0 %v5191_v19  ;;  %v6258_v2 = vld [vmem:[#allocation97_spill] sm:$0xff]  ;;  %v6259_v19 = vld [vmem:[#allocation98_spill] sm:$0xff] }
 0x991   :  { %2891 = vmatpush.msra.mxu1 %v5194_v29  ;;  %2911 = vmatpush.msra.mxu2 %v5197_v30  ;;  %v6260_v29 = vld [vmem:[#allocation99_spill] sm:$0xff] }
 0x992   :  { %2931 = vmatpush.msra.mxu3 %v5200_v41  ;;  %2951 = vmatpush.msrb.mxu0 %v5203_v46  ;;  %v6261_v30 = vld [vmem:[#allocation67_spill] sm:$0xff]  ;;  %v6262_v41 = vld [vmem:[#allocation69_spill] sm:$0xff]  ;;  %v6263_v46 = vld [vmem:[#allocation70_spill] sm:$0xff] }
 0x993   :  { %2892 = vmatpush.msra.mxu1 %v5206_v25  ;;  %2912 = vmatpush.msra.mxu2 %v5209_v27  ;;  %v6264_v25 = vld [vmem:[#allocation68_spill] sm:$0xff]  ;;  %v6265_v27 = vld [vmem:[#allocation71_spill] sm:$0xff] }
 0x994   :  { %2932 = vmatpush.msra.mxu3 %v5212_v17  ;;  %2952 = vmatpush.msrb.mxu0 %v5215_v1  ;;  %v6266_v17 = vld [vmem:[#allocation73_spill] sm:$0xff]  ;;  %v6267_v1 = vld [vmem:[#allocation74_spill] sm:$0xff] }
 0x995   :  { %2893 = vmatpush.msra.mxu1 %v5218_v47  ;;  %2913 = vmatpush.msra.mxu2 %v5221_v39  ;;  %v6268_v47 = vld [vmem:[#allocation72_spill] sm:$0xff]  ;;  %v6269_v39 = vld [vmem:[#allocation45_spill] sm:$0xff] }
 0x996   :  { %2933 = vmatpush.msra.mxu3 %v5224_v22  ;;  %2953 = vmatpush.msrb.mxu0 %v5227_v23  ;;  %v6270_v22 = vld [vmem:[#allocation76_spill] sm:$0xff]  ;;  %v6271_v23 = vld [vmem:[#allocation77_spill] sm:$0xff] }
 0x997   :  { %2894 = vmatpush.msra.mxu1 %v5230_v28  ;;  %2914 = vmatpush.msra.mxu2 %v5233_v56  ;;  %v6272_v28 = vld [vmem:[#allocation75_spill] sm:$0xff]  ;;  %v6273_v56 = vld [vmem:[#allocation57_spill] sm:$0xff] }
 0x998   :  { %2934 = vmatpush.msra.mxu3 %v5236_v31  ;;  %2954 = vmatpush.msrb.mxu0 %v5239_v8  ;;  %v6274_v31 = vld [vmem:[#allocation58_spill] sm:$0xff]  ;;  %v6275_v8 = vld [vmem:[#allocation59_spill] sm:$0xff] }
 0x999   :  { %2895 = vmatpush.msra.mxu1 %v5242_v20  ;;  %2915 = vmatpush.msra.mxu2 %v5245_v18  ;;  %v6276_v20 = vld [vmem:[#allocation60_spill] sm:$0xff]  ;;  %v6277_v18 = vld [vmem:[#allocation22_spill] sm:$0xff] }
 0x99a   :  { %2935 = vmatpush.msra.mxu3 %v5248_v38  ;;  %2955 = vmatpush.msrb.mxu0 %v5251_v36  ;;  %v6278_v38 = vld [vmem:[#allocation46_spill] sm:$0xff]  ;;  %v6279_v36 = vld [vmem:[#allocation48_spill] sm:$0xff] }
 0x99b   :  { %2896 = vmatpush.msra.mxu1 %v5254_v4  ;;  %2916 = vmatpush.msra.mxu2 %v5257_v33  ;;  %v6280_v4 = vld [vmem:[#allocation78_spill] sm:$0xff]  ;;  %v6281_v33 = vld [vmem:[#allocation47_spill] sm:$0xff] }
 0x99c   :  { %2936 = vmatpush.msra.mxu3 %v5260_v32  ;;  %2956 = vmatpush.msrb.mxu0 %v6195_v0 }
 0x99d   :  { %2897 = vmatpush.msra.mxu1 %v5266_v42  ;;  %2917 = vmatpush.msra.mxu2 %v5269_v10 }
 0x99e   :  { %2937 = vmatpush.msra.mxu3 %v5272_v43  ;;  %2957 = vmatpush.msrb.mxu0 %v5275_v11  ;;  %v6283_v11 = vld [vmem:[#allocation25_spill] sm:$0xff] }
 0x99f   :  { %2898 = vmatpush.msra.mxu1 %v5278_v37  ;;  %2918 = vmatpush.msra.mxu2 %v5281_v63  ;;  %v6282_v63 = vld [vmem:[#allocation42_spill] sm:$0xff] }
 0x9a0   :  { %2938 = vmatpush.msra.mxu3 %v5356_v9  ;;  %2958 = vmatpush.msrb.mxu0 %v5359_v49  ;;  %v6284_v9 = vld [vmem:[#allocation26_spill] sm:$0xff] }
 0x9a1   :  { %2899 = vmatpush.msra.mxu1 %v5362_v3  ;;  %2919 = vmatpush.msra.mxu2 %v5365_v14 }
 0x9a2   :  { %2939 = vmatpush.msra.mxu3 %v6256_v58  ;;  %2959 = vmatpush.msrb.mxu0 %v6257_v26 }
 0x9a3   :  { %2900 = vmatpush.msra.mxu1 %v6258_v2  ;;  %2920 = vmatpush.msra.mxu2 %v6259_v19 }
 0x9a4   :  { %2940 = vmatpush.msra.mxu3 %v6260_v29  ;;  %2960 = vmatpush.msrb.mxu0 %v6261_v30 }
 0x9a5   :  { %2901 = vmatpush.msra.mxu1 %v6262_v41  ;;  %2921 = vmatpush.msra.mxu2 %v6263_v46 }
 0x9a6   :  { %2941 = vmatpush.msra.mxu3 %v6264_v25  ;;  %2961 = vmatpush.msrb.mxu0 %v6265_v27 }
 0x9a7   :  { %2902 = vmatpush.msra.mxu1 %v6266_v17  ;;  %2922 = vmatpush.msra.mxu2 %v6267_v1 }
 0x9a8   :  { %2942 = vmatpush.msra.mxu3 %v6268_v47  ;;  %2962 = vmatpush.msrb.mxu0 %v6269_v39 }
 0x9a9   :  { %2903 = vmatpush.msra.mxu1 %v6270_v22  ;;  %2923 = vmatpush.msra.mxu2 %v6271_v23 }
 0x9aa   :  { %2943 = vmatpush.msra.mxu3 %v6272_v28  ;;  %2963 = vmatpush.msrb.mxu0 %v6273_v56 }
 0x9ab   :  { %2904 = vmatpush.msra.mxu1 %v6274_v31  ;;  %2924 = vmatpush.msra.mxu2 %v6275_v8 }
 0x9ac   :  { %2944 = vmatpush.msra.mxu3 %v6276_v20  ;;  %2964 = vmatpush.msrb.mxu0 %v6277_v18  ;;  %v6286_v20 = vld [vmem:[#allocation43_spill] sm:$0xff] }
 0x9ad   :  { %2905 = vmatpush.msra.mxu1 %v6278_v38  ;;  %2925 = vmatpush.msra.mxu2 %v6279_v36 }
 0x9ae   :  { %2945 = vmatpush.msra.mxu3 %v6280_v4  ;;  %2965 = vmatpush.msrb.mxu0 %v6281_v33  ;;  %v6287_v4 = vld [vmem:[#allocation28_spill] sm:$0xff] }
 0xa0a   :  { %v2587_v32 = vpop.f32.mrf.mxu1 }
 0xa0b   :  { %v2588_v42 = vadd.f32 %v2587_v32, %v6282_v63  ;;  %v2647_v51 = vpop.f32.mrf.mxu0  ;;  %v6288_v63 = vld [vmem:[#allocation29_spill] sm:$0xff] }
 0xa0c   :  { %v2648_v13 = vadd.f32 %v2647_v51, %v6285_v16 }
 0xa0d   :  { %v3116_v10 = vmul.f32 -1.442695, %v2588_v42 }
 0xa0f   :  { %3345 = vpow2.f32 %v3116_v10 }
 0xa10   :  { %v2607_v43 = vpop.f32.mrf.mxu2 }
 0xa11   :  { %v2608_v37 = vadd.f32 %v2607_v43, %v6283_v11  ;;  %v2627_v0 = vpop.f32.mrf.mxu3 }
 0xa12   :  { %v2628_v49 = vadd.f32 %v2627_v0, %v6284_v9 }
 0xa13   :  { %v3117_v3 = vmul.f32 -1.442695, %v2608_v37 }
 0xa14   :  { %v3118_v14 = vmul.f32 -1.442695, %v2628_v49 }
 0xa15   :  { %v3346_v40 = vpop.eup %3345  ;;  %3347 = vpow2.f32 %v3117_v3 }
 0xa16   :  { %v2659_v12 = vadd.f32 1.0, %v3346_v40  ;;  %3349 = vpow2.f32 %v3118_v14 }
 0xa18   :  { %3351 = vrcp.f32 %v2659_v12  ;;  %v2673_v59 = vand.u32 2147483648, %v2659_v12  ;;  %vm2667_vm14 = vweird.f32 %v2659_v12  ;;  %v2671_v62 = vand.u32 2147483647, %v2659_v12 }
 0xa1a   :  { %v2674_v58 = vor.u32 1.1754944e-38, %v2673_v59  ;;  %vm2672_vm1 = vcmp.eq.f32.partialorder %v2671_v62, 8.507059e+37 }
 0xa1b   :  { %v3348_v53 = vpop.eup %3347 }
 0xa1c   :  { %v3350_v50 = vpop.eup %3349  ;;  %v2660_v35 = vadd.f32 1.0, %v3348_v53 }
 0xa1d   :  { %v2661_v7 = vadd.f32 1.0, %v3350_v50 }
 0xa1e   :  { %v3352_v45 = vpop.eup %3351  ;;  %3353 = vrcp.f32 %v2660_v35  ;;  %v2688_v21 = vand.u32 2147483648, %v2660_v35  ;;  %v2686_v6 = vand.u32 2147483647, %v2660_v35  ;;  %vm2682_vm2 = vweird.f32 %v2660_v35 }
 0xa1f   :  { %v2663_v34 = vmul.f32 %v3352_v45, %v2659_v12  ;;  %3355 = vrcp.f32 %v2661_v7  ;;  %vm2668_vm13 = vweird.f32 %v3352_v45  ;;  %v2703_v39 = vand.u32 2147483648, %v2661_v7 }
 0xa20   :  { %vm2669_vm15 = vmor %vm2667_vm14, %vm2668_vm13  ;;  %3357 = vtanh.f32 %v2648_v13  ;;  %v2689_v29 = vor.u32 1.1754944e-38, %v2688_v21  ;;  %vm2687_vm4 = vcmp.eq.f32.partialorder %v2686_v6, 8.507059e+37  ;;  %vm2697_vm6 = vweird.f32 %v2661_v7 }
 0xa21   :  { %v2664_v24 = vsub.f32 1.0, %v2663_v34  ;;  %v2701_v22 = vand.u32 2147483647, %v2661_v7  ;;  %v2704_v28 = vor.u32 1.1754944e-38, %v2703_v39 }
 0xa23   :  { %v2665_v57 = vmul.f32 %v3352_v45, %v2664_v24  ;;  %vm2702_vm8 = vcmp.eq.f32.partialorder %v2701_v22, 8.507059e+37 }
 0xa24   :  { %v3354_v15 = vpop.eup %3353 }
 0xa25   :  { %v3356_v60 = vpop.eup %3355  ;;  %v2666_v61 = vadd.f32 %v3352_v45, %v2665_v57  ;;  %v2678_v54 = vmul.f32 %v3354_v15, %v2660_v35  ;;  %vm2683_vm0 = vweird.f32 %v3354_v15 }
 0xa26   :  { %v2693_v44 = vmul.f32 %v3356_v60, %v2661_v7  ;;  %vm2684_vm3 = vmor %vm2682_vm2, %vm2683_vm0  ;;  %v3358_v41 = vpop.eup %3357  ;;  %vm2698_vm5 = vweird.f32 %v3356_v60  ;;  %v6289_v7 = vld [vmem:[#allocation27_spill] sm:$0xff] }
 0xa27   :  { %v2679_v48 = vsub.f32 1.0, %v2678_v54  ;;  %v2670_v5 = vsel %vm2669_vm15, %v3352_v45, %v2666_v61  ;;  %vm2699_vm7 = vmor %vm2697_vm6, %vm2698_vm5 }
 0xa28   :  { %v2694_v26 = vsub.f32 1.0, %v2693_v44  ;;  %v2675_v19 = vsel %vm2672_vm1, %v2674_v58, %v2670_v5 }
 0xa29   :  { %v2680_v52 = vmul.f32 %v3354_v15, %v2679_v48  ;;  %v2709_v27 = vmul.f32 %v3358_v41, %v2675_v19 }
 0xa2a   :  { %v2695_v25 = vmul.f32 %v3356_v60, %v2694_v26 }
 0xa2b   :  { %v2681_v2 = vadd.f32 %v3354_v15, %v2680_v52 }
 0xa2c   :  { %v2696_v47 = vadd.f32 %v3356_v60, %v2695_v25 }
 0xa2d   :  { %v2685_v30 = vsel %vm2684_vm3, %v3354_v15, %v2681_v2 }
 0xa2e   :  { %v2690_v46 = vsel %vm2687_vm4, %v2689_v29, %v2685_v30  ;;  %v2700_v23 = vsel %vm2699_vm7, %v3356_v60, %v2696_v47 }
 0xa2f   :  { %v2708_v17 = vmul.f32 %v2690_v46, %v5523_v55  ;;  %v2705_v31 = vsel %vm2702_vm8, %v2704_v28, %v2700_v23 }
 0xa31   :  { %v5595_v1 = vadd.f32 %v2709_v27, %v2708_v17 }
 0xa33   :  { %3359 = vtanh.f32 %v5595_v1 }
 0xa39   :  { %v3360_v56 = vpop.eup %3359 }
 0xa3a   :  { %v2712_v8 = vmul.f32 %v3360_v56, %v2705_v31  ;;  %v2883_v56 = vld [vmem:[#allocation1 + $0x9] sm:$0xff] }
 0xa3c   :  { %2746 = vmatmul.f32.vlgmr.msrb.gmra.mxu1 %v2712_v8  ;;  %2766 = vmatmul.f32.vlgmr.msrb.gmra.mxu2 %v2712_v8 }
 0xa3d   :  { %2786 = vmatmul.f32.vlgmr.msrb.gmra.mxu3 %v2712_v8  ;;  %2806 = vmatmul.f32.vlgmr.msra.gmra.mxu0 %v2712_v8 }
 0xab9   :  { %v2747_v55 = vpop.f32.mrf.mxu1 }
 0xaba   :  { %v2748_v18 = vadd.f32 %v2747_v55, %v6286_v20  ;;  %v2807_v53 = vpop.f32.mrf.mxu0  ;;  %v2884_v55 = vld [vmem:[#allocation1 + $0x12] sm:$0xff] }
 0xabb   :  { %v2808_v45 = vadd.f32 %v2807_v53, %v6289_v7 }
 0xabc   :  { %v3119_v38 = vmul.f32 -1.442695, %v2748_v18 }
 0xabe   :  { %3361 = vpow2.f32 %v3119_v38 }
 0xabf   :  { %v2767_v36 = vpop.f32.mrf.mxu2 }
 0xac0   :  { %v2768_v33 = vadd.f32 %v2767_v36, %v6287_v4  ;;  %v2787_v32 = vpop.f32.mrf.mxu3 }
 0xac1   :  { %v2788_v42 = vadd.f32 %v2787_v32, %v6288_v63 }
 0xac2   :  { %v3120_v10 = vmul.f32 -1.442695, %v2768_v33 }
 0xac3   :  { %v3121_v43 = vmul.f32 -1.442695, %v2788_v42 }
 0xac4   :  { %v3362_v11 = vpop.eup %3361  ;;  %3363 = vpow2.f32 %v3120_v10 }
 0xac5   :  { %v2819_v37 = vadd.f32 1.0, %v3362_v11  ;;  %3365 = vpow2.f32 %v3121_v43 }
 0xac7   :  { %3367 = vrcp.f32 %v2819_v37  ;;  %v2833_v57 = vand.u32 2147483648, %v2819_v37  ;;  %vm2827_vm10 = vweird.f32 %v2819_v37  ;;  %v2831_v16 = vand.u32 2147483647, %v2819_v37 }
 0xac9   :  { %v2834_v44 = vor.u32 1.1754944e-38, %v2833_v57  ;;  %vm2832_vm13 = vcmp.eq.f32.partialorder %v2831_v16, 8.507059e+37 }
 0xaca   :  { %v3364_v0 = vpop.eup %3363 }
 0xacb   :  { %v3366_v9 = vpop.eup %3365  ;;  %v2820_v49 = vadd.f32 1.0, %v3364_v0 }
 0xacc   :  { %v2821_v3 = vadd.f32 1.0, %v3366_v9  ;;  %v2885_v9 = vld [vmem:[#allocation1 + $0x1b] sm:$0xff] }
 0xacd   :  { %v3368_v14 = vpop.eup %3367  ;;  %3369 = vrcp.f32 %v2820_v49  ;;  %v2848_v60 = vand.u32 2147483648, %v2820_v49  ;;  %v2846_v59 = vand.u32 2147483647, %v2820_v49  ;;  %vm2842_vm14 = vweird.f32 %v2820_v49 }
 0xace   :  { %v2823_v40 = vmul.f32 %v3368_v14, %v2819_v37  ;;  %3371 = vrcp.f32 %v2821_v3  ;;  %vm2828_vm9 = vweird.f32 %v3368_v14  ;;  %v2863_v41 = vand.u32 2147483648, %v2821_v3 }
 0xacf   :  { %vm2829_vm11 = vmor %vm2827_vm10, %vm2828_vm9  ;;  %3373 = vtanh.f32 %v2808_v45  ;;  %v2849_v5 = vor.u32 1.1754944e-38, %v2848_v60  ;;  %vm2847_vm0 = vcmp.eq.f32.partialorder %v2846_v59, 8.507059e+37  ;;  %vm2857_vm2 = vweird.f32 %v2821_v3 }
 0xad0   :  { %v2824_v12 = vsub.f32 1.0, %v2823_v40  ;;  %v2861_v46 = vand.u32 2147483647, %v2821_v3  ;;  %v2864_v27 = vor.u32 1.1754944e-38, %v2863_v41 }
 0xad2   :  { %v2825_v50 = vmul.f32 %v3368_v14, %v2824_v12  ;;  %vm2862_vm4 = vcmp.eq.f32.partialorder %v2861_v46, 8.507059e+37 }
 0xad3   :  { %v3370_v35 = vpop.eup %3369 }
 0xad4   :  { %v3372_v34 = vpop.eup %3371  ;;  %v2826_v24 = vadd.f32 %v3368_v14, %v2825_v50  ;;  %v2838_v51 = vmul.f32 %v3370_v35, %v2820_v49  ;;  %vm2843_vm12 = vweird.f32 %v3370_v35 }
 0xad5   :  { %v2853_v15 = vmul.f32 %v3372_v34, %v2821_v3  ;;  %vm2844_vm15 = vmor %vm2842_vm14, %vm2843_vm12  ;;  %v3374_v6 = vpop.eup %3373  ;;  %vm2858_vm1 = vweird.f32 %v3372_v34 }
 0xad6   :  { %v2839_v13 = vsub.f32 1.0, %v2838_v51  ;;  %v2830_v61 = vsel %vm2829_vm11, %v3368_v14, %v2826_v24  ;;  %vm2859_vm3 = vmor %vm2857_vm2, %vm2858_vm1 }
 0xad7   :  { %v2854_v62 = vsub.f32 1.0, %v2853_v15  ;;  %v2835_v21 = vsel %vm2832_vm13, %v2834_v44, %v2830_v61 }
 0xad8   :  { %v2840_v54 = vmul.f32 %v3370_v35, %v2839_v13  ;;  %v2869_v2 = vmul.f32 %v3374_v6, %v2835_v21 }
 0xad9   :  { %v2855_v26 = vmul.f32 %v3372_v34, %v2854_v62 }
 0xada   :  { %v2841_v48 = vadd.f32 %v3370_v35, %v2840_v54 }
 0xadb   :  { %v2856_v30 = vadd.f32 %v3372_v34, %v2855_v26 }
 0xadc   :  { %v2845_v52 = vsel %vm2844_vm15, %v3370_v35, %v2841_v48 }
 0xadd   :  { %v2850_v58 = vsel %vm2847_vm0, %v2849_v5, %v2845_v52  ;;  %v2860_v25 = vsel %vm2859_vm3, %v3372_v34, %v2856_v30 }
 0xade   :  { %v2868_v19 = vmul.f32 %v2850_v58, %v5595_v1  ;;  %v2865_v47 = vsel %vm2862_vm4, %v2864_v27, %v2860_v25  ;;  %v2882_v1 = vld [vmem:[#allocation1] sm:$0xff] }
 0xae0   :  { %v5603_v29 = vadd.f32 %v2869_v2, %v2868_v19 }
 0xae2   :  { %3375 = vtanh.f32 %v5603_v29 }
 0xae8   :  { %v3376_v17 = vpop.eup %3375 }
 0xae9   :  { %v2872_v39 = vmul.f32 %v3376_v17, %v2865_v47 }
 0xaeb   :  { %2906 = vmatmul.f32.vlgmr.msra.gmra.mxu1 %v2872_v39  ;;  %2926 = vmatmul.f32.vlgmr.msra.gmra.mxu2 %v2872_v39 }
 0xaec   :  { %2946 = vmatmul.f32.vlgmr.msra.gmra.mxu3 %v2872_v39  ;;  %2966 = vmatmul.f32.vlgmr.msrb.gmra.mxu0 %v2872_v39 }
 0xb68   :  { %v2907_v22 = vpop.f32.mrf.mxu1 }
 0xb69   :  { %v2908_v23 = vadd.f32 %v2907_v22, %v2882_v1  ;;  %v2967_v0 = vpop.f32.mrf.mxu0 }
 0xb6a   :  { %v2968_v14 = vadd.f32 %v2967_v0, %v2885_v9 }
 0xb6b   :  { %v3122_v28 = vmul.f32 -1.442695, %v2908_v23 }
 0xb6d   :  { %3377 = vpow2.f32 %v3122_v28 }
 0xb6e   :  { %v2927_v31 = vpop.f32.mrf.mxu2 }
 0xb6f   :  { %v2928_v8 = vadd.f32 %v2927_v31, %v2883_v56  ;;  %v2947_v20 = vpop.f32.mrf.mxu3 }
 0xb70   :  { %v2948_v18 = vadd.f32 %v2947_v20, %v2884_v55 }
 0xb71   :  { %v3123_v38 = vmul.f32 -1.442695, %v2928_v8 }
 0xb72   :  { %v3124_v36 = vmul.f32 -1.442695, %v2948_v18 }
 0xb73   :  { %v3378_v4 = vpop.eup %3377  ;;  %3379 = vpow2.f32 %v3123_v38 }
 0xb74   :  { %v2979_v33 = vadd.f32 1.0, %v3378_v4  ;;  %3381 = vpow2.f32 %v3124_v36 }
 0xb76   :  { %3383 = vrcp.f32 %v2979_v33  ;;  %v2993_v50 = vand.u32 2147483648, %v2979_v33  ;;  %vm2987_vm6 = vweird.f32 %v2979_v33  ;;  %v2991_v7 = vand.u32 2147483647, %v2979_v33 }
 0xb78   :  { %v2994_v15 = vor.u32 1.1754944e-38, %v2993_v50  ;;  %vm2992_vm9 = vcmp.eq.f32.partialorder %v2991_v7, 8.507059e+37 }
 0xb79   :  { %v3380_v32 = vpop.eup %3379 }
 0xb7a   :  { %v3382_v63 = vpop.eup %3381  ;;  %v2980_v42 = vadd.f32 1.0, %v3380_v32 }
 0xb7b   :  { %v2981_v10 = vadd.f32 1.0, %v3382_v63 }
 0xb7c   :  { %v3384_v43 = vpop.eup %3383  ;;  %3385 = vrcp.f32 %v2980_v42  ;;  %v3008_v34 = vand.u32 2147483648, %v2980_v42  ;;  %v3006_v57 = vand.u32 2147483647, %v2980_v42  ;;  %vm3002_vm10 = vweird.f32 %v2980_v42 }
 0xb7d   :  { %v2983_v11 = vmul.f32 %v3384_v43, %v2979_v33  ;;  %3387 = vrcp.f32 %v2981_v10  ;;  %vm2988_vm5 = vweird.f32 %v3384_v43  ;;  %v3023_v6 = vand.u32 2147483648, %v2981_v10 }
 0xb7e   :  { %vm2989_vm7 = vmor %vm2987_vm6, %vm2988_vm5  ;;  %3389 = vtanh.f32 %v2968_v14  ;;  %v3009_v61 = vor.u32 1.1754944e-38, %v3008_v34  ;;  %vm3007_vm12 = vcmp.eq.f32.partialorder %v3006_v57, 8.507059e+37  ;;  %vm3017_vm14 = vweird.f32 %v2981_v10 }
 0xb7f   :  { %v2984_v37 = vsub.f32 1.0, %v2983_v11  ;;  %v3021_v58 = vand.u32 2147483647, %v2981_v10  ;;  %v3024_v2 = vor.u32 1.1754944e-38, %v3023_v6 }
 0xb81   :  { %v2985_v49 = vmul.f32 %v3384_v43, %v2984_v37  ;;  %vm3022_vm0 = vcmp.eq.f32.partialorder %v3021_v58, 8.507059e+37 }
 0xb82   :  { %v3386_v3 = vpop.eup %3385 }
 0xb83   :  { %v3388_v40 = vpop.eup %3387  ;;  %v2986_v12 = vadd.f32 %v3384_v43, %v2985_v49  ;;  %v2998_v53 = vmul.f32 %v3386_v3, %v2980_v42  ;;  %vm3003_vm8 = vweird.f32 %v3386_v3 }
 0xb84   :  { %v3013_v35 = vmul.f32 %v3388_v40, %v2981_v10  ;;  %vm3004_vm11 = vmor %vm3002_vm10, %vm3003_vm8  ;;  %v3390_v59 = vpop.eup %3389  ;;  %vm3018_vm13 = vweird.f32 %v3388_v40 }
 0xb85   :  { %v2999_v45 = vsub.f32 1.0, %v2998_v53  ;;  %v2990_v24 = vsel %vm2989_vm7, %v3384_v43, %v2986_v12  ;;  %vm3019_vm15 = vmor %vm3017_vm14, %vm3018_vm13 }
 0xb86   :  { %v3014_v16 = vsub.f32 1.0, %v3013_v35  ;;  %v2995_v60 = vsel %vm2992_vm9, %v2994_v15, %v2990_v24 }
 0xb87   :  { %v3000_v51 = vmul.f32 %v3386_v3, %v2999_v45  ;;  %v3029_v48 = vmul.f32 %v3390_v59, %v2995_v60 }
 0xb88   :  { %v3015_v62 = vmul.f32 %v3388_v40, %v3014_v16 }
 0xb89   :  { %v3001_v13 = vadd.f32 %v3386_v3, %v3000_v51 }
 0xb8a   :  { %v3016_v52 = vadd.f32 %v3388_v40, %v3015_v62 }
 0xb8b   :  { %v3005_v54 = vsel %vm3004_vm11, %v3386_v3, %v3001_v13 }
 0xb8c   :  { %v3010_v44 = vsel %vm3007_vm12, %v3009_v61, %v3005_v54  ;;  %v3020_v26 = vsel %vm3019_vm15, %v3388_v40, %v3016_v52 }
 0xb8d   :  { %v3028_v21 = vmul.f32 %v3010_v44, %v5603_v29  ;;  %v3025_v30 = vsel %vm3022_vm0, %v3024_v2, %v3020_v26 }
 0xb8f   :  { %v3030_v5 = vadd.f32 %v3029_v48, %v3028_v21 }
 0xb91   :  { %3391 = vtanh.f32 %v3030_v5 }
 0xb97   :  { %v3392_v19 = vpop.eup %3391 }
 0xb98   :  { %v3032_v29 = vmul.f32 %v3392_v19, %v3025_v30 }
 0xb9a   :  { %3033 = vst [vmem:[#allocation15] sm:$0x3] %v3032_v29 }
 0xb9b   :  { %3057 = dma.vmem_to_hbm [thread:$0]  %s3053_s26, 32, %s3055_s29, [#allocation16]  }
 0xb9c   :  { %3695 = dma.done.wait [#allocation7], 256  }
 0xb9d   :  { %3696 = vsyncadd [#allocation7], 4294967040 }
 0xb9e   :  { %3697 = dma.done.wait [#allocation16], 32  }
 0xb9f   :  { %3698 = vsyncadd [#allocation16], 4294967264 }
 0xba0   :  { %3066 = vsyncpa [#allocation6], 1 }
 0xba1   :  { %3067 = vsyncpa [#allocation9], 1 }
 0xba2   :  { %3068 = vsyncpa [#allocation12], 1 }
 0xba3   :  { %3069 = vsyncpa [#allocation7], 1 }
 0xba4   :  { %3070 = vsyncpa [#allocation16], 1 }

</bundles_post_ra>
